<compile_context>
chip_gen: v6e
topology: v6e:2x2x1
jax: 0.10.0
libtpu: 0.0.40
codegen_flags: <defaults>
</compile_context>

<pallas_src>
import math

import jax
import jax.numpy as jnp
from jax import lax
from jax.experimental import pallas as pl
from jax.experimental.pallas import tpu as pltpu

MANO_OUT = 3 * 2 + 15 * 3 + 10 + 3                  # = 64
HEAD_W = ((2 * MANO_OUT + 3 + 127) // 128) * 128    # 256: lane-dense head width


def init_regressor_kernel(xp_ref, w1_ref, b1_ref, w2_ref, b2_ref,
                          wh_ref, bh_ref, out_ref):
  """One grid step == one batch tile of BT elements."""
  BT, Hp, Wp, C = xp_ref.shape             # (BT, H+2, W+2, C), bf16 in VMEM
  H, W = Hp - 2, Wp - 2
  HW = H * W

  xp = xp_ref[...]                          # bf16; no f32 upcast (review #2)

  # Hoist the dx (sublane-axis) shift out of the tap loop: 3 shifted slabs
  # instead of 9 shifted windows (review #3), fused along channels so each
  # dy tap is ONE matmul with K = 3*C (review #4).
  slabs = [xp[:, :, dx:dx + W, :] for dx in range(3)]       # 3 x (BT, H+2, W, C)
  x2d = slabs[1][:, 1:H + 1, :, :].reshape(BT * HW, C)      # unpadded features
  xcat = jnp.concatenate(slabs, axis=-1)                    # (BT, H+2, W, 3C)

  # 3x3 conv (left|right branches fused along output channels) as 3
  # accumulated K=3C matmuls; dy windows are free leading-dim slices.
  acc = None
  for dy in range(3):
    win = xcat[:, dy:dy + H, :, :].reshape(BT * HW, 3 * C)
    part = jnp.dot(win, w1_ref[dy], preferred_element_type=jnp.float32)
    acc = part if acc is None else acc + part               # init from tap 0 (#8)

  # BatchNorm + conv bias already folded into w1/b1; ReLU.
  h = jnp.maximum(acc + b1_ref[...], 0.0)                   # (BT*HW, 2*C2) f32

  # Fused block-diagonal 1x1 convs -> 3 attention logit columns (bf16 MXU, #6).
  logits = jnp.dot(h.astype(jnp.bfloat16), w2_ref[...],
                   preferred_element_type=jnp.float32) + b2_ref[...]
  attn = 0.5 * jnp.tanh(0.5 * logits) + 0.5                 # sigmoid via EUP tanh

  # Per batch element: normalize each attention column by its spatial sum
  # (+1e-8, matching the reference; column 2 is constant 0.5 -> mean pool),
  # then pool all three columns with one (3, HW) @ (HW, C) MXU pass.
  pooled_rows = []
  for b in range(BT):
    a_b = attn[b * HW:(b + 1) * HW, :]                      # (HW, 3) f32
    x_b = x2d[b * HW:(b + 1) * HW, :]                       # (HW, C) bf16
    inv = pl.reciprocal(jnp.sum(a_b, axis=0, keepdims=True) + 1e-8, approx=True)
    a_n = (a_b * inv).astype(jnp.bfloat16)                  # normalized weights
    pooled_rows.append(
        lax.dot_general(a_n, x_b, (((0,), (0,)), ((), ())),
                        preferred_element_type=jnp.float32))   # (3, C)
  pooled = jnp.concatenate(pooled_rows, axis=0)             # (BT*3, C) f32

  # Fused Linear heads: (BT*3, C) @ (C, 256), lane-dense 256-wide rows.
  heads = jnp.dot(pooled.astype(jnp.bfloat16), wh_ref[...],
                  preferred_element_type=jnp.float32)       # (BT*3, HEAD_W)
  for b in range(BT):
    out_ref[b] = heads[b * 3:(b + 1) * 3, :] + bh_ref[...]


def make_params(key, feat_dim):
  """Deterministic synthetic parameters matching InitRegressor.__init__/init_weights."""
  C = feat_dim
  C2 = C // 2
  ks = jax.random.split(key, 14)

  def conv3(k):                      # Conv2d(C, C//2, 3): std = sqrt(2/(3*3*out))
    return jax.random.normal(k, (3, 3, C, C2), jnp.float32) * math.sqrt(2.0 / (9 * C2))

  def conv1(k):                      # Conv2d(C//2, 1, 1): std = sqrt(2/1)
    return jax.random.normal(k, (C2, 1), jnp.float32) * math.sqrt(2.0)

  def unif(k, shape, fan_in):        # PyTorch default bias init
    b = 1.0 / math.sqrt(fan_in)
    return jax.random.uniform(k, shape, jnp.float32, -b, b)

  def lin(k, out):                   # Linear weight, std = 0.001 (stored (in, out))
    return jax.random.normal(k, (C, out), jnp.float32) * 0.001

  bn = dict(gamma=jnp.ones((C2,), jnp.float32), beta=jnp.zeros((C2,), jnp.float32),
            mean=jnp.zeros((C2,), jnp.float32), var=jnp.ones((C2,), jnp.float32))

  return dict(
      w1l=conv3(ks[0]), b1l=unif(ks[1], (C2,), 9 * C), bnl=bn,
      w2l=conv1(ks[2]), b2l=unif(ks[3], (1,), C2),
      w1r=conv3(ks[4]), b1r=unif(ks[5], (C2,), 9 * C), bnr=bn,
      w2r=conv1(ks[6]), b2r=unif(ks[7], (1,), C2),
      wml=lin(ks[8], MANO_OUT), bml=unif(ks[9], (MANO_OUT,), C),
      wmr=lin(ks[10], MANO_OUT), bmr=unif(ks[11], (MANO_OUT,), C),
      wof=lin(ks[12], 3), bof=unif(ks[13], (3,), C),
  )


def _fuse_params(params, C):
  """Trace-time folding/fusion: BN+bias into conv, left|right branch fusion,
  dx-tap fusion along K, block-diagonal 1x1 conv, fused lane-dense heads."""
  C2 = C // 2
  eps = 1e-5

  def fold(w1, b1, bn):              # fold inference BN into conv weight/bias
    s = bn['gamma'] / jnp.sqrt(bn['var'] + eps)             # (C2,)
    return w1 * s, (b1 - bn['mean']) * s + bn['beta']

  w1l, b1l = fold(params['w1l'], params['b1l'], params['bnl'])
  w1r, b1r = fold(params['w1r'], params['b1r'], params['bnr'])
  # (3,3,C,2*C2) -> (3, 3*C, 2*C2): per-dy weight with contraction ordered
  # (dx, c), matching the in-kernel dx-concatenated slabs.
  w1 = jnp.concatenate([w1l, w1r], axis=-1).reshape(3, 3 * C, 2 * C2)
  w1 = w1.astype(jnp.bfloat16)
  b1 = jnp.concatenate([b1l, b1r]).reshape(1, 2 * C2)

  # Block-diagonal fused 1x1 conv; third column all-zero -> constant 0.5
  # attention column which after normalization equals the mean pool.
  w2 = jnp.zeros((2 * C2, 3), jnp.float32)
  w2 = w2.at[:C2, 0].set(params['w2l'][:, 0]).at[C2:, 1].set(params['w2r'][:, 0])
  w2 = w2.astype(jnp.bfloat16)
  b2 = jnp.zeros((1, 3), jnp.float32)
  b2 = b2.at[0, 0].set(params['b2l'][0]).at[0, 1].set(params['b2r'][0])

  # Fused heads padded to a 256-wide lane-dense output row.
  wh = jnp.zeros((C, HEAD_W), jnp.float32)
  wh = wh.at[:, :MANO_OUT].set(params['wml'])
  wh = wh.at[:, MANO_OUT:2 * MANO_OUT].set(params['wmr'])
  wh = wh.at[:, 2 * MANO_OUT:2 * MANO_OUT + 3].set(params['wof'])
  wh = wh.astype(jnp.bfloat16)
  bh = jnp.zeros((3, HEAD_W), jnp.float32)
  bh = bh.at[0, :MANO_OUT].set(params['bml'])
  bh = bh.at[1, MANO_OUT:2 * MANO_OUT].set(params['bmr'])
  bh = bh.at[2, 2 * MANO_OUT:2 * MANO_OUT + 3].set(params['bof'])
  return w1, b1, w2, b2, wh, bh


def init_regressor_forward(feat_nchw, params, batch_tile=8):
  """feat_nchw: (B, C, H, W) float32, same convention as the PyTorch module."""
  B, C, H, W = feat_nchw.shape
  C2 = C // 2
  BT = min(batch_tile, B)
  Bp = -(-B // BT) * BT                       # batch padded to a BT multiple

  w1, b1, w2, b2, wh, bh = _fuse_params(params, C)

  # NCHW -> NHWC (channels on lanes), pad batch + 3x3 halo, cast to bf16.
  # This is the only wrapper-side pass over the feature map (no im2col).
  xp = jnp.pad(jnp.transpose(feat_nchw, (0, 2, 3, 1)),
               ((0, Bp - B), (1, 1), (1, 1), (0, 0))).astype(jnp.bfloat16)

  out = pl.pallas_call(
      init_regressor_kernel,
      grid=(Bp // BT,),
      in_specs=[
          pl.BlockSpec((BT, H + 2, W + 2, C), lambda b: (b, 0, 0, 0)),
          pl.BlockSpec((3, 3 * C, 2 * C2), lambda b: (0, 0, 0)),
          pl.BlockSpec((1, 2 * C2), lambda b: (0, 0)),
          pl.BlockSpec((2 * C2, 3), lambda b: (0, 0)),
          pl.BlockSpec((1, 3), lambda b: (0, 0)),
          pl.BlockSpec((C, HEAD_W), lambda b: (0, 0)),
          pl.BlockSpec((3, HEAD_W), lambda b: (0, 0)),
      ],
      out_specs=pl.BlockSpec((BT, 3, HEAD_W), lambda b: (b, 0, 0)),
      out_shape=jax.ShapeDtypeStruct((Bp, 3, HEAD_W), jnp.float32),
      compiler_params=pltpu.CompilerParams(
          # TODO(synk): on v7x use pltpu.CORE_PARALLEL (grid extent divisible
          # by 2) to guarantee the batch-tile axis splits across both TCs.
          dimension_semantics=("parallel",),
          vmem_limit_bytes=48 * 1024 * 1024),
  )(xp, w1, b1, w2, b2, wh, bh)

  out = out[:B]
  mano_para_left = out[:, 0, :MANO_OUT]
  mano_para_right = out[:, 1, MANO_OUT:2 * MANO_OUT]
  pd_offset = out[:, 2, 2 * MANO_OUT:2 * MANO_OUT + 3]

  # torch.split(mano_para, [6 + 15*3, 10, 3], dim=-1)
  pd_mano_pose_left = mano_para_left[:, :51]
  pd_mano_beta_left = mano_para_left[:, 51:61]
  para_left = mano_para_left[:, 61:64]
  pd_mano_pose_right = mano_para_right[:, :51]
  pd_mano_beta_right = mano_para_right[:, 51:61]
  para_right = mano_para_right[:, 61:64]

  # TODO(synk): MANO mesh/joint regression and projection_batch_xy require
  # external MANO assets; the corresponding outputs stay None.
  return {
      'pd_rel_joint': None,
      'pd_offset': pd_offset,
      'pd_mano_pose_left': pd_mano_pose_left,
      'pd_mano_pose_right': pd_mano_pose_right,
      'pd_mano_beta_left': pd_mano_beta_left,
      'pd_mano_beta_right': pd_mano_beta_right,
      'pd_proj_left': para_left,
      'pd_proj_right': para_right,
      'pd_mano_para_left': mano_para_left,
      'pd_mano_para_right': mano_para_right,
      'pd_joint_uv_left': None,
      'pd_joint_uv_right': None,
      'pd_mesh_uv_left': None,
      'pd_mesh_uv_right': None,
      'pd_joint_xyz_left': None,
      'pd_joint_xyz_right': None,
      'pd_mesh_xyz_left': None,
      'pd_mesh_xyz_right': None,
      'pd_var_left': None,
      'pd_var_right': None,
      'rel_joint_right': None,
  }


def init_regressor_reference(feat, params):
  """Pure-JAX f32 reference of the attention pooling + heads (tolerance check)."""
  eps = 1e-5

  def branch(w1, b1, bn, w2, b2):
    y = lax.conv_general_dilated(feat, w1, (1, 1), 'SAME',
                                 dimension_numbers=('NCHW', 'HWIO', 'NCHW'))
    y = y + b1[None, :, None, None]
    scale = bn['gamma'] / jnp.sqrt(bn['var'] + eps)
    y = (y - bn['mean'][None, :, None, None]) * scale[None, :, None, None] \
        + bn['beta'][None, :, None, None]
    y = jnp.maximum(y, 0.0)
    logits = jnp.einsum('bchw,co->bohw', y, w2) + b2[None, :, None, None]
    return jax.nn.sigmoid(logits)                        # (B,1,H,W)

  def pool(attn):
    num = (feat * attn).sum((-2, -1))                    # (B,C)
    den = attn.sum((-2, -1)) + 1e-8                      # (B,1)
    return num / den

  attn_l = branch(params['w1l'], params['b1l'], params['bnl'],
                  params['w2l'], params['b2l'])
  attn_r = branch(params['w1r'], params['b1r'], params['bnr'],
                  params['w2r'], params['b2r'])
  feat_l, feat_r = pool(attn_l), pool(attn_r)
  feat_mean = feat.mean((-2, -1))
  mano_l = feat_l @ params['wml'] + params['bml']
  mano_r = feat_r @ params['wmr'] + params['bmr']
  off = feat_mean @ params['wof'] + params['bof']
  return mano_l, mano_r, off


if __name__ == "__main__":
  B, C, H, W = 2, 32, 16, 16            # feat_dim = 32
  key = jax.random.PRNGKey(0)
  k_feat, k_params = jax.random.split(key)

  feat = jax.random.normal(k_feat, (B, C, H, W), jnp.float32)   # NCHW like PyTorch
  params = make_params(k_params, C)

  fwd = jax.jit(init_regressor_forward)
  out = fwd(feat, params)
  jax.block_until_ready([v for v in out.values() if v is not None])

  assert out['pd_offset'].shape == (B, 3)
  assert out['pd_mano_para_left'].shape == (B, MANO_OUT)
  assert out['pd_mano_pose_right'].shape == (B, 51)
  assert out['pd_mano_beta_left'].shape == (B, 10)
  assert out['pd_proj_right'].shape == (B, 3)

  # bf16 MXU + approx reciprocal -> tolerance check against the f32 reference.
  ref_l, ref_r, ref_o = init_regressor_reference(feat, params)
  for name, got, ref in (('mano_left', out['pd_mano_para_left'], ref_l),
                         ('mano_right', out['pd_mano_para_right'], ref_r),
                         ('offset', out['pd_offset'], ref_o)):
    err = float(jnp.max(jnp.abs(got - ref)))
    assert err < 5e-3, (name, err)

  print("KERNEL_OK")
</pallas_src>

<mosaic_0001>
module attributes {stable_mosaic.version = 11 : i64} {
  func.func @init_regressor_kernel(%arg0: i32, %arg1: memref<2x18x18x32xbf16, #tpu.memory_space<vmem>>, %arg2: memref<3x96x32xbf16, #tpu.memory_space<vmem>>, %arg3: memref<1x32xf32, #tpu.memory_space<vmem>>, %arg4: memref<32x3xbf16, #tpu.memory_space<vmem>>, %arg5: memref<1x3xf32, #tpu.memory_space<vmem>>, %arg6: memref<32x256xbf16, #tpu.memory_space<vmem>>, %arg7: memref<3x256xf32, #tpu.memory_space<vmem>>, %arg8: memref<2x3x256xf32, #tpu.memory_space<vmem>>) attributes {dimension_semantics = [#tpu.dimension_semantics<parallel>], iteration_bounds = array<i64: 1>, scalar_prefetch = 0 : i64, scratch_operands = 0 : i64, tpu.core_type = #tpu.core_type<tc>, window_params = [{transform_indices = @transform_0, window_bounds = array<i64: 2, 18, 18, 32>}, {pipeline_mode = #tpu.pipeline_mode<synchronous>, transform_indices = @transform_1, window_bounds = array<i64: 3, 96, 32>}, {pipeline_mode = #tpu.pipeline_mode<synchronous>, transform_indices = @transform_2, window_bounds = array<i64: 1, 32>}, {pipeline_mode = #tpu.pipeline_mode<synchronous>, transform_indices = @transform_3, window_bounds = array<i64: 32, 3>}, {pipeline_mode = #tpu.pipeline_mode<synchronous>, transform_indices = @transform_4, window_bounds = array<i64: 1, 3>}, {pipeline_mode = #tpu.pipeline_mode<synchronous>, transform_indices = @transform_5, window_bounds = array<i64: 32, 256>}, {pipeline_mode = #tpu.pipeline_mode<synchronous>, transform_indices = @transform_6, window_bounds = array<i64: 3, 256>}, {transform_indices = @transform_7, window_bounds = array<i64: 2, 3, 256>}]} {
    %c0 = arith.constant 0 : index
    %c0_0 = arith.constant 0 : index
    %c0_1 = arith.constant 0 : index
    %c0_2 = arith.constant 0 : index
    %0 = vector.load %arg1[%c0, %c0_0, %c0_1, %c0_2] : memref<2x18x18x32xbf16, #tpu.memory_space<vmem>>, vector<2x18x18x32xbf16>
    %1 = vector.extract_strided_slice %0 {offsets = [0, 0, 0, 0], sizes = [2, 18, 16, 32], strides = [1, 1, 1, 1]} : vector<2x18x18x32xbf16> to vector<2x18x16x32xbf16>
    %2 = vector.extract_strided_slice %0 {offsets = [0, 0, 1, 0], sizes = [2, 18, 16, 32], strides = [1, 1, 1, 1]} : vector<2x18x18x32xbf16> to vector<2x18x16x32xbf16>
    %3 = vector.extract_strided_slice %0 {offsets = [0, 0, 2, 0], sizes = [2, 18, 16, 32], strides = [1, 1, 1, 1]} : vector<2x18x18x32xbf16> to vector<2x18x16x32xbf16>
    %4 = vector.extract_strided_slice %2 {offsets = [0, 1, 0, 0], sizes = [2, 16, 16, 32], strides = [1, 1, 1, 1]} : vector<2x18x16x32xbf16> to vector<2x16x16x32xbf16>
    %5 = vector.shape_cast %4 : vector<2x16x16x32xbf16> to vector<512x32xbf16>
    %6 = tpu.concatenate %1, %2, %3 in 3 : vector<2x18x16x32xbf16>, vector<2x18x16x32xbf16>, vector<2x18x16x32xbf16> -> vector<2x18x16x96xbf16>
    %7 = vector.extract_strided_slice %6 {offsets = [0, 0, 0, 0], sizes = [2, 16, 16, 96], strides = [1, 1, 1, 1]} : vector<2x18x16x96xbf16> to vector<2x16x16x96xbf16>
    %8 = vector.shape_cast %7 : vector<2x16x16x96xbf16> to vector<512x96xbf16>
    %c0_3 = arith.constant 0 : index
    %c0_4 = arith.constant 0 : index
    %c0_5 = arith.constant 0 : index
    %9 = vector.load %arg2[%c0_3, %c0_4, %c0_5] : memref<3x96x32xbf16, #tpu.memory_space<vmem>>, vector<1x96x32xbf16>
    %10 = vector.shape_cast %9 : vector<1x96x32xbf16> to vector<96x32xbf16>
    %cst = arith.constant dense<0.000000e+00> : vector<512x32xf32>
    %11 = tpu.matmul %8, %10, %cst {dimension_numbers = #tpu.dot_dimension_numbers<[1], [0], [0], [1], [0, 0, 1, 1], [], []>} : vector<512x96xbf16>, vector<96x32xbf16>, vector<512x32xf32> -> vector<512x32xf32>
    %12 = vector.extract_strided_slice %6 {offsets = [0, 1, 0, 0], sizes = [2, 16, 16, 96], strides = [1, 1, 1, 1]} : vector<2x18x16x96xbf16> to vector<2x16x16x96xbf16>
    %13 = vector.shape_cast %12 : vector<2x16x16x96xbf16> to vector<512x96xbf16>
    %c1 = arith.constant 1 : index
    %c0_6 = arith.constant 0 : index
    %c0_7 = arith.constant 0 : index
    %14 = vector.load %arg2[%c1, %c0_6, %c0_7] : memref<3x96x32xbf16, #tpu.memory_space<vmem>>, vector<1x96x32xbf16>
    %15 = vector.shape_cast %14 : vector<1x96x32xbf16> to vector<96x32xbf16>
    %cst_8 = arith.constant dense<0.000000e+00> : vector<512x32xf32>
    %16 = tpu.matmul %13, %15, %cst_8 {dimension_numbers = #tpu.dot_dimension_numbers<[1], [0], [0], [1], [0, 0, 1, 1], [], []>} : vector<512x96xbf16>, vector<96x32xbf16>, vector<512x32xf32> -> vector<512x32xf32>
    %17 = arith.addf %11, %16 : vector<512x32xf32>
    %18 = vector.extract_strided_slice %6 {offsets = [0, 2, 0, 0], sizes = [2, 16, 16, 96], strides = [1, 1, 1, 1]} : vector<2x18x16x96xbf16> to vector<2x16x16x96xbf16>
    %19 = vector.shape_cast %18 : vector<2x16x16x96xbf16> to vector<512x96xbf16>
    %c2 = arith.constant 2 : index
    %c0_9 = arith.constant 0 : index
    %c0_10 = arith.constant 0 : index
    %20 = vector.load %arg2[%c2, %c0_9, %c0_10] : memref<3x96x32xbf16, #tpu.memory_space<vmem>>, vector<1x96x32xbf16>
    %21 = vector.shape_cast %20 : vector<1x96x32xbf16> to vector<96x32xbf16>
    %cst_11 = arith.constant dense<0.000000e+00> : vector<512x32xf32>
    %22 = tpu.matmul %19, %21, %cst_11 {dimension_numbers = #tpu.dot_dimension_numbers<[1], [0], [0], [1], [0, 0, 1, 1], [], []>} : vector<512x96xbf16>, vector<96x32xbf16>, vector<512x32xf32> -> vector<512x32xf32>
    %23 = arith.addf %17, %22 : vector<512x32xf32>
    %c0_12 = arith.constant 0 : index
    %c0_13 = arith.constant 0 : index
    %24 = vector.load %arg3[%c0_12, %c0_13] : memref<1x32xf32, #tpu.memory_space<vmem>>, vector<1x32xf32>
    %25 = vector.broadcast %24 : vector<1x32xf32> to vector<512x32xf32>
    %26 = arith.addf %23, %25 : vector<512x32xf32>
    %cst_14 = arith.constant 0.000000e+00 : f32
    %27 = vector.broadcast %cst_14 : f32 to vector<512x32xf32>
    %28 = arith.maximumf %26, %27 : vector<512x32xf32>
    %29 = arith.truncf %28 : vector<512x32xf32> to vector<512x32xbf16>
    %c0_15 = arith.constant 0 : index
    %c0_16 = arith.constant 0 : index
    %30 = vector.load %arg4[%c0_15, %c0_16] : memref<32x3xbf16, #tpu.memory_space<vmem>>, vector<32x3xbf16>
    %cst_17 = arith.constant dense<0.000000e+00> : vector<512x3xf32>
    %31 = tpu.matmul %29, %30, %cst_17 {dimension_numbers = #tpu.dot_dimension_numbers<[1], [0], [0], [1], [0, 0, 1, 1], [], []>} : vector<512x32xbf16>, vector<32x3xbf16>, vector<512x3xf32> -> vector<512x3xf32>
    %c0_18 = arith.constant 0 : index
    %c0_19 = arith.constant 0 : index
    %32 = vector.load %arg5[%c0_18, %c0_19] : memref<1x3xf32, #tpu.memory_space<vmem>>, vector<1x3xf32>
    %33 = vector.broadcast %32 : vector<1x3xf32> to vector<512x3xf32>
    %34 = arith.addf %31, %33 : vector<512x3xf32>
    %cst_20 = arith.constant 5.000000e-01 : f32
    %35 = vector.broadcast %cst_20 : f32 to vector<512x3xf32>
    %36 = arith.mulf %35, %34 : vector<512x3xf32>
    %37 = math.tanh %36 : vector<512x3xf32>
    %cst_21 = arith.constant 5.000000e-01 : f32
    %38 = vector.broadcast %cst_21 : f32 to vector<512x3xf32>
    %39 = arith.mulf %38, %37 : vector<512x3xf32>
    %cst_22 = arith.constant 5.000000e-01 : f32
    %40 = vector.broadcast %cst_22 : f32 to vector<512x3xf32>
    %41 = arith.addf %39, %40 : vector<512x3xf32>
    %42 = vector.extract_strided_slice %41 {offsets = [0, 0], sizes = [256, 3], strides = [1, 1]} : vector<512x3xf32> to vector<256x3xf32>
    %43 = vector.extract_strided_slice %5 {offsets = [0, 0], sizes = [256, 32], strides = [1, 1]} : vector<512x32xbf16> to vector<256x32xbf16>
    %cst_23 = arith.constant dense<0.000000e+00> : vector<3xf32>
    %44 = vector.multi_reduction <add>, %42, %cst_23 [0] : vector<256x3xf32> to vector<3xf32>
    %45 = vector.shape_cast %44 : vector<3xf32> to vector<1x3xf32>
    %cst_24 = arith.constant 9.99999993E-9 : f32
    %46 = vector.broadcast %cst_24 : f32 to vector<1x3xf32>
    %47 = arith.addf %45, %46 : vector<1x3xf32>
    %48 = tpu.reciprocal %47 {approx = true} : vector<1x3xf32> -> vector<1x3xf32>
    %49 = vector.broadcast %48 : vector<1x3xf32> to vector<256x3xf32>
    %50 = arith.mulf %42, %49 : vector<256x3xf32>
    %51 = arith.truncf %50 : vector<256x3xf32> to vector<256x3xbf16>
    %cst_25 = arith.constant dense<0.000000e+00> : vector<3x32xf32>
    %52 = tpu.matmul %51, %43, %cst_25 {dimension_numbers = #tpu.dot_dimension_numbers<[0], [0], [1], [1], [0, 1, 1, 1], [], []>} : vector<256x3xbf16>, vector<256x32xbf16>, vector<3x32xf32> -> vector<3x32xf32>
    %53 = vector.extract_strided_slice %41 {offsets = [256, 0], sizes = [256, 3], strides = [1, 1]} : vector<512x3xf32> to vector<256x3xf32>
    %54 = vector.extract_strided_slice %5 {offsets = [256, 0], sizes = [256, 32], strides = [1, 1]} : vector<512x32xbf16> to vector<256x32xbf16>
    %cst_26 = arith.constant dense<0.000000e+00> : vector<3xf32>
    %55 = vector.multi_reduction <add>, %53, %cst_26 [0] : vector<256x3xf32> to vector<3xf32>
    %56 = vector.shape_cast %55 : vector<3xf32> to vector<1x3xf32>
    %cst_27 = arith.constant 9.99999993E-9 : f32
    %57 = vector.broadcast %cst_27 : f32 to vector<1x3xf32>
    %58 = arith.addf %56, %57 : vector<1x3xf32>
    %59 = tpu.reciprocal %58 {approx = true} : vector<1x3xf32> -> vector<1x3xf32>
    %60 = vector.broadcast %59 : vector<1x3xf32> to vector<256x3xf32>
    %61 = arith.mulf %53, %60 : vector<256x3xf32>
    %62 = arith.truncf %61 : vector<256x3xf32> to vector<256x3xbf16>
    %cst_28 = arith.constant dense<0.000000e+00> : vector<3x32xf32>
    %63 = tpu.matmul %62, %54, %cst_28 {dimension_numbers = #tpu.dot_dimension_numbers<[0], [0], [1], [1], [0, 1, 1, 1], [], []>} : vector<256x3xbf16>, vector<256x32xbf16>, vector<3x32xf32> -> vector<3x32xf32>
    %64 = tpu.concatenate %52, %63 in 0 : vector<3x32xf32>, vector<3x32xf32> -> vector<6x32xf32>
    %65 = arith.truncf %64 : vector<6x32xf32> to vector<6x32xbf16>
    %c0_29 = arith.constant 0 : index
    %c0_30 = arith.constant 0 : index
    %66 = vector.load %arg6[%c0_29, %c0_30] : memref<32x256xbf16, #tpu.memory_space<vmem>>, vector<32x256xbf16>
    %cst_31 = arith.constant dense<0.000000e+00> : vector<6x256xf32>
    %67 = tpu.matmul %65, %66, %cst_31 {dimension_numbers = #tpu.dot_dimension_numbers<[1], [0], [0], [1], [0, 0, 1, 1], [], []>} : vector<6x32xbf16>, vector<32x256xbf16>, vector<6x256xf32> -> vector<6x256xf32>
    %68 = vector.extract_strided_slice %67 {offsets = [0, 0], sizes = [3, 256], strides = [1, 1]} : vector<6x256xf32> to vector<3x256xf32>
    %c0_32 = arith.constant 0 : index
    %c0_33 = arith.constant 0 : index
    %69 = vector.load %arg7[%c0_32, %c0_33] : memref<3x256xf32, #tpu.memory_space<vmem>>, vector<3x256xf32>
    %70 = arith.addf %68, %69 : vector<3x256xf32>
    %c0_34 = arith.constant 0 : index
    %c0_35 = arith.constant 0 : index
    %c0_36 = arith.constant 0 : index
    %71 = vector.load %arg8[%c0_34, %c0_35, %c0_36] : memref<2x3x256xf32, #tpu.memory_space<vmem>>, vector<1x3x256xf32>
    %72 = vector.shape_cast %71 : vector<1x3x256xf32> to vector<3x256xf32>
    %73 = vector.shape_cast %70 : vector<3x256xf32> to vector<1x3x256xf32>
    tpu.vector_store %arg8[%c0_34, %c0_35, %c0_36], %73 {strides = array<i32>} : memref<2x3x256xf32, #tpu.memory_space<vmem>>, vector<1x3x256xf32>,
    %74 = vector.extract_strided_slice %67 {offsets = [3, 0], sizes = [3, 256], strides = [1, 1]} : vector<6x256xf32> to vector<3x256xf32>
    %c0_37 = arith.constant 0 : index
    %c0_38 = arith.constant 0 : index
    %75 = vector.load %arg7[%c0_37, %c0_38] : memref<3x256xf32, #tpu.memory_space<vmem>>, vector<3x256xf32>
    %76 = arith.addf %74, %75 : vector<3x256xf32>
    %c1_39 = arith.constant 1 : index
    %c0_40 = arith.constant 0 : index
    %c0_41 = arith.constant 0 : index
    %77 = vector.load %arg8[%c1_39, %c0_40, %c0_41] : memref<2x3x256xf32, #tpu.memory_space<vmem>>, vector<1x3x256xf32>
    %78 = vector.shape_cast %77 : vector<1x3x256xf32> to vector<3x256xf32>
    %79 = vector.shape_cast %76 : vector<3x256xf32> to vector<1x3x256xf32>
    tpu.vector_store %arg8[%c1_39, %c0_40, %c0_41], %79 {strides = array<i32>} : memref<2x3x256xf32, #tpu.memory_space<vmem>>, vector<1x3x256xf32>,
    return
  }
  func.func @transform_0(%arg0: i32) -> (i32, i32, i32, i32) {
    %c0_i32 = arith.constant 0 : i32
    %c0_i32_0 = arith.constant 0 : i32
    %c0_i32_1 = arith.constant 0 : i32
    %c0_i32_2 = arith.constant 0 : i32
    return %arg0, %c0_i32, %c0_i32_0, %c0_i32_1 : i32, i32, i32, i32
  }
  func.func @transform_1(%arg0: i32) -> (i32, i32, i32) {
    %c0_i32 = arith.constant 0 : i32
    %c0_i32_0 = arith.constant 0 : i32
    %c0_i32_1 = arith.constant 0 : i32
    %c0_i32_2 = arith.constant 0 : i32
    return %c0_i32, %c0_i32_0, %c0_i32_1 : i32, i32, i32
  }
  func.func @transform_2(%arg0: i32) -> (i32, i32) {
    %c0_i32 = arith.constant 0 : i32
    %c0_i32_0 = arith.constant 0 : i32
    %c0_i32_1 = arith.constant 0 : i32
    return %c0_i32, %c0_i32_0 : i32, i32
  }
  func.func @transform_3(%arg0: i32) -> (i32, i32) {
    %c0_i32 = arith.constant 0 : i32
    %c0_i32_0 = arith.constant 0 : i32
    %c0_i32_1 = arith.constant 0 : i32
    return %c0_i32, %c0_i32_0 : i32, i32
  }
  func.func @transform_4(%arg0: i32) -> (i32, i32) {
    %c0_i32 = arith.constant 0 : i32
    %c0_i32_0 = arith.constant 0 : i32
    %c0_i32_1 = arith.constant 0 : i32
    return %c0_i32, %c0_i32_0 : i32, i32
  }
  func.func @transform_5(%arg0: i32) -> (i32, i32) {
    %c0_i32 = arith.constant 0 : i32
    %c0_i32_0 = arith.constant 0 : i32
    %c0_i32_1 = arith.constant 0 : i32
    return %c0_i32, %c0_i32_0 : i32, i32
  }
  func.func @transform_6(%arg0: i32) -> (i32, i32) {
    %c0_i32 = arith.constant 0 : i32
    %c0_i32_0 = arith.constant 0 : i32
    %c0_i32_1 = arith.constant 0 : i32
    return %c0_i32, %c0_i32_0 : i32, i32
  }
  func.func @transform_7(%arg0: i32) -> (i32, i32, i32) {
    %c0_i32 = arith.constant 0 : i32
    %c0_i32_0 = arith.constant 0 : i32
    %c0_i32_1 = arith.constant 0 : i32
    return %arg0, %c0_i32, %c0_i32_0 : i32, i32, i32
  }
}

</mosaic_0001>

<bundles_post_ra>
// kernel: init_regressor_forward.1
= control target key start
LH: loop header
LB: loop body
LE: loop exit
PB: predicated region body
PF: predicated region fallthrough
CT: control target
= control target key end

     0   :  { %vm1699_vm0 = vcmask 1046528   ;;  %s5736_s25 = smov 64   ;;  %vm1194_vm1 = vsmask.f32 7424  ;;  %s5737_s11 = smov 32   ;;  %vm1880_vm2 = vcmask 261120   ;;  %s8352_s0 = inlined_call_operand.vmem [shape: bf16[2,18,18,32], index: 0, kind: input, shape index: {}]   ;;  %s8353_s1 = inlined_call_operand.vmem [shape: bf16[3,96,32], index: 1, kind: input, shape index: {}]   ;;  %s8354_s3 = inlined_call_operand.vmem [shape: bf16[32,3], index: 3, kind: input, shape index: {}]   ;;  %s8355_s2 = inlined_call_operand.vmem [shape: f32[1,32], index: 2, kind: input, shape index: {}]   ;;  %s8356_s4 = inlined_call_operand.vmem [shape: f32[1,3], index: 4, kind: input, shape index: {}]   ;;  %s8357_s5 = inlined_call_operand.vmem [shape: bf16[32,256], index: 5, kind: input, shape index: {}]   ;;  %s8358_s6 = inlined_call_operand.vmem [shape: f32[3,256], index: 6, kind: input, shape index: {}]   ;;  %s8359_s7 = inlined_call_operand.vmem [shape: f32[2,3,256], index: 7, kind: output, shape index: {}]  }
   0x1   :  { %v30_v0 = vld [vmem:[%s8352_s0 + $0xc] sm:$0xf]  ;;  %v31_v1 = vld [vmem:[%s8352_s0 + $0x10] sm:$0xf]  ;;  %v32_v2 = vld [vmem:[%s8352_s0 + $0x14] sm:$0x1] }
   0x2   :  { %v5788_v3 = vcombine.low %v30_v0, %v31_v1  ;;  %v4667_v4 = vcombine.low %v32_v2, %v32_v2  ;;  %v33_v5 = vld [vmem:[%s8352_s0 + $0x18] sm:$0xf]  ;;  %v34_v6 = vld [vmem:[%s8352_s0 + $0x1c] sm:$0xf]  ;;  %v35_v8 = vld [vmem:[%s8352_s0 + $0x20] sm:$0x1] }
   0x3   :  { %v5456_v7 = vld [vmem:[%s8353_s1 + $0x58] sm:$0xff]   ;;  %v5802_v9 = vcombine.low %v33_v5, %v34_v6  ;;  %v39_v12 = vld [vmem:[%s8352_s0 + $0x30] sm:$0xf]  ;;  %v4668_v16 = vcombine.low %v35_v8, %v35_v8  ;;  %v40_v17 = vld [vmem:[%s8352_s0 + $0x34] sm:$0xf]  ;;  %vm1953_vm3 = vcmask 523264  }
   0x4   :  { %v1703_v10 = vrot.slane %v5788_v3, 1  ;;  %v1704_v11 = vrot.slane %v4667_v4, 1  ;;  %5107 = vmatprep.subr.bf16.mxu0 %v5456_v7  ;;  %v1208_v13 = vshrl.u32 %v5788_v3, 16  ;;  %v1210_v14 = vshll.u32 %v5788_v3, 16  ;;  %v5459_v18 = vld [vmem:[%s8353_s1 + $0x50] sm:$0xff]   ;;  %v5462_v24 = vld [vmem:[%s8353_s1 + $0x48] sm:$0xff]  }
   0x5   :  { %v1215_v15 = vshll.u32 %v4667_v4, 16  ;;  %5108 = vmatpush3.bf16.msra.mxu0 %v5456_v7  ;;  %v1706_v20 = vrot.slane %v5802_v9, 1  ;;  %v1220_v21 = vshrl.u32 %v5802_v9, 16  ;;  %v1222_v22 = vshll.u32 %v5802_v9, 16  ;;  %v41_v23 = vld [vmem:[%s8352_s0 + $0x38] sm:$0x1] }
   0x6   :  { %v1705_v19 = vsel %vm1699_vm0, %v1703_v10, %v1704_v11  ;;  %v1212_v25 = vrot.slane %v1210_v14, 1  ;;  %v1707_v27 = vrot.slane %v4668_v16, 1  ;;  %5109 = vmatprep.subr.bf16.mxu0 %v5459_v18  ;;  %v1227_v29 = vshll.u32 %v4668_v16, 16  ;;  %v36_v34 = vld [vmem:[%s8352_s0 + $0x24] sm:$0xf]  ;;  %v5468_v57 = vld [vmem:[%s8353_s1 + $0x38] sm:$0xff]  }
   0x7   :  { %1810 = vrot.lane.b32.xlu1 %v1705_v19, %s5736_s25  ;;  %v1217_v26 = vrot.slane %v1215_v15, 1  ;;  %v1224_v28 = vrot.slane %v1222_v22, 1  ;;  %v5827_v30 = vcombine.low %v39_v12, %v40_v17  ;;  %v4670_v33 = vcombine.low %v41_v23, %v41_v23  ;;  %v37_v35 = vld [vmem:[%s8352_s0 + $0x28] sm:$0xf]  ;;  %v38_v36 = vld [vmem:[%s8352_s0 + $0x2c] sm:$0x1] }
   0x8   :  { %v1213_v31 = vor.u32 %v1212_v25, %v1208_v13  ;;  %v1708_v32 = vsel %vm1699_vm0, %v1706_v20, %v1707_v27  ;;  %v1229_v38 = vrot.slane %v1227_v29, 1  ;;  %v5465_v39 = vld [vmem:[%s8353_s1 + $0x40] sm:$0xff]   ;;  %v5847_v44 = vcombine.low %v36_v34, %v37_v35  ;;  %v45_v46 = vld [vmem:[%s8352_s0 + $0x48] sm:$0xf]  ;;  %v46_v47 = vld [vmem:[%s8352_s0 + $0x4c] sm:$0xf] }
   0x9   :  { %5110 = vmatpush3.bf16.msra.mxu0 %v5459_v18  ;;  %v1225_v37 = vor.u32 %v1224_v28, %v1220_v21  ;;  %v1244_v41 = vshrl.u32 %v5827_v30, 16  ;;  %v1246_v42 = vshll.u32 %v5827_v30, 16  ;;  %v1251_v43 = vshll.u32 %v4670_v33, 16  ;;  %v47_v51 = vld [vmem:[%s8352_s0 + $0x50] sm:$0x1] }
   0xa   :  { %5111 = vmatprep.subr.bf16.mxu0 %v5462_v24  ;;  %v1218_v40 = vsel %vm1194_vm1, %v1213_v31, %v1217_v26  ;;  %v4669_v45 = vcombine.low %v38_v36, %v38_v36  ;;  %v42_v52 = vld [vmem:[%s8352_s0 + $0x3c] sm:$0xf]  ;;  %v1232_v53 = vshrl.u32 %v5847_v44, 16  ;;  %v1234_v54 = vshll.u32 %v5847_v44, 16  ;;  %v43_v56 = vld [vmem:[%s8352_s0 + $0x40] sm:$0xf] }
   0xb   :  { %1812 = vrot.lane.b32.xlu1 %v1708_v32, %s5736_s25  ;;  %1629 = vrot.lane.b32.xlu0 %v1218_v40, %s5737_s11  ;;  %v1230_v48 = vsel %vm1194_vm1, %v1225_v37, %v1229_v38  ;;  %v1248_v49 = vrot.slane %v1246_v42, 1  ;;  %v1253_v50 = vrot.slane %v1251_v43, 1  ;;  %v1712_v59 = vrot.slane %v5827_v30, 1  ;;  %v44_v1 = vld [vmem:[%s8352_s0 + $0x44] sm:$0x1]  ;;  %v5471_v12 = vld [vmem:[%s8353_s1 + $0x30] sm:$0xff]  }
   0xc   :  { %v1239_v55 = vshll.u32 %v4669_v45, 16  ;;  %v1713_v60 = vrot.slane %v4670_v33, 1  ;;  %v1236_v61 = vrot.slane %v1234_v54, 1  ;;  %v5872_v63 = vcombine.low %v45_v46, %v46_v47  ;;  %v51_v17 = vld [vmem:[%s8352_s0 + $0x60] sm:$0xf]  ;;  %v5474_v31 = vld [vmem:[%s8353_s1 + $0x88] sm:$0xff]  }
   0xd   :  { %5112 = vmatpush3.bf16.msra.mxu0 %v5462_v24  ;;  %v1249_v58 = vor.u32 %v1248_v49, %v1244_v41  ;;  %v4672_v0 = vcombine.low %v47_v51, %v47_v51  ;;  %v1709_v4 = vrot.slane %v5847_v44, 1  ;;  %v1710_v5 = vrot.slane %v4669_v45, 1  ;;  %v52_v18 = vld [vmem:[%s8352_s0 + $0x64] sm:$0xf]  ;;  %v53_v22 = vld [vmem:[%s8352_s0 + $0x68] sm:$0x1] }
   0xe   :  { %5113 = vmatprep.subr.bf16.mxu0 %v5465_v39  ;;  %v1241_v62 = vrot.slane %v1239_v55, 1  ;;  %v5879_v6 = vcombine.low %v42_v52, %v43_v56  ;;  %v1237_v7 = vor.u32 %v1236_v61, %v1232_v53  ;;  %v1268_v8 = vshrl.u32 %v5872_v63, 16  ;;  %v48_v29 = vld [vmem:[%s8352_s0 + $0x54] sm:$0xf]  ;;  %v49_v36 = vld [vmem:[%s8352_s0 + $0x58] sm:$0xf] }
   0xf   :  { %1631 = vrot.lane.b32.xlu0 %v1230_v48, %s5737_s11  ;;  %v1254_v2 = vsel %vm1194_vm1, %v1249_v58, %v1253_v50  ;;  %v1270_v10 = vshll.u32 %v5872_v63, 16  ;;  %v1275_v11 = vshll.u32 %v4672_v0, 16  ;;  %v1714_v13 = vsel %vm1699_vm0, %v1712_v59, %v1713_v60  ;;  %v50_v37 = vld [vmem:[%s8352_s0 + $0x5c] sm:$0x1]  ;;  %v57_v40 = vld [vmem:[%s8352_s0 + $0x78] sm:$0xf] }
  0x10   :  { %1635 = vrot.lane.b32.xlu1 %v1254_v2, %s5737_s11  ;;  %v4671_v14 = vcombine.low %v44_v1, %v44_v1  ;;  %v1256_v15 = vshrl.u32 %v5879_v6, 16  ;;  %v1258_v16 = vshll.u32 %v5879_v6, 16  ;;  %v1242_v19 = vsel %vm1194_vm1, %v1237_v7, %v1241_v62  ;;  %v58_v41 = vld [vmem:[%s8352_s0 + $0x7c] sm:$0xf]  ;;  %v59_v50 = vld [vmem:[%s8352_s0 + $0x80] sm:$0x1] }
  0x11   :  { %5114 = vmatpush3.bf16.msra.mxu0 %v5465_v39  ;;  %v1272_v20 = vrot.slane %v1270_v10, 1  ;;  %v1277_v21 = vrot.slane %v1275_v11, 1  ;;  %v1711_v25 = vsel %vm1699_vm0, %v1709_v4, %v1710_v5  ;;  %v1718_v27 = vrot.slane %v5872_v63, 1  ;;  %v54_v55 = vld [vmem:[%s8352_s0 + $0x6c] sm:$0xf] }
  0x12   :  { %5115 = vmatprep.subr.bf16.mxu0 %v5468_v57  ;;  %v1260_v23 = vrot.slane %v1258_v16, 1  ;;  %v1263_v24 = vshll.u32 %v4671_v14, 16  ;;  %v5904_v28 = vcombine.low %v51_v17, %v52_v18  ;;  %v1719_v34 = vrot.slane %v4672_v0, 1  ;;  %v55_v59 = vld [vmem:[%s8352_s0 + $0x70] sm:$0xf] }
  0x13   :  { %1633 = vrot.lane.b32.xlu0 %v1242_v19, %s5737_s11  ;;  %v1273_v26 = vor.u32 %v1272_v20, %v1268_v8  ;;  %v4674_v35 = vcombine.low %v53_v22, %v53_v22  ;;  %v1715_v39 = vrot.slane %v5879_v6, 1  ;;  %v1716_v42 = vrot.slane %v4671_v14, 1  ;;  %v56_v1 = vld [vmem:[%s8352_s0 + $0x74] sm:$0x1]  ;;  %v65_v18 = vld [vmem:[%s8352_s0 + $0x98] sm:$0x1] }
  0x14   :  { %1816 = vrot.lane.b32.xlu1 %v1714_v13, %s5736_s25  ;;  %v1261_v32 = vor.u32 %v1260_v23, %v1256_v15  ;;  %v1265_v33 = vrot.slane %v1263_v24, 1  ;;  %v1292_v43 = vshrl.u32 %v5904_v28, 16  ;;  %v1294_v45 = vshll.u32 %v5904_v28, 16  ;;  %v63_v13 = vld [vmem:[%s8352_s0 + $0x90] sm:$0xf] }
  0x15   :  { %5116 = vmatpush3.bf16.msra.mxu0 %v5468_v57  ;;  %v1278_v38 = vsel %vm1194_vm1, %v1273_v26, %v1277_v21  ;;  %v1299_v46 = vshll.u32 %v4674_v35, 16  ;;  %v5931_v48 = vcombine.low %v48_v29, %v49_v36  ;;  %v4673_v49 = vcombine.low %v50_v37, %v50_v37  ;;  %v64_v14 = vld [vmem:[%s8352_s0 + $0x94] sm:$0xf]  ;;  %v60_v19 = vld [vmem:[%s8352_s0 + $0x84] sm:$0xf] }
  0x16   :  { %5117 = vmatprep.subr.bf16.mxu0 %v5471_v12  ;;  %v1266_v47 = vsel %vm1194_vm1, %v1261_v32, %v1265_v33  ;;  %v1720_v51 = vsel %vm1699_vm0, %v1718_v27, %v1719_v34  ;;  %v1296_v52 = vrot.slane %v1294_v45, 1  ;;  %v5937_v54 = vcombine.low %v57_v40, %v58_v41  ;;  %v61_v24 = vld [vmem:[%s8352_s0 + $0x88] sm:$0xf]  ;;  %v62_v34 = vld [vmem:[%s8352_s0 + $0x8c] sm:$0x1] }
  0x17   :  { %1814 = vrot.lane.b32.xlu0 %v1711_v25, %s5736_s25  ;;  %v1301_v53 = vrot.slane %v1299_v46, 1  ;;  %v1280_v56 = vshrl.u32 %v5931_v48, 16  ;;  %v1282_v57 = vshll.u32 %v5931_v48, 16  ;;  %v1287_v58 = vshll.u32 %v4673_v49, 16  ;;  %v69_v41 = vld [vmem:[%s8352_s0 + $0xa8] sm:$0xf] }
  0x18   :  { %1639 = vrot.lane.b32.xlu1 %v1278_v38, %s5737_s11  ;;  %v1717_v60 = vsel %vm1699_vm0, %v1715_v39, %v1716_v42  ;;  %v1297_v61 = vor.u32 %v1296_v52, %v1292_v43  ;;  %v1724_v62 = vrot.slane %v5904_v28, 1  ;;  %v5950_v0 = vcombine.low %v59_v50, %v59_v50  ;;  %v70_v42 = vld [vmem:[%s8352_s0 + $0xac] sm:$0xf] }
  0x19   :  { %5118 = vmatpush3.bf16.msra.mxu0 %v5471_v12  ;;  %v1284_v2 = vrot.slane %v1282_v57, 1  ;;  %v1289_v4 = vrot.slane %v1287_v58, 1  ;;  %v1725_v5 = vrot.slane %v4674_v35, 1  ;;  %v1318_v7 = vshll.u32 %v5937_v54, 16  ;;  %v71_v58 = vld [vmem:[%s8352_s0 + $0xb0] sm:$0x1] }
  0x1a   :  { %5259 = vmatprep.subr.bf16.mxu0 %v5474_v31  ;;  %v1302_v8 = vsel %vm1194_vm1, %v1297_v61, %v1301_v53  ;;  %v1316_v10 = vshrl.u32 %v5937_v54, 16  ;;  %v1323_v11 = vshll.u32 %v5950_v0, 16  ;;  %v5960_v12 = vcombine.low %v54_v55, %v55_v59  ;;  %v67_v55 = vld [vmem:[%s8352_s0 + $0xa0] sm:$0xf] }
  0x1b   :  { %1637 = vrot.lane.b32.xlu0 %v1266_v47, %s5737_s11  ;;  %v1285_v15 = vor.u32 %v1284_v2, %v1280_v56  ;;  %v1320_v16 = vrot.slane %v1318_v7, 1  ;;  %v4675_v17 = vcombine.low %v56_v1, %v56_v1  ;;  %v1721_v20 = vrot.slane %v5931_v48, 1 }
  0x1c   :  { %1820 = vrot.lane.b32.xlu1 %v1720_v51, %s5736_s25  ;;  %v1722_v21 = vrot.slane %v4673_v49, 1  ;;  %v1304_v22 = vshrl.u32 %v5960_v12, 16  ;;  %v1306_v23 = vshll.u32 %v5960_v12, 16  ;;  %v1726_v26 = vsel %vm1699_vm0, %v1724_v62, %v1725_v5  ;;  %v66_v49 = vld [vmem:[%s8352_s0 + $0x9c] sm:$0xf] }
  0x1d   :  { %v1290_v25 = vsel %vm1194_vm1, %v1285_v15, %v1289_v4  ;;  %v1311_v27 = vshll.u32 %v4675_v17, 16  ;;  %v1321_v29 = vor.u32 %v1320_v16, %v1316_v10  ;;  %v1325_v31 = vrot.slane %v1323_v11, 1  ;;  %v68_v4 = vld [vmem:[%s8352_s0 + $0xa4] sm:$0x1]  ;;  %v75_v11 = vld [vmem:[%s8352_s0 + $0xc0] sm:$0xf] }
  0x1e   :  { %v1308_v32 = vrot.slane %v1306_v23, 1  ;;  %v5984_v33 = vcombine.low %v63_v13, %v64_v14  ;;  %v5989_v35 = vcombine.low %v65_v18, %v65_v18  ;;  %v5991_v36 = vcombine.low %v60_v19, %v61_v24  ;;  %v76_v13 = vld [vmem:[%s8352_s0 + $0xc4] sm:$0xf]  ;;  %v73_v23 = vld [vmem:[%s8352_s0 + $0xb8] sm:$0xf] }
  0x1f   :  { %1818 = vrot.lane.b32.xlu0 %v1717_v60, %s5736_s25  ;;  %v1723_v37 = vsel %vm1699_vm0, %v1721_v20, %v1722_v21  ;;  %v1313_v39 = vrot.slane %v1311_v27, 1  ;;  %v6005_v46 = vcombine.low %v62_v34, %v62_v34  ;;  %v1326_v50 = vsel %vm1194_vm1, %v1321_v29, %v1325_v31  ;;  %v77_v27 = vld [vmem:[%s8352_s0 + $0xc8] sm:$0x1] }
  0x20   :  { %1643 = vrot.lane.b32.xlu1 %v1302_v8, %s5737_s11  ;;  %v1309_v38 = vor.u32 %v1308_v32, %v1304_v22  ;;  %v1342_v40 = vshll.u32 %v5984_v33, 16  ;;  %v1340_v43 = vshrl.u32 %v5984_v33, 16  ;;  %v1347_v45 = vshll.u32 %v5989_v35, 16  ;;  %v72_v22 = vld [vmem:[%s8352_s0 + $0xb4] sm:$0xf] }
  0x21   :  { %v1330_v47 = vshll.u32 %v5991_v36, 16  ;;  %v1730_v51 = vrot.slane %v5937_v54, 1  ;;  %v1731_v52 = vrot.slane %v5950_v0, 1  ;;  %v1727_v56 = vrot.slane %v5960_v12, 1 }
  0x22   :  { %v1344_v53 = vrot.slane %v1342_v40, 1  ;;  %v1728_v57 = vrot.slane %v4675_v17, 1  ;;  %v1314_v59 = vsel %vm1194_vm1, %v1309_v38, %v1313_v39  ;;  %v1349_v60 = vrot.slane %v1347_v45, 1 }
  0x23   :  { %1641 = vrot.lane.b32.xlu0 %v1290_v25, %s5737_s11  ;;  %v1328_v61 = vshrl.u32 %v5991_v36, 16  ;;  %v6024_v62 = vcombine.low %v69_v41, %v70_v42  ;;  %v1332_v1 = vrot.slane %v1330_v47, 1  ;;  %v1335_v2 = vshll.u32 %v6005_v46, 16  ;;  %v87_v47 = vld [vmem:[%s8352_s0 + $0xf0] sm:$0xf] }
  0x24   :  { %1824 = vrot.lane.b32.xlu1 %v1726_v26, %s5736_s25  ;;  %v1345_v0 = vor.u32 %v1344_v53, %v1340_v43  ;;  %v6031_v5 = vcombine.low %v66_v49, %v67_v55  ;;  %v1732_v7 = vsel %vm1699_vm0, %v1730_v51, %v1731_v52  ;;  %v6034_v8 = vcombine.low %v71_v58, %v71_v58  ;;  %v88_v49 = vld [vmem:[%s8352_s0 + $0xf4] sm:$0xf] }
  0x25   :  { %v1366_v10 = vshll.u32 %v6024_v62, 16  ;;  %v1729_v14 = vsel %vm1699_vm0, %v1727_v56, %v1728_v57  ;;  %v1736_v15 = vrot.slane %v5984_v33, 1  ;;  %v6046_v16 = vcombine.low %v68_v4, %v68_v4 }
  0x26   :  { %v1354_v17 = vshll.u32 %v6031_v5, 16  ;;  %v1350_v18 = vsel %vm1194_vm1, %v1345_v0, %v1349_v60  ;;  %v1333_v19 = vor.u32 %v1332_v1, %v1328_v61  ;;  %v1337_v20 = vrot.slane %v1335_v2, 1  ;;  %v85_v2 = vld [vmem:[%s8352_s0 + $0xe8] sm:$0xf] }
  0x27   :  { %1822 = vrot.lane.b32.xlu0 %v1723_v37, %s5736_s25  ;;  %v1737_v21 = vrot.slane %v5989_v35, 1  ;;  %v1364_v24 = vshrl.u32 %v6024_v62, 16  ;;  %v1368_v25 = vrot.slane %v1366_v10, 1  ;;  %v1371_v26 = vshll.u32 %v6034_v8, 16 }
  0x28   :  { %1647 = vrot.lane.b32.xlu1 %v1326_v50, %s5737_s11  ;;  %v6063_v29 = vcombine.low %v75_v11, %v76_v13  ;;  %v1733_v31 = vrot.slane %v5991_v36, 1  ;;  %v1734_v32 = vrot.slane %v6005_v46, 1  ;;  %v1352_v34 = vshrl.u32 %v6031_v5, 16  ;;  %v74_v46 = vld [vmem:[%s8352_s0 + $0xbc] sm:$0x1] }
  0x29   :  { %v1356_v35 = vrot.slane %v1354_v17, 1  ;;  %v1359_v37 = vshll.u32 %v6046_v16, 16  ;;  %v6070_v38 = vcombine.low %v72_v22, %v73_v23  ;;  %v1338_v39 = vsel %vm1194_vm1, %v1333_v19, %v1337_v20  ;;  %v93_v22 = vld [vmem:[%s8352_s0 + $0x108] sm:$0xf]  ;;  %v94_v23 = vld [vmem:[%s8352_s0 + $0x10c] sm:$0xf] }
  0x2a   :  { %v4682_v40 = vcombine.low %v77_v27, %v77_v27  ;;  %v1390_v41 = vshll.u32 %v6063_v29, 16  ;;  %v1738_v42 = vsel %vm1699_vm0, %v1736_v15, %v1737_v21  ;;  %v1369_v43 = vor.u32 %v1368_v25, %v1364_v24 }
  0x2b   :  { %1645 = vrot.lane.b32.xlu0 %v1314_v59, %s5737_s11  ;;  %v1373_v45 = vrot.slane %v1371_v26, 1  ;;  %v1735_v50 = vsel %vm1699_vm0, %v1733_v31, %v1734_v32  ;;  %v1357_v51 = vor.u32 %v1356_v35, %v1352_v34  ;;  %v1361_v52 = vrot.slane %v1359_v37, 1  ;;  %v84_v59 = vld [vmem:[%s8352_s0 + $0xe4] sm:$0xf]  ;;  %v90_v31 = vld [vmem:[%s8352_s0 + $0xfc] sm:$0xf] }
  0x2c   :  { %1828 = vrot.lane.b32.xlu1 %v1732_v7, %s5736_s25  ;;  %v1378_v53 = vshll.u32 %v6070_v38, 16  ;;  %v1388_v55 = vshrl.u32 %v6063_v29, 16  ;;  %v1392_v56 = vrot.slane %v1390_v41, 1  ;;  %v1395_v57 = vshll.u32 %v4682_v40, 16  ;;  %v89_v7 = vld [vmem:[%s8352_s0 + $0xf8] sm:$0x1] }
  0x2d   :  { %v4681_v58 = vcombine.low %v74_v46, %v74_v46  ;;  %v1374_v60 = vsel %vm1194_vm1, %v1369_v43, %v1373_v45  ;;  %v1742_v61 = vrot.slane %v6024_v62, 1  ;;  %v1743_v0 = vrot.slane %v6034_v8, 1  ;;  %v91_v32 = vld [vmem:[%s8352_s0 + $0x100] sm:$0xf]  ;;  %v95_v45 = vld [vmem:[%s8352_s0 + $0x110] sm:$0x1] }
  0x2e   :  { %v6096_v1 = vcombine.low %v87_v47, %v88_v49  ;;  %v1739_v4 = vrot.slane %v6031_v5, 1  ;;  %v1362_v10 = vsel %vm1194_vm1, %v1357_v51, %v1361_v52  ;;  %v1740_v11 = vrot.slane %v6046_v16, 1  ;;  %v86_v16 = vld [vmem:[%s8352_s0 + $0xec] sm:$0x1]  ;;  %v99_v52 = vld [vmem:[%s8352_s0 + $0x120] sm:$0xf] }
  0x2f   :  { %1826 = vrot.lane.b32.xlu0 %v1729_v14, %s5736_s25  ;;  %v1376_v8 = vshrl.u32 %v6070_v38, 16  ;;  %v1380_v13 = vrot.slane %v1378_v53, 1  ;;  %v1393_v14 = vor.u32 %v1392_v56, %v1388_v55  ;;  %v1397_v15 = vrot.slane %v1395_v57, 1 }
  0x30   :  { %1651 = vrot.lane.b32.xlu1 %v1350_v18, %s5737_s11  ;;  %v1383_v17 = vshll.u32 %v4681_v58, 16  ;;  %v6110_v18 = vcombine.low %v84_v59, %v85_v2  ;;  %v1744_v19 = vsel %vm1699_vm0, %v1742_v61, %v1743_v0  ;;  %v6113_v20 = vcombine.low %v89_v7, %v89_v7  ;;  %v100_v0 = vld [vmem:[%s8352_s0 + $0x124] sm:$0xf] }
  0x31   :  { %v1438_v21 = vshll.u32 %v6096_v1, 16  ;;  %v1741_v24 = vsel %vm1699_vm0, %v1739_v4, %v1740_v11  ;;  %v1381_v25 = vor.u32 %v1380_v13, %v1376_v8  ;;  %v1748_v26 = vrot.slane %v6063_v29, 1 }
  0x32   :  { %v1749_v27 = vrot.slane %v4682_v40, 1  ;;  %v1398_v34 = vsel %vm1194_vm1, %v1393_v14, %v1397_v15  ;;  %v1385_v35 = vrot.slane %v1383_v17, 1  ;;  %v4685_v37 = vcombine.low %v86_v16, %v86_v16  ;;  %v101_v14 = vld [vmem:[%s8352_s0 + $0x128] sm:$0x1]  ;;  %v96_v17 = vld [vmem:[%s8352_s0 + $0x114] sm:$0xf] }
  0x33   :  { %1649 = vrot.lane.b32.xlu0 %v1338_v39, %s5737_s11  ;;  %v1426_v39 = vshll.u32 %v6110_v18, 16  ;;  %v1436_v41 = vshrl.u32 %v6096_v1, 16  ;;  %v1443_v40 = vshll.u32 %v6113_v20, 16  ;;  %v6139_v43 = vcombine.low %v93_v22, %v94_v23 }
  0x34   :  { %1832 = vrot.lane.b32.xlu1 %v1738_v42, %s5736_s25  ;;  %v1440_v42 = vrot.slane %v1438_v21, 1  ;;  %v1750_v46 = vsel %vm1699_vm0, %v1748_v26, %v1749_v27  ;;  %v1745_v47 = vrot.slane %v6070_v38, 1  ;;  %v1746_v49 = vrot.slane %v4681_v58, 1 }
  0x35   :  { %v6150_v51 = vcombine.low %v90_v31, %v91_v32  ;;  %v1386_v53 = vsel %vm1194_vm1, %v1381_v25, %v1385_v35  ;;  %v1424_v55 = vshrl.u32 %v6110_v18, 16  ;;  %v1428_v56 = vrot.slane %v1426_v39, 1  ;;  %v98_v35 = vld [vmem:[%s8352_s0 + $0x11c] sm:$0x1] }
  0x36   :  { %v1431_v57 = vshll.u32 %v4685_v37, 16  ;;  %v1441_v59 = vor.u32 %v1440_v42, %v1436_v41  ;;  %v1445_v58 = vrot.slane %v1443_v40, 1  ;;  %v1462_v61 = vshll.u32 %v6139_v43, 16  ;;  %v105_v40 = vld [vmem:[%s8352_s0 + $0x138] sm:$0xf] }
  0x37   :  { %1830 = vrot.lane.b32.xlu0 %v1735_v50, %s5736_s25  ;;  %v92_v50 = vld [vmem:[%s8352_s0 + $0x104] sm:$0x1]  ;;  %v1747_v2 = vsel %vm1699_vm0, %v1745_v47, %v1746_v49  ;;  %v1760_v4 = vrot.slane %v6096_v1, 1  ;;  %v1429_v11 = vor.u32 %v1428_v56, %v1424_v55  ;;  %v1761_v13 = vrot.slane %v6113_v20, 1  ;;  %v97_v20 = vld [vmem:[%s8352_s0 + $0x118] sm:$0xf] }
  0x38   :  { %1655 = vrot.lane.b32.xlu1 %v1374_v60, %s5737_s11  ;;  %v6158_v60 = vcombine.low %v95_v45, %v95_v45  ;;  %v6167_v7 = vcombine.low %v92_v50, %v92_v50  ;;  %v1433_v8 = vrot.slane %v1431_v57, 1  ;;  %v6175_v15 = vcombine.low %v99_v52, %v100_v0  ;;  %v106_v45 = vld [vmem:[%s8352_s0 + $0x13c] sm:$0xf] }
  0x39   :  { %v1460_v21 = vshrl.u32 %v6139_v43, 16  ;;  %v1464_v16 = vrot.slane %v1462_v61, 1  ;;  %v1757_v23 = vrot.slane %v6110_v18, 1  ;;  %v1448_v25 = vshrl.u32 %v6150_v51, 16 }
  0x3a   :  { %v1467_v22 = vshll.u32 %v6158_v60, 16  ;;  %v1455_v27 = vshll.u32 %v6167_v7, 16  ;;  %v6190_v31 = vcombine.low %v101_v14, %v101_v14  ;;  %v1434_v32 = vsel %vm1194_vm1, %v1429_v11, %v1433_v8  ;;  %v104_v11 = vld [vmem:[%s8352_s0 + $0x134] sm:$0x1] }
  0x3b   :  { %1653 = vrot.lane.b32.xlu0 %v1362_v10, %s5737_s11  ;;  %v1450_v10 = vshll.u32 %v6150_v51, 16  ;;  %v1762_v39 = vsel %vm1699_vm0, %v1760_v4, %v1761_v13  ;;  %v1465_v41 = vor.u32 %v1464_v16, %v1460_v21  ;;  %v1484_v55 = vshrl.u32 %v6175_v15, 16 }
  0x3c   :  { %1836 = vrot.lane.b32.xlu1 %v1744_v19, %s5736_s25  ;;  %v1446_v19 = vsel %vm1194_vm1, %v1441_v59, %v1445_v58  ;;  %v1469_v42 = vrot.slane %v1467_v22, 1  ;;  %v1457_v50 = vrot.slane %v1455_v27, 1  ;;  %v1491_v52 = vshll.u32 %v6190_v31, 16  ;;  %v111_v22 = vld [vmem:[%s8352_s0 + $0x150] sm:$0xf] }
  0x3d   :  { %v1452_v26 = vrot.slane %v1450_v10, 1  ;;  %v6218_v57 = vcombine.low %v98_v35, %v98_v35  ;;  %v1766_v61 = vrot.slane %v6139_v43, 1  ;;  %v1767_v0 = vrot.slane %v6158_v60, 1 }
  0x3e   :  { %v1470_v58 = vsel %vm1194_vm1, %v1465_v41, %v1469_v42  ;;  %v6227_v4 = vcombine.low %v105_v40, %v106_v45  ;;  %v1763_v10 = vrot.slane %v6150_v51, 1  ;;  %v1764_v13 = vrot.slane %v6167_v7, 1  ;;  %v109_v40 = vld [vmem:[%s8352_s0 + $0x148] sm:$0xf] }
  0x3f   :  { %1834 = vrot.lane.b32.xlu0 %v1741_v24, %s5736_s25  ;;  %v1758_v24 = vrot.slane %v4685_v37, 1  ;;  %v6198_v37 = vcombine.low %v96_v17, %v97_v20  ;;  %v1453_v49 = vor.u32 %v1452_v26, %v1448_v25  ;;  %v1493_v14 = vrot.slane %v1491_v52, 1 }
  0x40   :  { %1659 = vrot.lane.b32.xlu1 %v1398_v34, %s5737_s11  ;;  %v1486_v34 = vshll.u32 %v6175_v15, 16  ;;  %v1479_v16 = vshll.u32 %v6218_v57, 16  ;;  %v1768_v20 = vsel %vm1699_vm0, %v1766_v61, %v1767_v0  ;;  %v1510_v7 = vshll.u32 %v6227_v4, 16 }
  0x41   :  { %v1759_v47 = vsel %vm1699_vm0, %v1757_v23, %v1758_v24  ;;  %v1474_v59 = vshll.u32 %v6198_v37, 16  ;;  %v1458_v8 = vsel %vm1194_vm1, %v1453_v49, %v1457_v50  ;;  %v112_v24 = vld [vmem:[%s8352_s0 + $0x154] sm:$0xf]  ;;  %v1772_v25 = vrot.slane %v6175_v15, 1  ;;  %v110_v50 = vld [vmem:[%s8352_s0 + $0x14c] sm:$0x1] }
  0x42   :  { %v1488_v56 = vrot.slane %v1486_v34, 1  ;;  %v1773_v26 = vrot.slane %v6190_v31, 1  ;;  %v6254_v27 = vcombine.low %v104_v11, %v104_v11  ;;  %v108_v34 = vld [vmem:[%s8352_s0 + $0x144] sm:$0xf]  ;;  %v1765_v35 = vsel %vm1699_vm0, %v1763_v10, %v1764_v13  ;;  %v113_v31 = vld [vmem:[%s8352_s0 + $0x158] sm:$0x1] }
  0x43   :  { %1657 = vrot.lane.b32.xlu0 %v1386_v53, %s5737_s11  ;;  %v103_v53 = vld [vmem:[%s8352_s0 + $0x130] sm:$0xf]  ;;  %v1476_v21 = vrot.slane %v1474_v59, 1  ;;  %v1481_v42 = vrot.slane %v1479_v16, 1  ;;  %v1508_v45 = vshrl.u32 %v6227_v4, 16  ;;  %v6271_v49 = vcombine.low %v111_v22, %v112_v24 }
  0x44   :  { %1840 = vrot.lane.b32.xlu1 %v1750_v46, %s5736_s25  ;;  %v102_v46 = vld [vmem:[%s8352_s0 + $0x12c] sm:$0xf]  ;;  %v1489_v17 = vor.u32 %v1488_v56, %v1484_v55  ;;  %v1774_v52 = vsel %vm1699_vm0, %v1772_v25, %v1773_v26  ;;  %v1503_v56 = vshll.u32 %v6254_v27, 16  ;;  %v1770_v61 = vrot.slane %v6218_v57, 1  ;;  %v114_v57 = vld [vmem:[%s8352_s0 + $0x15c] sm:$0xf] }
  0x45   :  { %v6236_v60 = vcombine.low %v102_v46, %v103_v53  ;;  %v1512_v46 = vrot.slane %v1510_v7, 1  ;;  %v6284_v0 = vcombine.low %v108_v34, %v109_v40  ;;  %v1534_v13 = vshll.u32 %v6271_v49, 16  ;;  %v119_v7 = vld [vmem:[%s8352_s0 + $0x170] sm:$0x1] }
  0x46   :  { %v1505_v16 = vrot.slane %v1503_v56, 1  ;;  %v1532_v25 = vshrl.u32 %v6271_v49, 16  ;;  %v123_v56 = vld [vmem:[%s8352_s0 + $0x180] sm:$0xf]  ;;  %vm2087_vm4 = vcmask 785408   ;;  %vm4007_vm5 = vcmask 23552  }
  0x47   :  { %1838 = vrot.lane.b32.xlu0 %v1747_v2, %s5736_s25  ;;  %v107_v2 = vld [vmem:[%s8352_s0 + $0x140] sm:$0x1]  ;;  %v1496_v53 = vshrl.u32 %v6236_v60, 16  ;;  %v1513_v10 = vor.u32 %v1512_v46, %v1508_v45  ;;  %v1522_v26 = vshll.u32 %v6284_v0, 16  ;;  %v1520_v45 = vshrl.u32 %v6284_v0, 16 }
  0x48   :  { %1667 = vrot.lane.b32.xlu1 %v1446_v19, %s5737_s11  ;;  %v1472_v19 = vshrl.u32 %v6198_v37, 16  ;;  %v6245_v23 = vcombine.low %v107_v2, %v107_v2  ;;  %v117_v2 = vld [vmem:[%s8352_s0 + $0x168] sm:$0xf]  ;;  %vm135_vm6 = vsmask.f32 3328  ;;  %vm4521_vm9 = vcmask 1042432  }
  0x49   :  { %v1524_v46 = vrot.slane %v1522_v26, 1  ;;  %vm136_vm7 = vsmask.f32 7440  ;;  %vm4616_vm10 = vcmask 1040384   ;;  %vm4617_vm11 = vcmask 1044484  }
  0x4a   :  { %v1477_v41 = vor.u32 %v1476_v21, %v1472_v19  ;;  %v115_v19 = vld [vmem:[%s8352_s0 + $0x160] sm:$0xf]  ;;  %v1779_v22 = vrot.slane %v6245_v23, 1  ;;  %vm7441_vm8 = vmor %vm135_vm6, %vm136_vm7 }
  0x4b   :  { %1665 = vrot.lane.b32.xlu0 %v1434_v32, %s5737_s11  ;;  %v1498_v32 = vshll.u32 %v6236_v60, 16  ;;  %v6322_v40 = vcombine.low %v114_v57, %v115_v19  ;;  %v1784_v19 = vrot.slane %v6271_v49, 1  ;;  %vm4618_vm12 = vmor %vm4616_vm10, %vm4617_vm11 }
  0x4c   :  { %1848 = vrot.lane.b32.xlu1 %v1762_v39, %s5736_s25  ;;  %v1494_v39 = vsel %vm1194_vm1, %v1489_v17, %v1493_v14  ;;  %v1482_v59 = vsel %vm1194_vm1, %v1477_v41, %v1481_v42  ;;  %v118_v14 = vld [vmem:[%s8352_s0 + $0x16c] sm:$0xf]  ;;  %v1778_v17 = vrot.slane %v6227_v4, 1  ;;  %v1776_v42 = vrot.slane %v6254_v27, 1 }
  0x4d   :  { %v1500_v55 = vrot.slane %v1498_v32, 1  ;;  %v6313_v32 = vcombine.low %v117_v2, %v118_v14  ;;  %v1544_v26 = vshrl.u32 %v6322_v40, 16 }
  0x4f   :  { %1846 = vrot.lane.b32.xlu0 %v1759_v47, %s5736_s25  ;;  %v1515_v47 = vshll.u32 %v6245_v23, 16  ;;  %v1501_v21 = vor.u32 %v1500_v55, %v1496_v53  ;;  %v1780_v53 = vsel %vm1699_vm0, %v1778_v17, %v1779_v22  ;;  %v120_v22 = vld [vmem:[%s8352_s0 + $0x174] sm:$0xf] }
  0x50   :  { %1671 = vrot.lane.b32.xlu1 %v1470_v58, %s5737_s11  ;;  %v1769_v58 = vrot.slane %v6198_v37, 1 }
  0x51   :  { %v1517_v11 = vrot.slane %v1515_v47, 1  ;;  %v1506_v41 = vsel %vm1194_vm1, %v1501_v21, %v1505_v16  ;;  %v6326_v47 = vcombine.low %v119_v7, %v119_v7  ;;  %v121_v7 = vld [vmem:[%s8352_s0 + $0x178] sm:$0xf] }
  0x52   :  { %v1771_v24 = vsel %vm1699_vm0, %v1769_v58, %v1770_v61 }
  0x53   :  { %1669 = vrot.lane.b32.xlu0 %v1458_v8, %s5737_s11  ;;  %v6289_v8 = vcombine.low %v113_v31, %v113_v31  ;;  %v1518_v34 = vsel %vm1194_vm1, %v1513_v10, %v1517_v11  ;;  %v1546_v10 = vshll.u32 %v6322_v40, 16  ;;  %v1525_v11 = vor.u32 %v1524_v46, %v1520_v45 }
  0x54   :  { %1852 = vrot.lane.b32.xlu1 %v1768_v20, %s5736_s25  ;;  %v6304_v20 = vcombine.low %v110_v50, %v110_v50  ;;  %v1558_v50 = vshll.u32 %v6313_v32, 16  ;;  %v1563_v17 = vshll.u32 %v6326_v47, 16 }
  0x55   :  { %v1539_v23 = vshll.u32 %v6289_v8, 16  ;;  %v1785_v21 = vrot.slane %v6289_v8, 1 }
  0x56   :  { %v1527_v31 = vshll.u32 %v6304_v20, 16  ;;  %v1560_v14 = vrot.slane %v1558_v50, 1  ;;  %v1782_v8 = vrot.slane %v6304_v20, 1  ;;  %v122_v50 = vld [vmem:[%s8352_s0 + $0x17c] sm:$0x1] }
  0x57   :  { %1850 = vrot.lane.b32.xlu0 %v1765_v35, %s5736_s25  ;;  %v1536_v35 = vrot.slane %v1534_v13, 1  ;;  %v1541_v55 = vrot.slane %v1539_v23, 1  ;;  %v1556_v13 = vshrl.u32 %v6313_v32, 16  ;;  %v5487_v23 = vld [vmem:[%s8353_s1 + $0x28] sm:$0xff]   ;;  %v1786_v45 = vsel %vm1699_vm0, %v1784_v19, %v1785_v21  ;;  %v127_v21 = vld [vmem:[%s8352_s0 + $0x190] sm:$0xf] }
  0x58   :  { %1675 = vrot.lane.b32.xlu1 %v1494_v39, %s5737_s11  ;;  %v1775_v39 = vrot.slane %v6236_v60, 1  ;;  %v1529_v61 = vrot.slane %v1527_v31, 1  ;;  %v6371_v31 = vcombine.low %v120_v22, %v121_v7  ;;  %5183 = vmatprep.subr.bf16.mxu1 %v5487_v23  ;;  %v131_v22 = vld [vmem:[%s8352_s0 + $0x1a0] sm:$0x1] }
  0x59   :  { %v1537_v27 = vor.u32 %v1536_v35, %v1532_v25  ;;  %v125_v25 = vld [vmem:[%s8352_s0 + $0x188] sm:$0x1]  ;;  %5184 = vmatpush3.bf16.msra.mxu1 %v5487_v23 }
  0x5a   :  { %v1777_v58 = vsel %vm1699_vm0, %v1775_v39, %v1776_v42  ;;  %v1530_v39 = vsel %vm1194_vm1, %v1525_v11, %v1529_v61  ;;  %v1565_v42 = vrot.slane %v1563_v17, 1  ;;  %v6374_v20 = vcombine.low %v125_v25, %v125_v25 }
  0x5b   :  { %1673 = vrot.lane.b32.xlu0 %v1482_v59, %s5737_s11  ;;  %v124_v59 = vld [vmem:[%s8352_s0 + $0x184] sm:$0xf]  ;;  %v1542_v57 = vsel %vm1194_vm1, %v1537_v27, %v1541_v55  ;;  %v6395_v11 = vcombine.low %v122_v50, %v122_v50  ;;  %v1787_v25 = vrot.slane %v6322_v40, 1 }
  0x5c   :  { %1856 = vrot.lane.b32.xlu1 %v1774_v52, %s5736_s25  ;;  %v116_v52 = vld [vmem:[%s8352_s0 + $0x164] sm:$0x1]  ;;  %v6350_v16 = vcombine.low %v123_v56, %v124_v59  ;;  %v1790_v56 = vrot.slane %v6313_v32, 1  ;;  %v1791_v59 = vrot.slane %v6326_v47, 1 }
  0x5d   :  { %v6341_v2 = vcombine.low %v116_v52, %v116_v52  ;;  %v129_v52 = vld [vmem:[%s8352_s0 + $0x198] sm:$0xf]  ;;  %v1575_v23 = vshll.u32 %v6395_v11, 16 }
  0x5e   :  { %v1582_v46 = vshll.u32 %v6350_v16, 16  ;;  %v1580_v47 = vshrl.u32 %v6350_v16, 16 }
  0x5f   :  { %1854 = vrot.lane.b32.xlu0 %v1771_v24, %s5736_s25  ;;  %v1781_v24 = vrot.slane %v6284_v0, 1  ;;  %v1551_v35 = vshll.u32 %v6341_v2, 16 }
  0x60   :  { %1679 = vrot.lane.b32.xlu1 %v1518_v34, %s5737_s11  ;;  %v1548_v34 = vrot.slane %v1546_v10, 1  ;;  %v1584_v17 = vrot.slane %v1582_v46, 1 }
  0x61   :  { %v1553_v55 = vrot.slane %v1551_v35, 1  ;;  %v1783_v61 = vsel %vm1699_vm0, %v1781_v24, %v1782_v8  ;;  %v1792_v24 = vsel %vm1699_vm0, %v1790_v56, %v1791_v59  ;;  %v1788_v8 = vrot.slane %v6341_v2, 1  ;;  %v128_v2 = vld [vmem:[%s8352_s0 + $0x194] sm:$0x1] }
  0x62   :  { %v1549_v27 = vor.u32 %v1548_v34, %v1544_v26  ;;  %v5490_v26 = vld [vmem:[%s8353_s1 + $0x18] sm:$0xff]   ;;  %v1568_v34 = vshrl.u32 %v6371_v31, 16  ;;  %v1577_v56 = vrot.slane %v1575_v23, 1  ;;  %v6438_v59 = vcombine.low %v128_v2, %v128_v2  ;;  %v5493_v23 = vld [vmem:[%s8353_s1] sm:$0xff]  }
  0x63   :  { %1677 = vrot.lane.b32.xlu0 %v1506_v41, %s5737_s11  ;;  %v1561_v41 = vor.u32 %v1560_v14, %v1556_v13  ;;  %v1570_v13 = vshll.u32 %v6371_v31, 16  ;;  %v126_v14 = vld [vmem:[%s8352_s0 + $0x18c] sm:$0xf]  ;;  %v1789_v50 = vsel %vm1699_vm0, %v1787_v25, %v1788_v8  ;;  %v6457_v25 = vld [vmem:[%s8352_s0] sm:$0xff]  }
  0x64   :  { %1860 = vrot.lane.b32.xlu1 %v1780_v53, %s5736_s25  ;;  %v130_v53 = vld [vmem:[%s8352_s0 + $0x19c] sm:$0xf]  ;;  %v1554_v7 = vsel %vm1194_vm1, %v1549_v27, %v1553_v55  ;;  %v5491_v27 = vld [vmem:[%s8353_s1 + $0x10] sm:$0xff]  }
  0x65   :  { %v1566_v10 = vsel %vm1194_vm1, %v1561_v41, %v1565_v42  ;;  %v6403_v19 = vcombine.low %v129_v52, %v130_v53  ;;  %v1572_v35 = vrot.slane %v1570_v13, 1  ;;  %v1585_v41 = vor.u32 %v1584_v17, %v1580_v47 }
  0x66   :  { %v1796_v52 = vrot.slane %v6350_v16, 1  ;;  %v1797_v53 = vrot.slane %v6374_v20, 1  ;;  %v1793_v47 = vrot.slane %v6371_v31, 1  ;;  %v1794_v17 = vrot.slane %v6395_v11, 1 }
  0x67   :  { %1858 = vrot.lane.b32.xlu0 %v1777_v58, %s5736_s25  ;;  %v5488_v58 = vld [vmem:[%s8353_s1 + $0x20] sm:$0xff]   ;;  %v1606_v46 = vshll.u32 %v6403_v19, 16  ;;  %v1573_v55 = vor.u32 %v1572_v35, %v1568_v34  ;;  %v6465_v35 = vld [vmem:[%s8352_s0 + $0xcc] sm:$0xff]  }
  0x68   :  { %1683 = vrot.lane.b32.xlu1 %v1542_v57, %s5737_s11  ;;  %v1587_v57 = vshll.u32 %v6374_v20, 16  ;;  %5185 = vmatprep.subr.bf16.mxu1 %v5488_v58  ;;  %v1798_v11 = vsel %vm1699_vm0, %v1796_v52, %v1797_v53  ;;  %v1795_v34 = vsel %vm1699_vm0, %v1793_v47, %v1794_v17  ;;  %v1198_v52 = vshll.u32 %v6457_v25, 16 }
  0x69   :  { %5186 = vmatpush3.bf16.msra.mxu1 %v5488_v58  ;;  %v1608_v13 = vrot.slane %v1606_v46, 1 }
  0x6a   :  { %v1589_v42 = vrot.slane %v1587_v57, 1  ;;  %5187 = vmatprep.subr.bf16.mxu1 %v5490_v26  ;;  %v5492_v57 = vld [vmem:[%s8353_s1 + $0x8] sm:$0xff]   ;;  %v1200_v47 = vrot.slane %v1198_v52, 1 }
  0x6b   :  { %1681 = vrot.lane.b32.xlu0 %v1530_v39, %s5737_s11  ;;  %v6422_v39 = vcombine.low %v126_v14, %v127_v21  ;;  %v1578_v21 = vsel %vm1194_vm1, %v1573_v55, %v1577_v56  ;;  %v1802_v55 = vrot.slane %v6403_v19, 1  ;;  %v6526_v52 = vld [vmem:[%s8352_s0 + $0x1a4] sm:$0xff]  }
  0x6c   :  { %1864 = vrot.lane.b32.xlu1 %v1786_v45, %s5736_s25  ;;  %v6424_v45 = vcombine.low %v131_v22, %v131_v22 }
  0x6d   :  { %5188 = vmatpush3.bf16.msra.mxu1 %v5490_v26  ;;  %v1594_v58 = vshll.u32 %v6422_v39, 16  ;;  %v1592_v22 = vshrl.u32 %v6422_v39, 16 }
  0x6e   :  { %v1611_v14 = vshll.u32 %v6424_v45, 16  ;;  %5189 = vmatprep.subr.bf16.mxu1 %v5491_v27  ;;  %v1803_v56 = vrot.slane %v6424_v45, 1  ;;  %v1402_v45 = vshll.u32 %v6465_v35, 16 }
  0x6f   :  { %1862 = vrot.lane.b32.xlu0 %v1783_v61, %s5736_s25  ;;  %v1590_v61 = vsel %vm1194_vm1, %v1585_v41, %v1589_v42 }
  0x70   :  { %1687 = vrot.lane.b32.xlu1 %v1566_v10, %s5737_s11  ;;  %v1604_v10 = vshrl.u32 %v6403_v19, 16  ;;  %v1613_v26 = vrot.slane %v1611_v14, 1 }
  0x71   :  { %5190 = vmatpush3.bf16.msra.mxu1 %v5491_v27 }
  0x72   :  { %v1609_v8 = vor.u32 %v1608_v13, %v1604_v10  ;;  %5191 = vmatprep.subr.bf16.mxu1 %v5492_v57  ;;  %v5483_v10 = vld [vmem:[%s8352_s0 + $0xd4] ss:$0 sps:$4 sm:$0x11]  }
  0x73   :  { %1685 = vrot.lane.b32.xlu0 %v1554_v7, %s5737_s11  ;;  %v1596_v7 = vrot.slane %v1594_v58, 1 }
  0x74   :  { %1868 = vrot.lane.b32.xlu1 %v1792_v24, %s5736_s25  ;;  %v1599_v24 = vshll.u32 %v6438_v59, 16  ;;  %v1614_v27 = vsel %vm1194_vm1, %v1609_v8, %v1613_v26  ;;  %v1404_v26 = vrot.slane %v1402_v45, 1 }
  0x75   :  { %5192 = vmatpush3.bf16.msra.mxu1 %v5492_v57  ;;  %v1597_v46 = vor.u32 %v1596_v7, %v1592_v22  ;;  %v6498_v57 = vld [vmem:[%s8352_s0 + $0xd8] sm:$0xff]   ;;  %v1700_v22 = vrot.slane %v6457_v25, 1 }
  0x76   :  { %v1601_v2 = vrot.slane %v1599_v24, 1  ;;  %5193 = vmatprep.subr.bf16.mxu1 %v5493_v23  ;;  %v5479_v24 = vld [vmem:[%s8353_s1 + $0x80] sm:$0xff]  }
  0x77   :  { %1866 = vrot.lane.b32.xlu0 %v1789_v50, %s5736_s25  ;;  %v5478_v50 = vld [vmem:[%s8352_s0 + $0x8] ss:$0 sps:$4 sm:$0x11]  }
  0x78   :  { %1691 = vrot.lane.b32.xlu1 %v1590_v61, %s5737_s11  ;;  %v1799_v61 = vrot.slane %v6422_v39, 1  ;;  %v1602_v14 = vsel %vm1194_vm1, %v1597_v46, %v1601_v2  ;;  %v1203_v17 = vshll.u32 %v5478_v50, 16  ;;  %v1701_v7 = vrot.slane %v5478_v50, 1 }
  0x79   :  { %v1811_v20 = vpop.permute.xlu1 %1810  ;;  %5194 = vmatpush3.bf16.msra.mxu1 %v5493_v23  ;;  %v5485_v23 = vld [vmem:[%s8352_s0 + $0xe0] ss:$0 sps:$4 sm:$0x11]   ;;  %v1414_v50 = vshll.u32 %v6498_v57, 16 }
  0x7a   :  { %v1205_v2 = vrot.slane %v1203_v17, 1 }
  0x7b   :  { %1689 = vrot.lane.b32.xlu0 %v1578_v21, %s5737_s11  ;;  %v1804_v21 = vsel %vm1699_vm0, %v1802_v55, %v1803_v56  ;;  %v5480_v55 = vld [vmem:[%s8353_s1 + $0x78] sm:$0xff]   ;;  %v1751_v56 = vrot.slane %v6465_v35, 1 }
  0x7c   :  { %1872 = vrot.lane.b32.xlu1 %v1798_v11, %s5736_s25 }
  0x7d   :  { %v1630_v41 = vpop.permute.xlu0 %1629  ;;  %v1813_v42 = vpop.permute.xlu1 %1812 }
  0x7e   :  { %v1884_v53 = vsel %vm1880_vm2, %v5788_v3, %v1630_v41  ;;  %v1800_v3 = vrot.slane %v6438_v59, 1  ;;  %v5638_v41 = vld [vmem:[%s8353_s1 + $0x88] sm:$0xff]  }
  0x7f   :  { %v6481_v58 = vsel %vm1953_vm3, %v1884_v53, %v1811_v20  ;;  %1870 = vrot.lane.b32.xlu0 %v1795_v34, %s5736_s25  ;;  %v1196_v20 = vshrl.u32 %v6457_v25, 16  ;;  %v1407_v34 = vshll.u32 %v5483_v10, 16 }
  0x80   :  { %5119 = vmatprep.mubr.msk.bf16.mxu0 %vm2087_vm4, %v6481_v58  ;;  %1695 = vrot.lane.b32.xlu1 %v1614_v27, %s5737_s11  ;;  %v1702_v27 = vsel %vm1699_vm0, %v1700_v22, %v1701_v7 }
  0x81   :  { %v1632_v13 = vpop.permute.xlu0 %1631  ;;  %v1201_v46 = vor.u32 %v1200_v47, %v1196_v20  ;;  %v1419_v20 = vshll.u32 %v5485_v23, 16 }
  0x82   :  { %v1886_v59 = vsel %vm1880_vm2, %v5802_v9, %v1632_v13  ;;  %v1636_v11 = vpop.permute.xlu1 %1635  ;;  %v1400_v9 = vshrl.u32 %v6465_v35, 16  ;;  %v1409_v13 = vrot.slane %v1407_v34, 1  ;;  %v5481_v34 = vld [vmem:[%s8353_s1 + $0x70] sm:$0xff]  }
  0x83   :  { %v6508_v8 = vsel %vm1953_vm3, %v1886_v59, %v1813_v42  ;;  %1693 = vrot.lane.b32.xlu0 %v1602_v14, %s5737_s11  ;;  %v1801_v42 = vsel %vm1699_vm0, %v1799_v61, %v1800_v3  ;;  %v1752_v61 = vrot.slane %v5483_v10, 1  ;;  %v1412_v14 = vshrl.u32 %v6498_v57, 16  ;;  %v5495_v10 = vld [vmem:[%s8352_s0 + $0x1ac] ss:$0 sps:$4 sm:$0x11]  }
  0x84   :  { %5120 = vmatmul.mubr.msk.bf16.vlgmr.msra.gmra.mxu0 %vm2087_vm4, %v6508_v8  ;;  %1876 = vrot.lane.b32.xlu1 %v1804_v21, %s5736_s25  ;;  %v1405_v45 = vor.u32 %v1404_v26, %v1400_v9  ;;  %v1890_v47 = vsel %vm1880_vm2, %v5827_v30, %v1636_v11  ;;  %v1206_v17 = vsel %vm1194_vm1, %v1201_v46, %v1205_v2  ;;  %v1416_v59 = vrot.slane %v1414_v50, 1 }
  0x85   :  { %5260 = vmatpush3.bf16.msra.mxu0 %v5638_v41  ;;  %v1634_v53 = vpop.permute.xlu0 %1633  ;;  %v1618_v21 = vshll.u32 %v6526_v52, 16  ;;  %v1753_v9 = vsel %vm1699_vm0, %v1751_v56, %v1752_v61  ;;  %v1754_v30 = vrot.slane %v6498_v57, 1  ;;  %v1755_v11 = vrot.slane %v5485_v23, 1 }
  0x86   :  { %5261 = vmatprep.subr.bf16.mxu0 %v5479_v24  ;;  %v1817_v3 = vpop.permute.xlu1 %1816  ;;  %v1888_v22 = vsel %vm1880_vm2, %v5847_v44, %v1634_v53  ;;  %v1410_v44 = vsel %vm1194_vm1, %v1405_v45, %v1409_v13  ;;  %v1417_v23 = vor.u32 %v1416_v59, %v1412_v14  ;;  %v1616_v46 = vshrl.u32 %v6526_v52, 16  ;;  %v5486_v45 = vld [vmem:[%s8353_s1 + $0x68] sm:$0xff]  }
  0x87   :  { %1874 = vrot.lane.b32.xlu0 %v1801_v42, %s5736_s25  ;;  %v6554_v41 = vsel %vm1953_vm3, %v1890_v47, %v1817_v3  ;;  %v1421_v42 = vrot.slane %v1419_v20, 1  ;;  %v1620_v2 = vrot.slane %v1618_v21, 1  ;;  %v1623_v50 = vshll.u32 %v5495_v10, 16 }
  0x88   :  { %1808 = vrot.lane.b32.xlu1 %v1702_v27, %s5736_s25  ;;  %v1756_v27 = vsel %vm1699_vm0, %v1754_v30, %v1755_v11  ;;  %v1805_v56 = vrot.slane %v6526_v52, 1  ;;  %v1806_v61 = vrot.slane %v5495_v10, 1 }
  0x89   :  { %5262 = vmatpush3.bf16.msra.mxu0 %v5479_v24  ;;  %v1815_v7 = vpop.permute.xlu0 %1814  ;;  %v1422_v14 = vsel %vm1194_vm1, %v1417_v23, %v1421_v42  ;;  %v1625_v20 = vrot.slane %v1623_v50, 1 }
  0x8a   :  { %5263 = vmatprep.subr.bf16.mxu0 %v5480_v55  ;;  %v6548_v26 = vsel %vm1953_vm3, %v1888_v22, %v1815_v7  ;;  %v1640_v24 = vpop.permute.xlu1 %1639  ;;  %v1807_v59 = vsel %vm1699_vm0, %v1805_v56, %v1806_v61 }
  0x8b   :  { %5123 = vmatprep.mubr.msk.bf16.mxu0 %vm2087_vm4, %v6548_v26  ;;  %1627 = vrot.lane.b32.xlu0 %v1206_v17, %s5737_s11  ;;  %v1894_v13 = vsel %vm1880_vm2, %v5872_v63, %v1640_v24  ;;  %v5489_v63 = vld [vmem:[%s8353_s1 + $0x60] sm:$0xff]  }
  0x8c   :  { %5124 = vmatmul.mubr.msk.bf16.gmra.mxu0 %vm2087_vm4, %v6554_v41  ;;  %1842 = vrot.lane.b32.xlu1 %v1753_v9, %s5736_s25 }
  0x8d   :  { %v1638_v53 = vpop.permute.xlu0 %1637  ;;  %5264 = vmatpush3.bf16.msra.mxu0 %v5480_v55  ;;  %v1621_v55 = vor.u32 %v1620_v2, %v1616_v46 }
  0x8e   :  { %v1821_v3 = vpop.permute.xlu1 %1820  ;;  %5265 = vmatprep.subr.bf16.mxu0 %v5481_v34  ;;  %v1892_v47 = vsel %vm1880_vm2, %v5879_v6, %v1638_v53 }
  0x8f   :  { %1661 = vrot.lane.b32.xlu0 %v1410_v44, %s5737_s11  ;;  %v6584_v22 = vsel %vm1953_vm3, %v1894_v13, %v1821_v3  ;;  %v1626_v6 = vsel %vm1194_vm1, %v1621_v55, %v1625_v20 }
  0x90   :  { %1844 = vrot.lane.b32.xlu1 %v1756_v27, %s5736_s25 }
  0x91   :  { %v1819_v17 = vpop.permute.xlu0 %1818  ;;  %5266 = vmatpush3.bf16.msra.mxu0 %v5481_v34 }
  0x92   :  { %v6578_v10 = vsel %vm1953_vm3, %v1892_v47, %v1819_v17  ;;  %v1644_v21 = vpop.permute.xlu1 %1643  ;;  %5267 = vmatprep.subr.bf16.mxu0 %v5486_v45 }
  0x93   :  { %5127 = vmatprep.mubr.msk.bf16.mxu0 %vm2087_vm4, %v6578_v10  ;;  %1663 = vrot.lane.b32.xlu0 %v1422_v14, %s5737_s11  ;;  %v1898_v30 = vsel %vm1880_vm2, %v5904_v28, %v1644_v21 }
  0x94   :  { %5128 = vmatmul.mubr.msk.bf16.gmra.mxu0 %vm2087_vm4, %v6584_v22  ;;  %1878 = vrot.lane.b32.xlu1 %v1807_v59, %s5736_s25 }
  0x95   :  { %v1642_v7 = vpop.permute.xlu0 %1641  ;;  %5268 = vmatpush3.bf16.msra.mxu0 %v5486_v45 }
  0x96   :  { %v1825_v9 = vpop.permute.xlu1 %1824  ;;  %5269 = vmatprep.subr.bf16.mxu0 %v5489_v63  ;;  %v1896_v11 = vsel %vm1880_vm2, %v5931_v48, %v1642_v7 }
  0x97   :  { %1697 = vrot.lane.b32.xlu0 %v1626_v6, %s5737_s11  ;;  %v6602_v42 = vsel %vm1953_vm3, %v1898_v30, %v1825_v9 }
  0x99   :  { %v1823_v24 = vpop.permute.xlu0 %1822  ;;  %5270 = vmatpush3.bf16.msra.mxu0 %v5489_v63 }
  0x9a   :  { %v6599_v34 = vsel %vm1953_vm3, %v1896_v11, %v1823_v24  ;;  %v1648_v44 = vpop.permute.xlu1 %1647 }
  0x9b   :  { %5131 = vmatprep.mubr.msk.bf16.mxu0 %vm2087_vm4, %v6599_v34  ;;  %v1902_v48 = vsel %vm1880_vm2, %v5937_v54, %v1648_v44 }
  0x9c   :  { %5132 = vmatmul.mubr.msk.bf16.gmra.mxu0 %vm2087_vm4, %v6602_v42 }
  0x9d   :  { %v1646_v23 = vpop.permute.xlu0 %1645 }
  0x9e   :  { %v1829_v28 = vpop.permute.xlu1 %1828  ;;  %v1900_v46 = vsel %vm1880_vm2, %v5960_v12, %v1646_v23 }
  0x9f   :  { %v6616_v27 = vsel %vm1953_vm3, %v1902_v48, %v1829_v28 }
  0xa1   :  { %v1827_v2 = vpop.permute.xlu0 %1826 }
  0xa2   :  { %v6613_v50 = vsel %vm1953_vm3, %v1900_v46, %v1827_v2  ;;  %v1652_v53 = vpop.permute.xlu1 %1651 }
  0xa3   :  { %5135 = vmatprep.mubr.msk.bf16.mxu0 %vm2087_vm4, %v6613_v50  ;;  %v1906_v54 = vsel %vm1880_vm2, %v5984_v33, %v1652_v53 }
  0xa4   :  { %5136 = vmatmul.mubr.msk.bf16.gmra.mxu0 %vm2087_vm4, %v6616_v27 }
  0xa5   :  { %v1650_v56 = vpop.permute.xlu0 %1649 }
  0xa6   :  { %v1833_v61 = vpop.permute.xlu1 %1832  ;;  %v1904_v12 = vsel %vm1880_vm2, %v5991_v36, %v1650_v56 }
  0xa7   :  { %v6630_v14 = vsel %vm1953_vm3, %v1906_v54, %v1833_v61 }
  0xa9   :  { %v1831_v3 = vpop.permute.xlu0 %1830 }
  0xaa   :  { %v6627_v45 = vsel %vm1953_vm3, %v1904_v12, %v1831_v3  ;;  %v1656_v13 = vpop.permute.xlu1 %1655 }
  0xab   :  { %5139 = vmatprep.mubr.msk.bf16.mxu0 %vm2087_vm4, %v6627_v45  ;;  %v1910_v33 = vsel %vm1880_vm2, %v6024_v62, %v1656_v13 }
  0xac   :  { %5140 = vmatmul.mubr.msk.bf16.gmra.mxu0 %vm2087_vm4, %v6630_v14 }
  0xad   :  { %v1654_v55 = vpop.permute.xlu0 %1653 }
  0xae   :  { %v1837_v20 = vpop.permute.xlu1 %1836  ;;  %v1908_v36 = vsel %vm1880_vm2, %v6031_v5, %v1654_v55 }
  0xaf   :  { %v6644_v21 = vsel %vm1953_vm3, %v1910_v33, %v1837_v20 }
  0xb1   :  { %v1835_v47 = vpop.permute.xlu0 %1834 }
  0xb2   :  { %v6641_v17 = vsel %vm1953_vm3, %v1908_v36, %v1835_v47  ;;  %v1660_v59 = vpop.permute.xlu1 %1659  ;;  %v5496_v47 = vld [vmem:[%s8354_s3 + $0x8] sm:$0xff]  }
  0xb3   :  { %5143 = vmatprep.mubr.msk.bf16.mxu0 %vm2087_vm4, %v6641_v17  ;;  %v1914_v62 = vsel %vm1880_vm2, %v6063_v29, %v1660_v59  ;;  %5335 = vmatprep.subr.bf16.mxu1 %v5496_v47 }
  0xb4   :  { %5144 = vmatmul.mubr.msk.bf16.gmra.mxu0 %vm2087_vm4, %v6644_v21 }
  0xb5   :  { %v1658_v63 = vpop.permute.xlu0 %1657 }
  0xb6   :  { %v1841_v6 = vpop.permute.xlu1 %1840  ;;  %v1912_v5 = vsel %vm1880_vm2, %v6070_v38, %v1658_v63 }
  0xb7   :  { %v6658_v11 = vsel %vm1953_vm3, %v1914_v62, %v1841_v6 }
  0xb9   :  { %v1839_v7 = vpop.permute.xlu0 %1838 }
  0xba   :  { %v6655_v9 = vsel %vm1953_vm3, %v1912_v5, %v1839_v7  ;;  %v1668_v30 = vpop.permute.xlu1 %1667 }
  0xbb   :  { %5147 = vmatprep.mubr.msk.bf16.mxu0 %vm2087_vm4, %v6655_v9  ;;  %v1922_v29 = vsel %vm1880_vm2, %v6096_v1, %v1668_v30 }
  0xbc   :  { %5148 = vmatmul.mubr.msk.bf16.gmra.mxu0 %vm2087_vm4, %v6658_v11 }
  0xbd   :  { %v1666_v24 = vpop.permute.xlu0 %1665 }
  0xbe   :  { %v1849_v44 = vpop.permute.xlu1 %1848  ;;  %v1920_v38 = vsel %vm1880_vm2, %v6110_v18, %v1666_v24 }
  0xbf   :  { %v6672_v46 = vsel %vm1953_vm3, %v1922_v29, %v1849_v44 }
  0xc1   :  { %v1847_v23 = vpop.permute.xlu0 %1846 }
  0xc2   :  { %v6669_v28 = vsel %vm1953_vm3, %v1920_v38, %v1847_v23  ;;  %v1672_v48 = vpop.permute.xlu1 %1671 }
  0xc3   :  { %5151 = vmatprep.mubr.msk.bf16.mxu0 %vm2087_vm4, %v6669_v28  ;;  %v1926_v1 = vsel %vm1880_vm2, %v6139_v43, %v1672_v48 }
  0xc4   :  { %5152 = vmatmul.mubr.msk.bf16.gmra.mxu0 %vm2087_vm4, %v6672_v46 }
  0xc5   :  { %v1670_v2 = vpop.permute.xlu0 %1669 }
  0xc6   :  { %v1853_v53 = vpop.permute.xlu1 %1852  ;;  %v1924_v18 = vsel %vm1880_vm2, %v6150_v51, %v1670_v2 }
  0xc7   :  { %v6686_v12 = vsel %vm1953_vm3, %v1926_v1, %v1853_v53 }
  0xc9   :  { %v1851_v56 = vpop.permute.xlu0 %1850 }
  0xca   :  { %v6683_v61 = vsel %vm1953_vm3, %v1924_v18, %v1851_v56  ;;  %v1676_v54 = vpop.permute.xlu1 %1675 }
  0xcb   :  { %5155 = vmatprep.mubr.msk.bf16.mxu0 %vm2087_vm4, %v6683_v61  ;;  %v1930_v43 = vsel %vm1880_vm2, %v6175_v15, %v1676_v54 }
  0xcc   :  { %5156 = vmatmul.mubr.msk.bf16.gmra.mxu0 %vm2087_vm4, %v6686_v12 }
  0xcd   :  { %v1674_v3 = vpop.permute.xlu0 %1673 }
  0xce   :  { %v1857_v13 = vpop.permute.xlu1 %1856  ;;  %v1928_v51 = vsel %vm1880_vm2, %v6198_v37, %v1674_v3 }
  0xcf   :  { %v6700_v36 = vsel %vm1953_vm3, %v1930_v43, %v1857_v13 }
  0xd1   :  { %v1855_v55 = vpop.permute.xlu0 %1854 }
  0xd2   :  { %v6697_v20 = vsel %vm1953_vm3, %v1928_v51, %v1855_v55  ;;  %v1680_v33 = vpop.permute.xlu1 %1679 }
  0xd3   :  { %5159 = vmatprep.mubr.msk.bf16.mxu0 %vm2087_vm4, %v6697_v20  ;;  %v1934_v59 = vsel %vm1880_vm2, %v6227_v4, %v1680_v33 }
  0xd4   :  { %5160 = vmatmul.mubr.msk.bf16.gmra.mxu0 %vm2087_vm4, %v6700_v36 }
  0xd5   :  { %v1678_v15 = vpop.permute.xlu0 %1677 }
  0xd6   :  { %v1861_v37 = vpop.permute.xlu1 %1860  ;;  %v1932_v63 = vsel %vm1880_vm2, %v6236_v60, %v1678_v15 }
  0xd7   :  { %v6717_v7 = vsel %vm1953_vm3, %v1934_v59, %v1861_v37 }
  0xd9   :  { %v1859_v6 = vpop.permute.xlu0 %1858 }
  0xda   :  { %v6714_v62 = vsel %vm1953_vm3, %v1932_v63, %v1859_v6  ;;  %v1684_v5 = vpop.permute.xlu1 %1683 }
  0xdb   :  { %5163 = vmatprep.mubr.msk.bf16.mxu0 %vm2087_vm4, %v6714_v62  ;;  %v1938_v4 = vsel %vm1880_vm2, %v6271_v49, %v1684_v5 }
  0xdc   :  { %5164 = vmatmul.mubr.msk.bf16.gmra.mxu0 %vm2087_vm4, %v6717_v7 }
  0xdd   :  { %v1682_v30 = vpop.permute.xlu0 %1681 }
  0xde   :  { %v1865_v24 = vpop.permute.xlu1 %1864  ;;  %v1936_v60 = vsel %vm1880_vm2, %v6284_v0, %v1682_v30 }
  0xdf   :  { %v6731_v23 = vsel %vm1953_vm3, %v1938_v4, %v1865_v24 }
  0xe1   :  { %v1863_v44 = vpop.permute.xlu0 %1862 }
  0xe2   :  { %v6728_v29 = vsel %vm1953_vm3, %v1936_v60, %v1863_v44  ;;  %v1688_v38 = vpop.permute.xlu1 %1687 }
  0xe3   :  { %5167 = vmatprep.mubr.msk.bf16.mxu0 %vm2087_vm4, %v6728_v29  ;;  %v1942_v49 = vsel %vm1880_vm2, %v6313_v32, %v1688_v38 }
  0xe4   :  { %5168 = vmatmul.mubr.msk.bf16.gmra.mxu0 %vm2087_vm4, %v6731_v23 }
  0xe5   :  { %v1686_v48 = vpop.permute.xlu0 %1685 }
  0xe6   :  { %v1869_v2 = vpop.permute.xlu1 %1868  ;;  %v1940_v0 = vsel %vm1880_vm2, %v6322_v40, %v1686_v48 }
  0xe7   :  { %v6745_v56 = vsel %vm1953_vm3, %v1942_v49, %v1869_v2 }
  0xe9   :  { %v1867_v53 = vpop.permute.xlu0 %1866 }
  0xea   :  { %v6742_v1 = vsel %vm1953_vm3, %v1940_v0, %v1867_v53  ;;  %v1692_v18 = vpop.permute.xlu1 %1691 }
  0xeb   :  { %5171 = vmatprep.mubr.msk.bf16.mxu0 %vm2087_vm4, %v6742_v1  ;;  %v1946_v32 = vsel %vm1880_vm2, %v6350_v16, %v1692_v18 }
  0xec   :  { %5172 = vmatmul.mubr.msk.bf16.gmra.mxu0 %vm2087_vm4, %v6745_v56 }
  0xed   :  { %v1690_v54 = vpop.permute.xlu0 %1689 }
  0xee   :  { %v1873_v3 = vpop.permute.xlu1 %1872  ;;  %v1944_v40 = vsel %vm1880_vm2, %v6371_v31, %v1690_v54 }
  0xef   :  { %v6759_v55 = vsel %vm1953_vm3, %v1946_v32, %v1873_v3 }
  0xf1   :  { %v1871_v13 = vpop.permute.xlu0 %1870 }
  0xf2   :  { %v6756_v43 = vsel %vm1953_vm3, %v1944_v40, %v1871_v13  ;;  %v1696_v51 = vpop.permute.xlu1 %1695 }
  0xf3   :  { %5175 = vmatprep.mubr.msk.bf16.mxu0 %vm2087_vm4, %v6756_v43  ;;  %v1950_v16 = vsel %vm1880_vm2, %v6403_v19, %v1696_v51 }
  0xf4   :  { %5176 = vmatmul.mubr.msk.bf16.gmra.mxu0 %vm2087_vm4, %v6759_v55 }
  0xf5   :  { %v1694_v33 = vpop.permute.xlu0 %1693 }
  0xf6   :  { %v1877_v15 = vpop.permute.xlu1 %1876  ;;  %v1948_v31 = vsel %vm1880_vm2, %v6422_v39, %v1694_v33 }
  0xf7   :  { %v6773_v63 = vsel %vm1953_vm3, %v1950_v16, %v1877_v15 }
  0xf9   :  { %v1875_v37 = vpop.permute.xlu0 %1874 }
  0xfa   :  { %v6770_v59 = vsel %vm1953_vm3, %v1948_v31, %v1875_v37  ;;  %v1809_v6 = vpop.permute.xlu1 %1808 }
  0xfb   :  { %5179 = vmatprep.mubr.msk.bf16.mxu0 %vm2087_vm4, %v6770_v59 }
  0xfc   :  { %5180 = vmatmul.mubr.msk.bf16.gmra.mxu0 %vm2087_vm4, %v6773_v63 }
  0xfd   :  { %5271 = vmatprep.mubr.msk.bf16.mxu0 %vm2087_vm4, %v6508_v8  ;;  %v1628_v19 = vpop.permute.xlu0 %1627 }
  0xfe   :  { %v1882_v39 = vsel %vm1880_vm2, %v6457_v25, %v1628_v19  ;;  %v5497_v25 = vld [vmem:[%s8354_s3] sm:$0xff]  }
  0xff   :  { %v1955_v5 = vsel %vm1953_vm3, %v1882_v39, %v1809_v6 }
 0x100   :  { %5195 = vmatprep.mubr.msk.bf16.mxu1 %vm2087_vm4, %v1955_v5 }
 0x101   :  { %5196 = vmatmul.mubr.msk.bf16.vlgmr.msra.gmra.mxu1 %vm2087_vm4, %v6481_v58  ;;  %v1662_v58 = vpop.permute.xlu0 %1661 }
 0x102   :  { %5199 = vmatprep.mubr.msk.bf16.mxu1 %vm2087_vm4, %v6508_v8  ;;  %5336 = vmatpush3.bf16.msra.mxu1 %v5496_v47  ;;  %v1843_v8 = vpop.permute.xlu1 %1842 }
 0x103   :  { %5337 = vmatprep.subr.bf16.mxu1 %v5497_v25 }
 0x104   :  { %5272 = vmatmul.mubr.msk.bf16.vlgmr.msra.gmra.mxu0 %vm2087_vm4, %v6548_v26 }
 0x105   :  { %5275 = vmatprep.mubr.msk.bf16.mxu0 %vm2087_vm4, %v6554_v41 }
 0x106   :  { %5338 = vmatpush3.bf16.msra.mxu1 %v5497_v25 }
 0x109   :  { %5200 = vmatmul.mubr.msk.bf16.gmra.mxu1 %vm2087_vm4, %v6548_v26  ;;  %v1664_v26 = vpop.permute.xlu0 %1663 }
 0x10a   :  { %5203 = vmatprep.mubr.msk.bf16.mxu1 %vm2087_vm4, %v6554_v41  ;;  %v1918_v41 = vsel %vm1880_vm2, %v6498_v57, %v1664_v26 }
 0x10c   :  { %5276 = vmatmul.mubr.msk.bf16.gmra.mxu0 %vm2087_vm4, %v6578_v10 }
 0x10d   :  { %5279 = vmatprep.mubr.msk.bf16.mxu0 %vm2087_vm4, %v6584_v22 }
 0x111   :  { %5204 = vmatmul.mubr.msk.bf16.gmra.mxu1 %vm2087_vm4, %v6578_v10  ;;  %v1845_v10 = vpop.permute.xlu1 %1844 }
 0x112   :  { %5207 = vmatprep.mubr.msk.bf16.mxu1 %vm2087_vm4, %v6584_v22  ;;  %v1916_v22 = vsel %vm1880_vm2, %v6465_v35, %v1662_v58 }
 0x114   :  { %5280 = vmatmul.mubr.msk.bf16.gmra.mxu0 %vm2087_vm4, %v6599_v34 }
 0x115   :  { %5283 = vmatprep.mubr.msk.bf16.mxu0 %vm2087_vm4, %v6602_v42  ;;  %v1879_v2 = vpop.permute.xlu1 %1878 }
 0x119   :  { %5208 = vmatmul.mubr.msk.bf16.gmra.mxu1 %vm2087_vm4, %v6599_v34  ;;  %v1991_v34 = vsel %vm1953_vm3, %v1918_v41, %v1845_v10 }
 0x11a   :  { %5211 = vmatprep.mubr.msk.bf16.mxu1 %vm2087_vm4, %v6602_v42  ;;  %v1989_v42 = vsel %vm1953_vm3, %v1916_v22, %v1843_v8 }
 0x11c   :  { %5284 = vmatmul.mubr.msk.bf16.gmra.mxu0 %vm2087_vm4, %v6613_v50 }
 0x11d   :  { %5287 = vmatprep.mubr.msk.bf16.mxu0 %vm2087_vm4, %v6616_v27 }
 0x121   :  { %5212 = vmatmul.mubr.msk.bf16.gmra.mxu1 %vm2087_vm4, %v6613_v50 }
 0x122   :  { %5215 = vmatprep.mubr.msk.bf16.mxu1 %vm2087_vm4, %v6616_v27 }
 0x124   :  { %5288 = vmatmul.mubr.msk.bf16.gmra.mxu0 %vm2087_vm4, %v6627_v45 }
 0x125   :  { %5291 = vmatprep.mubr.msk.bf16.mxu0 %vm2087_vm4, %v6630_v14 }
 0x129   :  { %5216 = vmatmul.mubr.msk.bf16.gmra.mxu1 %vm2087_vm4, %v6627_v45 }
 0x12a   :  { %5219 = vmatprep.mubr.msk.bf16.mxu1 %vm2087_vm4, %v6630_v14 }
 0x12c   :  { %5292 = vmatmul.mubr.msk.bf16.gmra.mxu0 %vm2087_vm4, %v6641_v17 }
 0x12d   :  { %5295 = vmatprep.mubr.msk.bf16.mxu0 %vm2087_vm4, %v6644_v21 }
 0x131   :  { %5220 = vmatmul.mubr.msk.bf16.gmra.mxu1 %vm2087_vm4, %v6641_v17 }
 0x132   :  { %5223 = vmatprep.mubr.msk.bf16.mxu1 %vm2087_vm4, %v6644_v21 }
 0x134   :  { %5296 = vmatmul.mubr.msk.bf16.gmra.mxu0 %vm2087_vm4, %v6655_v9 }
 0x135   :  { %5299 = vmatprep.mubr.msk.bf16.mxu0 %vm2087_vm4, %v6658_v11 }
 0x139   :  { %5224 = vmatmul.mubr.msk.bf16.gmra.mxu1 %vm2087_vm4, %v6655_v9 }
 0x13a   :  { %5227 = vmatprep.mubr.msk.bf16.mxu1 %vm2087_vm4, %v1991_v34 }
 0x13c   :  { %5300 = vmatmul.mubr.msk.bf16.gmra.mxu0 %vm2087_vm4, %v1989_v42 }
 0x13d   :  { %5303 = vmatprep.mubr.msk.bf16.mxu0 %vm2087_vm4, %v6672_v46 }
 0x141   :  { %5228 = vmatmul.mubr.msk.bf16.gmra.mxu1 %vm2087_vm4, %v6669_v28 }
 0x142   :  { %5231 = vmatprep.mubr.msk.bf16.mxu1 %vm2087_vm4, %v6672_v46 }
 0x144   :  { %v6860_v35 = vpop.f32.mrf.mxu0  ;;  %5304 = vmatmul.mubr.msk.bf16.gmra.mxu0 %vm2087_vm4, %v6683_v61 }
 0x145   :  { %5307 = vmatprep.mubr.msk.bf16.mxu0 %vm2087_vm4, %v6686_v12 }
 0x146   :  { %v6866_v57 = vpop.f32.mrf.mxu0 }
 0x148   :  { %v6868_v50 = vpop.f32.mrf.mxu0 }
 0x149   :  { %5232 = vmatmul.mubr.msk.bf16.gmra.mxu1 %vm2087_vm4, %v6683_v61 }
 0x14a   :  { %v6872_v27 = vpop.f32.mrf.mxu0  ;;  %5235 = vmatprep.mubr.msk.bf16.mxu1 %vm2087_vm4, %v6686_v12 }
 0x14c   :  { %v6876_v45 = vpop.f32.mrf.mxu0  ;;  %5308 = vmatmul.mubr.msk.bf16.gmra.mxu0 %vm2087_vm4, %v6697_v20 }
 0x14d   :  { %5311 = vmatprep.mubr.msk.bf16.mxu0 %vm2087_vm4, %v6700_v36 }
 0x14e   :  { %v6882_v14 = vpop.f32.mrf.mxu0 }
 0x150   :  { %v6884_v17 = vpop.f32.mrf.mxu0 }
 0x151   :  { %5236 = vmatmul.mubr.msk.bf16.gmra.mxu1 %vm2087_vm4, %v6697_v20 }
 0x152   :  { %v6888_v21 = vpop.f32.mrf.mxu0  ;;  %5239 = vmatprep.mubr.msk.bf16.mxu1 %vm2087_vm4, %v6700_v36 }
 0x154   :  { %v6892_v9 = vpop.f32.mrf.mxu0  ;;  %5312 = vmatmul.mubr.msk.bf16.gmra.mxu0 %vm2087_vm4, %v6714_v62 }
 0x155   :  { %5315 = vmatprep.mubr.msk.bf16.mxu0 %vm2087_vm4, %v6717_v7 }
 0x156   :  { %v6898_v11 = vpop.f32.mrf.mxu0 }
 0x158   :  { %v6900_v28 = vpop.f32.mrf.mxu0 }
 0x159   :  { %5240 = vmatmul.mubr.msk.bf16.gmra.mxu1 %vm2087_vm4, %v6714_v62 }
 0x15a   :  { %v6904_v46 = vpop.f32.mrf.mxu0  ;;  %5243 = vmatprep.mubr.msk.bf16.mxu1 %vm2087_vm4, %v6717_v7 }
 0x15c   :  { %v6908_v61 = vpop.f32.mrf.mxu0  ;;  %5316 = vmatmul.mubr.msk.bf16.gmra.mxu0 %vm2087_vm4, %v6728_v29 }
 0x15d   :  { %5319 = vmatprep.mubr.msk.bf16.mxu0 %vm2087_vm4, %v6731_v23 }
 0x15e   :  { %v6914_v12 = vpop.f32.mrf.mxu0 }
 0x160   :  { %v6916_v20 = vpop.f32.mrf.mxu0 }
 0x161   :  { %5244 = vmatmul.mubr.msk.bf16.gmra.mxu1 %vm2087_vm4, %v6728_v29  ;;  %v1698_v29 = vpop.permute.xlu0 %1697 }
 0x162   :  { %v6920_v36 = vpop.f32.mrf.mxu0  ;;  %5247 = vmatprep.mubr.msk.bf16.mxu1 %vm2087_vm4, %v6731_v23  ;;  %v1952_v48 = vsel %vm1880_vm2, %v6526_v52, %v1698_v29 }
 0x163   :  { %v2025_v0 = vsel %vm1953_vm3, %v1952_v48, %v1879_v2 }
 0x164   :  { %v6924_v47 = vpop.f32.mrf.mxu0  ;;  %5320 = vmatmul.mubr.msk.bf16.gmra.mxu0 %vm2087_vm4, %v6742_v1 }
 0x165   :  { %5323 = vmatprep.mubr.msk.bf16.mxu0 %vm2087_vm4, %v6745_v56 }
 0x166   :  { %v6930_v62 = vpop.f32.mrf.mxu0 }
 0x168   :  { %v6932_v7 = vpop.f32.mrf.mxu0 }
 0x169   :  { %5248 = vmatmul.mubr.msk.bf16.gmra.mxu1 %vm2087_vm4, %v6742_v1 }
 0x16a   :  { %v6936_v30 = vpop.f32.mrf.mxu0  ;;  %5251 = vmatprep.mubr.msk.bf16.mxu1 %vm2087_vm4, %v6745_v56 }
 0x16c   :  { %v6940_v24 = vpop.f32.mrf.mxu0  ;;  %5324 = vmatmul.mubr.msk.bf16.gmra.mxu0 %vm2087_vm4, %v6756_v43 }
 0x16d   :  { %5327 = vmatprep.mubr.msk.bf16.mxu0 %vm2087_vm4, %v6759_v55 }
 0x16e   :  { %v6946_v4 = vpop.f32.mrf.mxu0 }
 0x170   :  { %v6948_v60 = vpop.f32.mrf.mxu0 }
 0x171   :  { %5252 = vmatmul.mubr.msk.bf16.gmra.mxu1 %vm2087_vm4, %v6756_v43 }
 0x172   :  { %v6952_v44 = vpop.f32.mrf.mxu0  ;;  %5255 = vmatprep.mubr.msk.bf16.mxu1 %vm2087_vm4, %v6759_v55 }
 0x174   :  { %v6956_v38 = vpop.f32.mrf.mxu0  ;;  %5328 = vmatmul.mubr.msk.bf16.gmra.mxu0 %vm2087_vm4, %v6770_v59 }
 0x175   :  { %5331 = vmatprep.mubr.msk.bf16.mxu0 %vm2087_vm4, %v6773_v63 }
 0x176   :  { %v6962_v23 = vpop.f32.mrf.mxu0 }
 0x178   :  { %v6966_v49 = vpop.f32.mrf.mxu0 }
 0x179   :  { %5256 = vmatmul.mubr.msk.bf16.gmra.mxu1 %vm2087_vm4, %v6770_v59 }
 0x17a   :  { %v6971_v53 = vpop.f32.mrf.mxu0 }
 0x17c   :  { %v6973_v1 = vpop.f32.mrf.mxu0  ;;  %5332 = vmatmul.mubr.msk.bf16.gmra.mxu0 %vm2087_vm4, %v2025_v0 }
 0x17e   :  { %v6976_v18 = vpop.f32.mrf.mxu0 }
 0x180   :  { %v6978_v56 = vpop.f32.mrf.mxu0 }
 0x182   :  { %v6980_v54 = vpop.f32.mrf.mxu0 }
 0x184   :  { %v6982_v52 = vpop.f32.mrf.mxu0 }
 0x186   :  { %v6984_v3 = vpop.f32.mrf.mxu0 }
 0x188   :  { %v6986_v32 = vpop.f32.mrf.mxu0 }
 0x18a   :  { %v6988_v40 = vpop.f32.mrf.mxu0 }
 0x18c   :  { %v6990_v13 = vpop.f32.mrf.mxu0 }
 0x18e   :  { %v6992_v43 = vpop.f32.mrf.mxu0 }
 0x190   :  { %v6994_v51 = vpop.f32.mrf.mxu0 }
 0x192   :  { %v6996_v55 = vpop.f32.mrf.mxu0 }
 0x194   :  { %v6998_v33 = vpop.f32.mrf.mxu0 }
 0x196   :  { %v7000_v16 = vpop.f32.mrf.mxu0 }
 0x198   :  { %v7002_v15 = vpop.f32.mrf.mxu0 }
 0x19a   :  { %v7004_v31 = vpop.f32.mrf.mxu0 }
 0x19c   :  { %v7006_v37 = vpop.f32.mrf.mxu0 }
 0x19d   :  { %8406 = vst [vmem:[#allocation2_spill] sm:$0xff] %v7006_v37 }
 0x19e   :  { %v7008_v59 = vpop.f32.mrf.mxu0 }
 0x19f   :  { %8407 = vst [vmem:[#allocation3_spill] sm:$0xff] %v7008_v59 }
 0x1a0   :  { %v7010_v63 = vpop.f32.mrf.mxu0 }
 0x1a1   :  { %8408 = vst [vmem:[#allocation4_spill] sm:$0xff] %v7010_v63 }
 0x1a2   :  { %v7012_v6 = vpop.f32.mrf.mxu0 }
 0x1a3   :  { %8409 = vst [vmem:[#allocation5_spill] sm:$0xff] %v7012_v6 }
 0x1a4   :  { %v7014_v19 = vpop.f32.mrf.mxu0 }
 0x1a5   :  { %8410 = vst [vmem:[#allocation6_spill] sm:$0xff] %v7014_v19 }
 0x1a6   :  { %v7016_v39 = vpop.f32.mrf.mxu0 }
 0x1a7   :  { %8411 = vst [vmem:[#allocation7_spill] sm:$0xff] %v7016_v39 }
 0x1a8   :  { %v7018_v5 = vpop.f32.mrf.mxu0 }
 0x1a9   :  { %8412 = vst [vmem:[#allocation8_spill] sm:$0xff] %v7018_v5 }
 0x1aa   :  { %v7020_v25 = vpop.f32.mrf.mxu0 }
 0x1ab   :  { %8413 = vst [vmem:[#allocation9_spill] sm:$0xff] %v7020_v25 }
 0x1ac   :  { %v7022_v58 = vpop.f32.mrf.mxu0 }
 0x1ad   :  { %8414 = vst [vmem:[#allocation10_spill] sm:$0xff] %v7022_v58 }
 0x1ae   :  { %v7024_v8 = vpop.f32.mrf.mxu0 }
 0x1af   :  { %8415 = vst [vmem:[#allocation11_spill] sm:$0xff] %v7024_v8 }
 0x1b0   :  { %v7026_v26 = vpop.f32.mrf.mxu0 }
 0x1b1   :  { %8416 = vst [vmem:[#allocation12_spill] sm:$0xff] %v7026_v26 }
 0x1b2   :  { %v7028_v41 = vpop.f32.mrf.mxu0 }
 0x1b3   :  { %8417 = vst [vmem:[#allocation13_spill] sm:$0xff] %v7028_v41 }
 0x1b4   :  { %v7030_v10 = vpop.f32.mrf.mxu0 }
 0x1b5   :  { %8418 = vst [vmem:[#allocation14_spill] sm:$0xff] %v7030_v10 }
 0x1b6   :  { %v7032_v22 = vpop.f32.mrf.mxu0 }
 0x1b7   :  { %8419 = vst [vmem:[#allocation15_spill] sm:$0xff] %v7032_v22 }
 0x1b8   :  { %v7034_v34 = vpop.f32.mrf.mxu0 }
 0x1b9   :  { %8420 = vst [vmem:[#allocation16_spill] sm:$0xff] %v7034_v34 }
 0x1ba   :  { %v7036_v42 = vpop.f32.mrf.mxu0 }
 0x1bb   :  { %8421 = vst [vmem:[#allocation17_spill] sm:$0xff] %v7036_v42 }
 0x1bc   :  { %v7038_v29 = vpop.f32.mrf.mxu0 }
 0x1bd   :  { %8422 = vst [vmem:[#allocation18_spill] sm:$0xff] %v7038_v29 }
 0x1be   :  { %v7040_v48 = vpop.f32.mrf.mxu0 }
 0x1bf   :  { %8423 = vst [vmem:[#allocation19_spill] sm:$0xff] %v7040_v48 }
 0x1c0   :  { %v7042_v2 = vpop.f32.mrf.mxu0 }
 0x1c1   :  { %8424 = vst [vmem:[#allocation20_spill] sm:$0xff] %v7042_v2  ;;  %v5197_v0 = vpop.f32.mrf.mxu1 }
 0x1c2   :  { %v7044_v8 = vpop.f32.mrf.mxu0  ;;  %v2524_v41 = vadd.f32 %v5197_v0, %v6860_v35 }
 0x1c3   :  { %8425 = vst [vmem:[#allocation21_spill] sm:$0xff] %v7044_v8  ;;  %v2515_v26 = vpop.f32.mrf.mxu1  ;;  %v7053_v8 = vld [vmem:[%s8355_s2] ss:$0 sm:$0xff] }
 0x1c4   :  { %v2516_v10 = vadd.f32 %v2515_v26, %v6866_v57  ;;  %v5273_v58 = vpop.f32.mrf.mxu0 }
 0x1c5   :  { %v5198_v22 = vpop.f32.mrf.mxu1  ;;  %v3114_v29 = vadd.f32 %v5273_v58, %v2524_v41 }
 0x1c6   :  { %v2527_v34 = vadd.f32 %v5198_v22, %v6868_v50  ;;  %v2857_v25 = vpop.f32.mrf.mxu0 }
 0x1c7   :  { %v3112_v42 = vadd.f32 %v2857_v25, %v2516_v10  ;;  %v2518_v5 = vpop.f32.mrf.mxu1  ;;  %v3185_v25 = vadd.f32 %v7053_v8, %v3114_v29 }
 0x1c8   :  { %v2519_v48 = vadd.f32 %v2518_v5, %v6872_v27  ;;  %v5274_v39 = vpop.f32.mrf.mxu0 }
 0x1c9   :  { %v3115_v2 = vadd.f32 %v5274_v39, %v2527_v34  ;;  %v5201_v35 = vpop.f32.mrf.mxu1  ;;  %v3183_v57 = vadd.f32 %v7053_v8, %v3112_v42 }
 0x1ca   :  { %v2860_v0 = vpop.f32.mrf.mxu0  ;;  %v2540_v58 = vadd.f32 %v5201_v35, %v6876_v45 }
 0x1cb   :  { %v3186_v26 = vadd.f32 %v7053_v8, %v3115_v2  ;;  %v3113_v50 = vadd.f32 %v2860_v0, %v2519_v48  ;;  %v2531_v22 = vpop.f32.mrf.mxu1  ;;  %v3247_v6 = vmax.f32 %v3183_v57, 0.0  ;;  %v3249_v48 = vmax.f32 %v3185_v25, 0.0 }
 0x1cc   :  { %v2532_v27 = vadd.f32 %v2531_v22, %v6882_v14  ;;  %v5277_v5 = vpop.f32.mrf.mxu0 }
 0x1cd   :  { %v3184_v41 = vadd.f32 %v7053_v8, %v3113_v50  ;;  %v5202_v10 = vpop.f32.mrf.mxu1  ;;  %v3250_v19 = vmax.f32 %v3186_v26, 0.0  ;;  %v3118_v0 = vadd.f32 %v5277_v5, %v2540_v58 }
 0x1ce   :  { %v2543_v39 = vadd.f32 %v5202_v10, %v6884_v17  ;;  %v2873_v34 = vpop.f32.mrf.mxu0 }
 0x1cf   :  { %v3248_v42 = vmax.f32 %v3184_v41, 0.0  ;;  %v3116_v63 = vadd.f32 %v2873_v34, %v2532_v27  ;;  %v2534_v2 = vpop.f32.mrf.mxu1  ;;  %v3312_v22 = vpack.c.bf16 %v3250_v19, %v3249_v48  ;;  %v3189_v57 = vadd.f32 %v7053_v8, %v3118_v0 }
 0x1d0   :  { %v2535_v29 = vadd.f32 %v2534_v2, %v6888_v21  ;;  %v5278_v59 = vpop.f32.mrf.mxu0 }
 0x1d1   :  { %v3311_v45 = vpack.c.bf16 %v3248_v42, %v3247_v6  ;;  %v3119_v35 = vadd.f32 %v5278_v59, %v2543_v39  ;;  %v5205_v14 = vpop.f32.mrf.mxu1  ;;  %v3187_v50 = vadd.f32 %v7053_v8, %v3116_v63  ;;  %v3253_v34 = vmax.f32 %v3189_v57, 0.0 }
 0x1d2   :  { %v2876_v37 = vpop.f32.mrf.mxu0  ;;  %v2556_v25 = vadd.f32 %v5205_v14, %v6892_v9 }
 0x1d3   :  { %v3190_v26 = vadd.f32 %v7053_v8, %v3119_v35  ;;  %v3117_v17 = vadd.f32 %v2876_v37, %v2535_v29  ;;  %v2547_v10 = vpop.f32.mrf.mxu1  ;;  %5339 = vmatprep.mubr.msk.bf16.mxu1 %vm1880_vm2, %v3311_v45  ;;  %v3251_v37 = vmax.f32 %v3187_v50, 0.0 }
 0x1d4   :  { %v2548_v21 = vadd.f32 %v2547_v10, %v6898_v11  ;;  %v5281_v58 = vpop.f32.mrf.mxu0  ;;  %5340 = vmatmul.mubr.msk.bf16.vlgmr.msra.gmra.mxu1 %vm1880_vm2, %v3312_v22 }
 0x1d5   :  { %v3188_v59 = vadd.f32 %v7053_v8, %v3117_v17  ;;  %v5206_v6 = vpop.f32.mrf.mxu1  ;;  %v3254_v19 = vmax.f32 %v3190_v26, 0.0  ;;  %v3122_v42 = vadd.f32 %v5281_v58, %v2556_v25 }
 0x1d6   :  { %v2559_v63 = vadd.f32 %v5206_v6, %v6900_v28  ;;  %v2889_v27 = vpop.f32.mrf.mxu0 }
 0x1d7   :  { %v3252_v5 = vmax.f32 %v3188_v59, 0.0  ;;  %v3120_v41 = vadd.f32 %v2889_v27, %v2548_v21  ;;  %v2550_v39 = vpop.f32.mrf.mxu1  ;;  %v3314_v29 = vpack.c.bf16 %v3254_v19, %v3253_v34  ;;  %v3193_v50 = vadd.f32 %v7053_v8, %v3122_v42 }
 0x1d8   :  { %v2551_v9 = vadd.f32 %v2550_v39, %v6904_v46  ;;  %v5282_v2 = vpop.f32.mrf.mxu0 }
 0x1d9   :  { %v3313_v11 = vpack.c.bf16 %v3252_v5, %v3251_v37  ;;  %v3123_v48 = vadd.f32 %v5282_v2, %v2559_v63  ;;  %v5209_v0 = vpop.f32.mrf.mxu1  ;;  %v3191_v35 = vadd.f32 %v7053_v8, %v3120_v41  ;;  %v3257_v27 = vmax.f32 %v3193_v50, 0.0 }
 0x1da   :  { %v2892_v45 = vpop.f32.mrf.mxu0  ;;  %v2572_v26 = vadd.f32 %v5209_v0, %v6908_v61 }
 0x1db   :  { %v3194_v14 = vadd.f32 %v7053_v8, %v3123_v48  ;;  %v3121_v28 = vadd.f32 %v2892_v45, %v2551_v9  ;;  %v2563_v22 = vpop.f32.mrf.mxu1  ;;  %5343 = vmatprep.mubr.msk.bf16.mxu1 %vm1880_vm2, %v3313_v11  ;;  %v3255_v59 = vmax.f32 %v3191_v35, 0.0 }
 0x1dc   :  { %v2564_v46 = vadd.f32 %v2563_v22, %v6914_v12  ;;  %v5285_v17 = vpop.f32.mrf.mxu0  ;;  %5344 = vmatmul.mubr.msk.bf16.gmra.mxu1 %vm1880_vm2, %v3314_v29 }
 0x1dd   :  { %v3192_v10 = vadd.f32 %v7053_v8, %v3121_v28  ;;  %v5210_v57 = vpop.f32.mrf.mxu1  ;;  %v3258_v25 = vmax.f32 %v3194_v14, 0.0  ;;  %v3126_v37 = vadd.f32 %v5285_v17, %v2572_v26 }
 0x1de   :  { %v2575_v21 = vadd.f32 %v5210_v57, %v6916_v20  ;;  %v2905_v58 = vpop.f32.mrf.mxu0 }
 0x1df   :  { %v3256_v6 = vmax.f32 %v3192_v10, 0.0  ;;  %v3124_v19 = vadd.f32 %v2905_v58, %v2564_v46  ;;  %v2566_v63 = vpop.f32.mrf.mxu1  ;;  %v3316_v34 = vpack.c.bf16 %v3258_v25, %v3257_v27  ;;  %v3197_v48 = vadd.f32 %v7053_v8, %v3126_v37 }
 0x1e0   :  { %v2567_v61 = vadd.f32 %v2566_v63, %v6920_v36  ;;  %v5286_v5 = vpop.f32.mrf.mxu0 }
 0x1e1   :  { %v3315_v12 = vpack.c.bf16 %v3256_v6, %v3255_v59  ;;  %v3127_v41 = vadd.f32 %v5286_v5, %v2575_v21  ;;  %v5213_v39 = vpop.f32.mrf.mxu1  ;;  %v3195_v9 = vadd.f32 %v7053_v8, %v3124_v19  ;;  %v3261_v10 = vmax.f32 %v3197_v48, 0.0 }
 0x1e2   :  { %v2908_v42 = vpop.f32.mrf.mxu0  ;;  %v2588_v0 = vadd.f32 %v5213_v39, %v6924_v47 }
 0x1e3   :  { %v3198_v2 = vadd.f32 %v7053_v8, %v3127_v41  ;;  %v3125_v20 = vadd.f32 %v2908_v42, %v2567_v61  ;;  %v2579_v11 = vpop.f32.mrf.mxu1  ;;  %5347 = vmatprep.mubr.msk.bf16.mxu1 %vm1880_vm2, %v3315_v12  ;;  %v3259_v50 = vmax.f32 %v3195_v9, 0.0 }
 0x1e4   :  { %v2580_v36 = vadd.f32 %v2579_v11, %v6930_v62  ;;  %v5289_v29 = vpop.f32.mrf.mxu0  ;;  %5348 = vmatmul.mubr.msk.bf16.gmra.mxu1 %vm1880_vm2, %v3316_v34 }
 0x1e5   :  { %v3196_v45 = vadd.f32 %v7053_v8, %v3125_v20  ;;  %v5214_v35 = vpop.f32.mrf.mxu1  ;;  %v3262_v14 = vmax.f32 %v3198_v2, 0.0  ;;  %v3130_v57 = vadd.f32 %v5289_v29, %v2588_v0 }
 0x1e6   :  { %v2591_v28 = vadd.f32 %v5214_v35, %v6932_v7  ;;  %v2921_v22 = vpop.f32.mrf.mxu0 }
 0x1e7   :  { %v3260_v26 = vmax.f32 %v3196_v45, 0.0  ;;  %v3128_v46 = vadd.f32 %v2921_v22, %v2580_v36  ;;  %v2582_v17 = vpop.f32.mrf.mxu1  ;;  %v3318_v59 = vpack.c.bf16 %v3262_v14, %v3261_v10  ;;  %v3201_v37 = vadd.f32 %v7053_v8, %v3130_v57 }
 0x1e8   :  { %v2583_v47 = vadd.f32 %v2582_v17, %v6936_v30  ;;  %v5290_v25 = vpop.f32.mrf.mxu0 }
 0x1e9   :  { %v3317_v62 = vpack.c.bf16 %v3260_v26, %v3259_v50  ;;  %v3131_v21 = vadd.f32 %v5290_v25, %v2591_v28  ;;  %v5217_v58 = vpop.f32.mrf.mxu1  ;;  %v3199_v19 = vadd.f32 %v7053_v8, %v3128_v46  ;;  %v3265_v48 = vmax.f32 %v3201_v37, 0.0 }
 0x1ea   :  { %v2924_v6 = vpop.f32.mrf.mxu0  ;;  %v2604_v61 = vadd.f32 %v5217_v58, %v6940_v24 }
 0x1eb   :  { %v3202_v63 = vadd.f32 %v7053_v8, %v3131_v21  ;;  %v3129_v7 = vadd.f32 %v2924_v6, %v2583_v47  ;;  %v2595_v27 = vpop.f32.mrf.mxu1  ;;  %5351 = vmatprep.mubr.msk.bf16.mxu1 %vm1880_vm2, %v3317_v62  ;;  %v3263_v9 = vmax.f32 %v3199_v19, 0.0 }
 0x1ec   :  { %v2596_v30 = vadd.f32 %v2595_v27, %v6946_v4  ;;  %v5293_v5 = vpop.f32.mrf.mxu0  ;;  %5352 = vmatmul.mubr.msk.bf16.gmra.mxu1 %vm1880_vm2, %v3318_v59 }
 0x1ed   :  { %v3200_v12 = vadd.f32 %v7053_v8, %v3129_v7  ;;  %v5218_v41 = vpop.f32.mrf.mxu1  ;;  %v3266_v39 = vmax.f32 %v3202_v63, 0.0  ;;  %v3134_v0 = vadd.f32 %v5293_v5, %v2604_v61 }
 0x1ee   :  { %v2607_v34 = vadd.f32 %v5218_v41, %v6948_v60  ;;  %v2937_v42 = vpop.f32.mrf.mxu0 }
 0x1ef   :  { %v3264_v2 = vmax.f32 %v3200_v12, 0.0  ;;  %v3132_v20 = vadd.f32 %v2937_v42, %v2596_v30  ;;  %v2598_v11 = vpop.f32.mrf.mxu1  ;;  %v3320_v35 = vpack.c.bf16 %v3266_v39, %v3265_v48  ;;  %v3205_v26 = vadd.f32 %v7053_v8, %v3134_v0 }
 0x1f0   :  { %v2599_v24 = vadd.f32 %v2598_v11, %v6952_v44  ;;  %v5294_v36 = vpop.f32.mrf.mxu0 }
 0x1f1   :  { %v3319_v4 = vpack.c.bf16 %v3264_v2, %v3263_v9  ;;  %v3135_v29 = vadd.f32 %v5294_v36, %v2607_v34  ;;  %v5221_v45 = vpop.f32.mrf.mxu1  ;;  %v3203_v28 = vadd.f32 %v7053_v8, %v3132_v20  ;;  %v3269_v19 = vmax.f32 %v3205_v26, 0.0 }
 0x1f2   :  { %v2940_v14 = vpop.f32.mrf.mxu0  ;;  %v2620_v46 = vadd.f32 %v5221_v45, %v6956_v38 }
 0x1f3   :  { %v3206_v22 = vadd.f32 %v7053_v8, %v3135_v29  ;;  %v3133_v60 = vadd.f32 %v2940_v14, %v2599_v24  ;;  %v2611_v50 = vpop.f32.mrf.mxu1  ;;  %5355 = vmatprep.mubr.msk.bf16.mxu1 %vm1880_vm2, %v3319_v4  ;;  %v3267_v21 = vmax.f32 %v3203_v28, 0.0 }
 0x1f4   :  { %v2612_v44 = vadd.f32 %v2611_v50, %v6962_v23  ;;  %v5297_v17 = vpop.f32.mrf.mxu0  ;;  %5356 = vmatmul.mubr.msk.bf16.gmra.mxu1 %vm1880_vm2, %v3320_v35 }
 0x1f5   :  { %v3204_v10 = vadd.f32 %v7053_v8, %v3133_v60  ;;  %v5222_v57 = vpop.f32.mrf.mxu1  ;;  %v3270_v47 = vmax.f32 %v3206_v22, 0.0  ;;  %v3138_v63 = vadd.f32 %v5297_v17, %v2620_v46 }
 0x1f6   :  { %v2623_v25 = vadd.f32 %v5222_v57, %v6966_v49  ;;  %v2953_v62 = vpop.f32.mrf.mxu0 }
 0x1f7   :  { %v3268_v58 = vmax.f32 %v3204_v10, 0.0  ;;  %v3136_v59 = vadd.f32 %v2953_v62, %v2612_v44  ;;  %v2614_v6 = vpop.f32.mrf.mxu1  ;;  %v3322_v61 = vpack.c.bf16 %v3270_v47, %v3269_v19  ;;  %v3209_v39 = vadd.f32 %v7053_v8, %v3138_v63 }
 0x1f8   :  { %v2615_v38 = vadd.f32 %v2614_v6, %v6971_v53  ;;  %v5298_v7 = vpop.f32.mrf.mxu0 }
 0x1f9   :  { %v3321_v23 = vpack.c.bf16 %v3268_v58, %v3267_v21  ;;  %v3139_v27 = vadd.f32 %v5298_v7, %v2623_v25  ;;  %v5225_v37 = vpop.f32.mrf.mxu1  ;;  %v3207_v5 = vadd.f32 %v7053_v8, %v3136_v59  ;;  %v3273_v29 = vmax.f32 %v3209_v39, 0.0 }
 0x1fa   :  { %v2956_v30 = vpop.f32.mrf.mxu0  ;;  %v2636_v34 = vadd.f32 %v5225_v37, %v6973_v1 }
 0x1fb   :  { %v3210_v12 = vadd.f32 %v7053_v8, %v3139_v27  ;;  %v3137_v49 = vadd.f32 %v2956_v30, %v2615_v38  ;;  %v2627_v41 = vpop.f32.mrf.mxu1  ;;  %5359 = vmatprep.mubr.msk.bf16.mxu1 %vm1880_vm2, %v3321_v23  ;;  %v3271_v0 = vmax.f32 %v3207_v5, 0.0 }
 0x1fc   :  { %v2628_v53 = vadd.f32 %v2627_v41, %v6976_v18  ;;  %v5301_v42 = vpop.f32.mrf.mxu0  ;;  %5360 = vmatmul.mubr.msk.bf16.gmra.mxu1 %vm1880_vm2, %v3322_v61 }
 0x1fd   :  { %v3208_v9 = vadd.f32 %v7053_v8, %v3137_v49  ;;  %v5226_v2 = vpop.f32.mrf.mxu1  ;;  %v3274_v20 = vmax.f32 %v3210_v12, 0.0  ;;  %v3142_v45 = vadd.f32 %v5301_v42, %v2636_v34 }
 0x1fe   :  { %v2639_v11 = vadd.f32 %v5226_v2, %v6978_v56  ;;  %v2969_v48 = vpop.f32.mrf.mxu0 }
 0x1ff   :  { %v3272_v24 = vmax.f32 %v3208_v9, 0.0  ;;  %v3140_v36 = vadd.f32 %v2969_v48, %v2628_v53  ;;  %v2630_v4 = vpop.f32.mrf.mxu1  ;;  %v3324_v22 = vpack.c.bf16 %v3274_v20, %v3273_v29  ;;  %v3213_v44 = vadd.f32 %v7053_v8, %v3142_v45 }
 0x200   :  { %v2631_v1 = vadd.f32 %v2630_v4, %v6980_v54  ;;  %v5302_v35 = vpop.f32.mrf.mxu0 }
 0x201   :  { %v3323_v18 = vpack.c.bf16 %v3272_v24, %v3271_v0  ;;  %v3143_v14 = vadd.f32 %v5302_v35, %v2639_v11  ;;  %v5229_v28 = vpop.f32.mrf.mxu1  ;;  %v3211_v50 = vadd.f32 %v7053_v8, %v3140_v36  ;;  %v3277_v63 = vmax.f32 %v3213_v44, 0.0 }
 0x202   :  { %v2972_v60 = vpop.f32.mrf.mxu0  ;;  %v2652_v17 = vadd.f32 %v5229_v28, %v6982_v52 }
 0x203   :  { %v3214_v26 = vadd.f32 %v7053_v8, %v3143_v14  ;;  %v3141_v56 = vadd.f32 %v2972_v60, %v2631_v1  ;;  %v2643_v46 = vpop.f32.mrf.mxu1  ;;  %5363 = vmatprep.mubr.msk.bf16.mxu1 %vm1880_vm2, %v3323_v18  ;;  %v3275_v58 = vmax.f32 %v3211_v50, 0.0 }
 0x204   :  { %v2644_v54 = vadd.f32 %v2643_v46, %v6984_v3  ;;  %v5305_v10 = vpop.f32.mrf.mxu0  ;;  %5364 = vmatmul.mubr.msk.bf16.gmra.mxu1 %vm1880_vm2, %v3324_v22 }
 0x205   :  { %v3212_v57 = vadd.f32 %v7053_v8, %v3141_v56  ;;  %v5230_v47 = vpop.f32.mrf.mxu1  ;;  %v3278_v25 = vmax.f32 %v3214_v26, 0.0  ;;  %v3146_v38 = vadd.f32 %v5305_v10, %v2652_v17 }
 0x206   :  { %v2655_v62 = vadd.f32 %v5230_v47, %v6986_v32  ;;  %v2985_v21 = vpop.f32.mrf.mxu0 }
 0x207   :  { %v3276_v59 = vmax.f32 %v3212_v57, 0.0  ;;  %v3144_v6 = vadd.f32 %v2985_v21, %v2644_v54  ;;  %v2646_v19 = vpop.f32.mrf.mxu1  ;;  %v3326_v37 = vpack.c.bf16 %v3278_v25, %v3277_v63  ;;  %v3217_v49 = vadd.f32 %v7053_v8, %v3146_v38 }
 0x208   :  { %v2647_v52 = vadd.f32 %v2646_v19, %v6988_v40  ;;  %v5306_v7 = vpop.f32.mrf.mxu0 }
 0x209   :  { %v3325_v3 = vpack.c.bf16 %v3276_v59, %v3275_v58  ;;  %v3147_v23 = vadd.f32 %v5306_v7, %v2655_v62  ;;  %v5233_v27 = vpop.f32.mrf.mxu1  ;;  %v3215_v30 = vadd.f32 %v7053_v8, %v3144_v6  ;;  %v3281_v24 = vmax.f32 %v3217_v49, 0.0 }
 0x20a   :  { %v2988_v61 = vpop.f32.mrf.mxu0  ;;  %v2668_v41 = vadd.f32 %v5233_v27, %v6990_v13  ;;  %v8427_v27 = vld [vmem:[#allocation3_spill] sm:$0xff] }
 0x20b   :  { %v3218_v5 = vadd.f32 %v7053_v8, %v3147_v23  ;;  %v3145_v32 = vadd.f32 %v2988_v61, %v2647_v52  ;;  %v2659_v12 = vpop.f32.mrf.mxu1  ;;  %5367 = vmatprep.mubr.msk.bf16.mxu1 %vm1880_vm2, %v3325_v3  ;;  %v3279_v20 = vmax.f32 %v3215_v30, 0.0  ;;  %v8426_v3 = vld [vmem:[#allocation2_spill] sm:$0xff] }
 0x20c   :  { %v2660_v40 = vadd.f32 %v2659_v12, %v6992_v43  ;;  %v5309_v39 = vpop.f32.mrf.mxu0  ;;  %5368 = vmatmul.mubr.msk.bf16.gmra.mxu1 %vm1880_vm2, %v3326_v37 }
 0x20d   :  { %v3216_v34 = vadd.f32 %v7053_v8, %v3145_v32  ;;  %v5234_v53 = vpop.f32.mrf.mxu1  ;;  %v3282_v42 = vmax.f32 %v3218_v5, 0.0  ;;  %v3150_v36 = vadd.f32 %v5309_v39, %v2668_v41  ;;  %v8428_v32 = vld [vmem:[#allocation4_spill] sm:$0xff] }
 0x20e   :  { %v2671_v9 = vadd.f32 %v5234_v53, %v6994_v51  ;;  %v3001_v2 = vpop.f32.mrf.mxu0 }
 0x20f   :  { %v3280_v11 = vmax.f32 %v3216_v34, 0.0  ;;  %v3148_v48 = vadd.f32 %v3001_v2, %v2660_v40  ;;  %v2662_v0 = vpop.f32.mrf.mxu1  ;;  %v3328_v1 = vpack.c.bf16 %v3282_v42, %v3281_v24  ;;  %v3221_v22 = vadd.f32 %v7053_v8, %v3150_v36 }
 0x210   :  { %v2663_v13 = vadd.f32 %v2662_v0, %v6996_v55  ;;  %v5310_v4 = vpop.f32.mrf.mxu0 }
 0x211   :  { %v3327_v43 = vpack.c.bf16 %v3280_v11, %v3279_v20  ;;  %v3151_v29 = vadd.f32 %v5310_v4, %v2671_v9  ;;  %v5237_v45 = vpop.f32.mrf.mxu1  ;;  %v3219_v18 = vadd.f32 %v7053_v8, %v3148_v48  ;;  %v3285_v25 = vmax.f32 %v3221_v22, 0.0  ;;  %v8429_v9 = vld [vmem:[#allocation5_spill] sm:$0xff] }
 0x212   :  { %v3004_v35 = vpop.f32.mrf.mxu0  ;;  %v2684_v60 = vadd.f32 %v5237_v45, %v6998_v33 }
 0x213   :  { %v3222_v14 = vadd.f32 %v7053_v8, %v3151_v29  ;;  %v3149_v51 = vadd.f32 %v3004_v35, %v2663_v13  ;;  %v2675_v28 = vpop.f32.mrf.mxu1  ;;  %5371 = vmatprep.mubr.msk.bf16.mxu1 %vm1880_vm2, %v3327_v43  ;;  %v3283_v54 = vmax.f32 %v3219_v18, 0.0  ;;  %v8431_v18 = vld [vmem:[#allocation7_spill] sm:$0xff] }
 0x214   :  { %v2676_v55 = vadd.f32 %v2675_v28, %v7000_v16  ;;  %v5313_v50 = vpop.f32.mrf.mxu0  ;;  %5372 = vmatmul.mubr.msk.bf16.gmra.mxu1 %vm1880_vm2, %v3328_v1  ;;  %v8430_v1 = vld [vmem:[#allocation6_spill] sm:$0xff] }
 0x215   :  { %v3220_v26 = vadd.f32 %v7053_v8, %v3149_v51  ;;  %v5238_v56 = vpop.f32.mrf.mxu1  ;;  %v3286_v46 = vmax.f32 %v3222_v14, 0.0  ;;  %v3154_v62 = vadd.f32 %v5313_v50, %v2684_v60 }
 0x216   :  { %v2687_v44 = vadd.f32 %v5238_v56, %v7002_v15  ;;  %v3017_v17 = vpop.f32.mrf.mxu0 }
 0x217   :  { %v3284_v10 = vmax.f32 %v3220_v26, 0.0  ;;  %v3152_v57 = vadd.f32 %v3017_v17, %v2676_v55  ;;  %v2678_v47 = vpop.f32.mrf.mxu1  ;;  %v3330_v6 = vpack.c.bf16 %v3286_v46, %v3285_v25  ;;  %v3225_v7 = vadd.f32 %v7053_v8, %v3154_v62  ;;  %v8432_v55 = vld [vmem:[#allocation8_spill] sm:$0xff] }
 0x218   :  { %v2679_v33 = vadd.f32 %v2678_v47, %v7004_v31  ;;  %v5314_v21 = vpop.f32.mrf.mxu0 }
 0x219   :  { %v3329_v16 = vpack.c.bf16 %v3284_v10, %v3283_v54  ;;  %v3155_v58 = vadd.f32 %v5314_v21, %v2687_v44  ;;  %v5241_v59 = vpop.f32.mrf.mxu1  ;;  %v3223_v63 = vadd.f32 %v7053_v8, %v3152_v57  ;;  %v3289_v53 = vmax.f32 %v3225_v7, 0.0  ;;  %v8433_v57 = vld [vmem:[#allocation9_spill] sm:$0xff]  ;;  %v8435_v7 = vld [vmem:[#allocation11_spill] sm:$0xff] }
 0x21a   :  { %v3020_v19 = vpop.f32.mrf.mxu0  ;;  %v2700_v23 = vadd.f32 %v5241_v59, %v8426_v3 }
 0x21b   :  { %v3226_v38 = vadd.f32 %v7053_v8, %v3155_v58  ;;  %v3153_v15 = vadd.f32 %v3020_v19, %v2679_v33  ;;  %v2691_v52 = vpop.f32.mrf.mxu1  ;;  %5375 = vmatprep.mubr.msk.bf16.mxu1 %vm1880_vm2, %v3329_v16  ;;  %v3287_v41 = vmax.f32 %v3223_v63, 0.0 }
 0x21c   :  { %v2692_v31 = vadd.f32 %v2691_v52, %v8427_v27  ;;  %v5317_v37 = vpop.f32.mrf.mxu0  ;;  %5376 = vmatmul.mubr.msk.bf16.gmra.mxu1 %vm1880_vm2, %v3330_v6 }
 0x21d   :  { %v3224_v61 = vadd.f32 %v7053_v8, %v3153_v15  ;;  %v5242_v30 = vpop.f32.mrf.mxu1  ;;  %v3290_v5 = vmax.f32 %v3226_v38, 0.0  ;;  %v3158_v42 = vadd.f32 %v5317_v37, %v2700_v23  ;;  %v8434_v15 = vld [vmem:[#allocation10_spill] sm:$0xff] }
 0x21e   :  { %v2703_v12 = vadd.f32 %v5242_v30, %v8428_v32  ;;  %v3033_v49 = vpop.f32.mrf.mxu0 }
 0x21f   :  { %v3288_v40 = vmax.f32 %v3224_v61, 0.0  ;;  %v3156_v39 = vadd.f32 %v3033_v49, %v2692_v31  ;;  %v2694_v34 = vpop.f32.mrf.mxu1  ;;  %v3332_v24 = vpack.c.bf16 %v3290_v5, %v3289_v53  ;;  %v3229_v45 = vadd.f32 %v7053_v8, %v3158_v42  ;;  %v8436_v61 = vld [vmem:[#allocation12_spill] sm:$0xff] }
 0x220   :  { %v2695_v2 = vadd.f32 %v2694_v34, %v8429_v9  ;;  %v5318_v20 = vpop.f32.mrf.mxu0  ;;  %v8437_v34 = vld [vmem:[#allocation13_spill] sm:$0xff] }
 0x221   :  { %v3331_v11 = vpack.c.bf16 %v3288_v40, %v3287_v41  ;;  %v3159_v48 = vadd.f32 %v5318_v20, %v2703_v12  ;;  %v5245_v0 = vpop.f32.mrf.mxu1  ;;  %v3227_v13 = vadd.f32 %v7053_v8, %v3156_v39  ;;  %v3293_v54 = vmax.f32 %v3229_v45, 0.0  ;;  %v8439_v45 = vld [vmem:[#allocation15_spill] sm:$0xff] }
 0x222   :  { %v3036_v36 = vpop.f32.mrf.mxu0  ;;  %v2716_v35 = vadd.f32 %v5245_v0, %v8430_v1 }
 0x223   :  { %v3230_v4 = vadd.f32 %v7053_v8, %v3159_v48  ;;  %v3157_v43 = vadd.f32 %v3036_v36, %v2695_v2  ;;  %v2707_v29 = vpop.f32.mrf.mxu1  ;;  %5379 = vmatprep.mubr.msk.bf16.mxu1 %vm1880_vm2, %v3331_v11  ;;  %v3291_v56 = vmax.f32 %v3227_v13, 0.0 }
 0x224   :  { %v2708_v14 = vadd.f32 %v2707_v29, %v8431_v18  ;;  %v5321_v51 = vpop.f32.mrf.mxu0  ;;  %5380 = vmatmul.mubr.msk.bf16.gmra.mxu1 %vm1880_vm2, %v3332_v24 }
 0x225   :  { %v3228_v28 = vadd.f32 %v7053_v8, %v3157_v43  ;;  %v5246_v22 = vpop.f32.mrf.mxu1  ;;  %v3294_v60 = vmax.f32 %v3230_v4, 0.0  ;;  %v3162_v10 = vadd.f32 %v5321_v51, %v2716_v35  ;;  %v8438_v43 = vld [vmem:[#allocation14_spill] sm:$0xff] }
 0x226   :  { %v2719_v50 = vadd.f32 %v5246_v22, %v8432_v55  ;;  %v3049_v26 = vpop.f32.mrf.mxu0 }
 0x227   :  { %v3292_v46 = vmax.f32 %v3228_v28, 0.0  ;;  %v3160_v44 = vadd.f32 %v3049_v26, %v2708_v14  ;;  %v2710_v17 = vpop.f32.mrf.mxu1  ;;  %v3334_v16 = vpack.c.bf16 %v3294_v60, %v3293_v54  ;;  %v3233_v38 = vadd.f32 %v7053_v8, %v3162_v10  ;;  %v8440_v28 = vld [vmem:[#allocation16_spill] sm:$0xff] }
 0x228   :  { %v2711_v47 = vadd.f32 %v2710_v17, %v8433_v57  ;;  %v5322_v25 = vpop.f32.mrf.mxu0  ;;  %v8441_v17 = vld [vmem:[#allocation17_spill] sm:$0xff] }
 0x229   :  { %v3333_v62 = vpack.c.bf16 %v3292_v46, %v3291_v56  ;;  %v3163_v33 = vadd.f32 %v5322_v25, %v2719_v50  ;;  %v5249_v21 = vpop.f32.mrf.mxu1  ;;  %v3231_v59 = vadd.f32 %v7053_v8, %v3160_v44  ;;  %v3297_v40 = vmax.f32 %v3233_v38, 0.0  ;;  %v8443_v38 = vld [vmem:[#allocation19_spill] sm:$0xff] }
 0x22a   :  { %v3052_v58 = vpop.f32.mrf.mxu0  ;;  %v2732_v52 = vadd.f32 %v5249_v21, %v8434_v15 }
 0x22b   :  { %v3234_v6 = vadd.f32 %v7053_v8, %v3163_v33  ;;  %v3161_v19 = vadd.f32 %v3052_v58, %v2711_v47  ;;  %v2723_v63 = vpop.f32.mrf.mxu1  ;;  %5383 = vmatprep.mubr.msk.bf16.mxu1 %vm1880_vm2, %v3333_v62  ;;  %v3295_v32 = vmax.f32 %v3231_v59, 0.0 }
 0x22c   :  { %v2724_v3 = vadd.f32 %v2723_v63, %v8435_v7  ;;  %v5325_v23 = vpop.f32.mrf.mxu0  ;;  %5384 = vmatmul.mubr.msk.bf16.gmra.mxu1 %vm1880_vm2, %v3334_v16 }
 0x22d   :  { %v3232_v27 = vadd.f32 %v7053_v8, %v3161_v19  ;;  %v5250_v31 = vpop.f32.mrf.mxu1  ;;  %v3298_v37 = vmax.f32 %v3234_v6, 0.0  ;;  %v3166_v39 = vadd.f32 %v5325_v23, %v2732_v52  ;;  %v8442_v19 = vld [vmem:[#allocation18_spill] sm:$0xff] }
 0x22e   :  { %v2735_v30 = vadd.f32 %v5250_v31, %v8436_v61  ;;  %v3065_v5 = vpop.f32.mrf.mxu0 }
 0x22f   :  { %v3296_v12 = vmax.f32 %v3232_v27, 0.0  ;;  %v3164_v49 = vadd.f32 %v3065_v5, %v2724_v3  ;;  %v2726_v41 = vpop.f32.mrf.mxu1  ;;  %v3336_v11 = vpack.c.bf16 %v3298_v37, %v3297_v40  ;;  %v3237_v4 = vadd.f32 %v7053_v8, %v3166_v39  ;;  %v8444_v27 = vld [vmem:[#allocation20_spill] sm:$0xff] }
 0x230   :  { %v2727_v53 = vadd.f32 %v2726_v41, %v8437_v34  ;;  %v5326_v42 = vpop.f32.mrf.mxu0  ;;  %v8445_v41 = vld [vmem:[#allocation21_spill] sm:$0xff] }
 0x231   :  { %v3335_v9 = vpack.c.bf16 %v3296_v12, %v3295_v32  ;;  %v3167_v2 = vadd.f32 %v5326_v42, %v2735_v30  ;;  %v5253_v20 = vpop.f32.mrf.mxu1  ;;  %v3235_v0 = vadd.f32 %v7053_v8, %v3164_v49  ;;  %v3301_v46 = vmax.f32 %v3237_v4, 0.0 }
 0x232   :  { %v3068_v48 = vpop.f32.mrf.mxu0  ;;  %v2748_v29 = vadd.f32 %v5253_v20, %v8438_v43 }
 0x233   :  { %v3238_v24 = vadd.f32 %v7053_v8, %v3167_v2  ;;  %v3165_v36 = vadd.f32 %v3068_v48, %v2727_v53  ;;  %v2739_v13 = vpop.f32.mrf.mxu1  ;;  %5387 = vmatprep.mubr.msk.bf16.mxu1 %vm1880_vm2, %v3335_v9  ;;  %v3299_v55 = vmax.f32 %v3235_v0, 0.0 }
 0x234   :  { %v2740_v1 = vadd.f32 %v2739_v13, %v8439_v45  ;;  %v5329_v35 = vpop.f32.mrf.mxu0  ;;  %5388 = vmatmul.mubr.msk.bf16.gmra.mxu1 %vm1880_vm2, %v3336_v11  ;;  %v7214_v45 = vld [vmem:[%s8356_s4] ss:$0 sm:$0xff] }
 0x235   :  { %v3236_v18 = vadd.f32 %v7053_v8, %v3165_v36  ;;  %v5254_v14 = vpop.f32.mrf.mxu1  ;;  %v3302_v51 = vmax.f32 %v3238_v24, 0.0  ;;  %v3170_v44 = vadd.f32 %v5329_v35, %v2748_v29 }
 0x236   :  { %v2751_v22 = vadd.f32 %v5254_v14, %v8440_v28  ;;  %v3081_v60 = vpop.f32.mrf.mxu0 }
 0x237   :  { %v3300_v50 = vmax.f32 %v3236_v18, 0.0  ;;  %v3168_v26 = vadd.f32 %v3081_v60, %v2740_v1  ;;  %v2742_v56 = vpop.f32.mrf.mxu1  ;;  %v3338_v62 = vpack.c.bf16 %v3302_v51, %v3301_v46  ;;  %v3241_v6 = vadd.f32 %v7053_v8, %v3170_v44 }
 0x238   :  { %v2743_v54 = vadd.f32 %v2742_v56, %v8441_v17  ;;  %v5330_v10 = vpop.f32.mrf.mxu0 }
 0x239   :  { %v3337_v57 = vpack.c.bf16 %v3300_v50, %v3299_v55  ;;  %v3171_v47 = vadd.f32 %v5330_v10, %v2751_v22  ;;  %v5257_v25 = vpop.f32.mrf.mxu1  ;;  %v3239_v21 = vadd.f32 %v7053_v8, %v3168_v26  ;;  %v3305_v12 = vmax.f32 %v3241_v6, 0.0 }
 0x23a   :  { %v3084_v33 = vpop.f32.mrf.mxu0  ;;  %v2764_v63 = vadd.f32 %v5257_v25, %v8442_v19 }
 0x23b   :  { %v3242_v16 = vadd.f32 %v7053_v8, %v3171_v47  ;;  %v3169_v58 = vadd.f32 %v3084_v33, %v2743_v54  ;;  %v2755_v59 = vpop.f32.mrf.mxu1  ;;  %5391 = vmatprep.mubr.msk.bf16.mxu1 %vm1880_vm2, %v3337_v57  ;;  %v3303_v61 = vmax.f32 %v3239_v21, 0.0  ;;  %v5639_v21 = vld [vmem:[%s8352_s0 + $0x20] sm:$0x1] }
 0x23c   :  { %v2756_v15 = vadd.f32 %v2755_v59, %v8443_v38  ;;  %v5333_v52 = vpop.f32.mrf.mxu0  ;;  %5392 = vmatmul.mubr.msk.bf16.gmra.mxu1 %vm1880_vm2, %v3338_v62  ;;  %v5640_v59 = vld [vmem:[%s8352_s0 + $0x38] sm:$0x1]  ;;  %v5641_v38 = vld [vmem:[%s8352_s0 + $0x2c] sm:$0x1] }
 0x23d   :  { %v3240_v7 = vadd.f32 %v7053_v8, %v3169_v58  ;;  %v5258_v3 = vpop.f32.mrf.mxu1  ;;  %v3306_v23 = vmax.f32 %v3242_v16, 0.0  ;;  %v3174_v49 = vadd.f32 %v5333_v52, %v2764_v63  ;;  %v182_v16 = vshll.u32 %v5639_v21, 16 }
 0x23e   :  { %v2767_v31 = vadd.f32 %v5258_v3, %v8444_v27  ;;  %v3097_v37 = vpop.f32.mrf.mxu0  ;;  %v230_v6 = vshll.u32 %v5640_v59, 16  ;;  %v5642_v3 = vld [vmem:[%s8352_s0 + $0x50] sm:$0x1]  ;;  %v5643_v27 = vld [vmem:[%s8352_s0 + $0x44] sm:$0x1] }
 0x23f   :  { %v3304_v30 = vmax.f32 %v3240_v7, 0.0  ;;  %v3172_v5 = vadd.f32 %v3097_v37, %v2756_v15  ;;  %v2758_v32 = vpop.f32.mrf.mxu1  ;;  %v3340_v42 = vpack.c.bf16 %v3306_v23, %v3305_v12  ;;  %v3245_v48 = vadd.f32 %v7053_v8, %v3174_v49 }
 0x240   :  { %v2759_v40 = vadd.f32 %v2758_v32, %v8445_v41  ;;  %v5334_v39 = vpop.f32.mrf.mxu0  ;;  %v206_v15 = vshll.u32 %v5641_v38, 16  ;;  %v278_v23 = vshll.u32 %v5642_v3, 16  ;;  %v7244_v49 = vrot.slane %v182_v16, 5 }
 0x241   :  { %v3339_v34 = vpack.c.bf16 %v3304_v30, %v3303_v61  ;;  %v3175_v53 = vadd.f32 %v5334_v39, %v2767_v31  ;;  %v3243_v2 = vadd.f32 %v7053_v8, %v3172_v5  ;;  %v3309_v4 = vmax.f32 %v3245_v48, 0.0  ;;  %v5644_v30 = vld [vmem:[%s8352_s0 + $0x68] sm:$0x1] }
 0x242   :  { %v3100_v9 = vpop.f32.mrf.mxu0  ;;  %v254_v31 = vshll.u32 %v5643_v27, 16  ;;  %v326_v5 = vshll.u32 %v5644_v30, 16  ;;  %8446 = vst [vmem:[#allocation2_spill] sm:$0xff] %v7244_v49  ;;  %v7246_v41 = vrot.slane %v230_v6, 5  ;;  %v7254_v48 = vrot.slane %v278_v23, 5 }
 0x243   :  { %v3246_v20 = vadd.f32 %v7053_v8, %v3175_v53  ;;  %v3173_v11 = vadd.f32 %v3100_v9, %v2759_v40  ;;  %5395 = vmatprep.mubr.msk.bf16.mxu1 %vm1880_vm2, %v3339_v34  ;;  %v3307_v36 = vmax.f32 %v3243_v2, 0.0  ;;  %v7248_v53 = vrot.slane %v206_v15, 5 }
 0x244   :  { %5396 = vmatmul.mubr.msk.bf16.gmra.mxu1 %vm1880_vm2, %v3340_v42  ;;  %8447 = vst [vmem:[#allocation3_spill] sm:$0xff] %v7246_v41  ;;  %v5645_v42 = vld [vmem:[%s8352_s0 + $0x5c] sm:$0x1]  ;;  %8449 = vst [vmem:[#allocation5_spill] sm:$0xff] %v7254_v48 }
 0x245   :  { %v3244_v0 = vadd.f32 %v7053_v8, %v3173_v11  ;;  %v3310_v24 = vmax.f32 %v3246_v20, 0.0  ;;  %8448 = vst [vmem:[#allocation4_spill] sm:$0xff] %v7248_v53  ;;  %v302_v9 = vshll.u32 %v5645_v42, 16 }
 0x247   :  { %v3308_v13 = vmax.f32 %v3244_v0, 0.0  ;;  %v3342_v29 = vpack.c.bf16 %v3310_v24, %v3309_v4  ;;  %v7256_v0 = vrot.slane %v254_v31, 5  ;;  %v5646_v24 = vld [vmem:[%s8352_s0 + $0xf8] sm:$0x1]  ;;  %v7261_v4 = vrot.slane %v326_v5, 5 }
 0x249   :  { %v3341_v43 = vpack.c.bf16 %v3308_v13, %v3307_v36  ;;  %8450 = vst [vmem:[#allocation6_spill] sm:$0xff] %v7256_v0  ;;  %v566_v36 = vshll.u32 %v5646_v24, 16 }
 0x24b   :  { %5399 = vmatprep.mubr.msk.bf16.mxu1 %vm1880_vm2, %v3341_v43 }
 0x24c   :  { %5400 = vmatmul.mubr.msk.bf16.gmra.mxu1 %vm1880_vm2, %v3342_v29 }
 0x294   :  { %v5341_v1 = vpop.f32.mrf.mxu1 }
 0x295   :  { %v3505_v35 = vadd.f32 %v5341_v1, %v7214_v45 }
 0x296   :  { %v3496_v18 = vpop.f32.mrf.mxu1 }
 0x297   :  { %v3753_v8 = vmul.f32 0.5, %v3505_v35  ;;  %v3497_v14 = vadd.f32 %v7214_v45, %v3496_v18 }
 0x298   :  { %v5342_v51 = vpop.f32.mrf.mxu1 }
 0x299   :  { %v3751_v28 = vmul.f32 0.5, %v3497_v14  ;;  %v3508_v22 = vadd.f32 %v5342_v51, %v7214_v45  ;;  %5506 = vtanh.f32 %v3753_v8  ;;  %v7267_v51 = vrot.slane %v302_v9, 5 }
 0x29a   :  { %v3499_v60 = vpop.f32.mrf.mxu1 }
 0x29b   :  { %5508 = vtanh.f32 %v3751_v28  ;;  %v3754_v55 = vmul.f32 0.5, %v3508_v22  ;;  %v3500_v50 = vadd.f32 %v7214_v45, %v3499_v60 }
 0x29c   :  { %v5345_v26 = vpop.f32.mrf.mxu1 }
 0x29d   :  { %5510 = vtanh.f32 %v3754_v55  ;;  %v3752_v56 = vmul.f32 0.5, %v3500_v50  ;;  %v3521_v46 = vadd.f32 %v5345_v26, %v7214_v45  ;;  %v7271_v50 = vrot.slane %v566_v36, 5 }
 0x29e   :  { %v3512_v44 = vpop.f32.mrf.mxu1 }
 0x29f   :  { %5512 = vtanh.f32 %v3752_v56  ;;  %v3757_v17 = vmul.f32 0.5, %v3521_v46  ;;  %v3513_v54 = vadd.f32 %v7214_v45, %v3512_v44  ;;  %8453 = vst [vmem:[#allocation9_spill] sm:$0xff] %v7271_v50  ;;  %v5647_v44 = vld [vmem:[%s8352_s0 + $0xec] sm:$0x1] }
 0x2a0   :  { %v5346_v10 = vpop.f32.mrf.mxu1 }
 0x2a1   :  { %v3755_v57 = vmul.f32 0.5, %v3513_v54  ;;  %v3524_v47 = vadd.f32 %v5346_v10, %v7214_v45  ;;  %5514 = vtanh.f32 %v3757_v17  ;;  %v542_v17 = vshll.u32 %v5647_v44, 16  ;;  %v5648_v54 = vld [vmem:[%s8352_s0 + $0x110] sm:$0x1] }
 0x2a2   :  { %v3515_v25 = vpop.f32.mrf.mxu1  ;;  %v614_v10 = vshll.u32 %v5648_v54, 16 }
 0x2a3   :  { %5516 = vtanh.f32 %v3755_v57  ;;  %v3758_v62 = vmul.f32 0.5, %v3524_v47  ;;  %v3516_v33 = vadd.f32 %v7214_v45, %v3515_v25  ;;  %v7294_v3 = vrot.slane %v542_v17, 5 }
 0x2a4   :  { %v5349_v58 = vpop.f32.mrf.mxu1 }
 0x2a5   :  { %5518 = vtanh.f32 %v3758_v62  ;;  %v3756_v19 = vmul.f32 0.5, %v3516_v33  ;;  %v3537_v63 = vadd.f32 %v5349_v58, %v7214_v45  ;;  %8457 = vst [vmem:[#allocation13_spill] sm:$0xff] %v7294_v3 }
 0x2a6   :  { %v3528_v52 = vpop.f32.mrf.mxu1  ;;  %v5507_v7 = vpop.eup %5506 }
 0x2a7   :  { %5520 = vtanh.f32 %v3756_v19  ;;  %v3529_v37 = vadd.f32 %v7214_v45, %v3528_v52  ;;  %v3761_v32 = vmul.f32 0.5, %v3537_v63  ;;  %v3881_v2 = vmul.f32 0.5, %v5507_v7 }
 0x2a8   :  { %v5509_v61 = vpop.eup %5508  ;;  %v5350_v12 = vpop.f32.mrf.mxu1 }
 0x2a9   :  { %v3879_v40 = vmul.f32 0.5, %v5509_v61  ;;  %v3759_v39 = vmul.f32 0.5, %v3529_v37  ;;  %v3540_v20 = vadd.f32 %v5350_v12, %v7214_v45  ;;  %v7269_v28 = vadd.f32 0.5, %v3881_v2 }
 0x2aa   :  { %v5511_v34 = vpop.eup %5510  ;;  %v3531_v11 = vpop.f32.mrf.mxu1 }
 0x2ab   :  { %5522 = vtanh.f32 %v3759_v39  ;;  %v3762_v43 = vmul.f32 0.5, %v3540_v20  ;;  %v3532_v29 = vadd.f32 %v7214_v45, %v3531_v11  ;;  %v7264_v35 = vadd.f32 0.5, %v3879_v40  ;;  %8452 = vst [vmem:[#allocation8_spill] sm:$0xff] %v7269_v28  ;;  %v5649_v20 = vld [vmem:[%s8352_s0 + $0x104] sm:$0x1] }
 0x2ac   :  { %v5513_v13 = vpop.eup %5512  ;;  %5524 = vtanh.f32 %v3761_v32  ;;  %v5353_v1 = vpop.f32.mrf.mxu1  ;;  %v3882_v18 = vmul.f32 0.5, %v5511_v34  ;;  %v4011_v58 = vsel %vm4007_vm5, %v7269_v28, 0.0  ;;  %v7298_v32 = vrot.slane %v614_v10, 5 }
 0x2ad   :  { %8451 = vst [vmem:[#allocation7_spill] sm:$0xff] %v7264_v35  ;;  %v3880_v8 = vmul.f32 0.5, %v5513_v13  ;;  %v3553_v14 = vadd.f32 %v5353_v1, %v7214_v45  ;;  %5526 = vtanh.f32 %v3762_v43  ;;  %v3760_v22 = vmul.f32 0.5, %v3532_v29 }
 0x2ae   :  { %v3544_v60 = vpop.f32.mrf.mxu1  ;;  %v5515_v55 = vpop.eup %5514  ;;  %v4008_v25 = vsel %vm4007_vm5, %v7264_v35, 0.0  ;;  %v7284_v62 = vadd.f32 0.5, %v3882_v18  ;;  %8458 = vst [vmem:[#allocation14_spill] sm:$0xff] %v7298_v32  ;;  %v590_v11 = vshll.u32 %v5649_v20, 16 }
 0x2af   :  { %v7273_v26 = vadd.f32 0.5, %v3880_v8  ;;  %v3765_v56 = vmul.f32 0.5, %v3553_v14  ;;  %5528 = vtanh.f32 %v3760_v22  ;;  %v3545_v57 = vadd.f32 %v7214_v45, %v3544_v60  ;;  %v5650_v22 = vld [vmem:[%s8352_s0 + $0x128] sm:$0x1] }
 0x2b0   :  { %v5517_v46 = vpop.eup %5516  ;;  %v5354_v47 = vpop.f32.mrf.mxu1  ;;  %8455 = vst [vmem:[#allocation11_spill] sm:$0xff] %v7284_v62  ;;  %v3885_v38 = vmul.f32 0.5, %v5515_v55  ;;  %v4013_v37 = vsel %vm4007_vm5, %v7284_v62, 0.0  ;;  %v662_v60 = vshll.u32 %v5650_v22, 16 }
 0x2b1   :  { %8454 = vst [vmem:[#allocation10_spill] sm:$0xff] %v7273_v26  ;;  %v4009_v33 = vsel %vm4007_vm5, %v7273_v26, 0.0  ;;  %v3883_v21 = vmul.f32 0.5, %v5517_v46  ;;  %v3763_v6 = vmul.f32 0.5, %v3545_v57  ;;  %v3556_v19 = vadd.f32 %v5354_v47, %v7214_v45  ;;  %v5651_v47 = vld [vmem:[%s8352_s0 + $0x11c] sm:$0x1] }
 0x2b2   :  { %v5519_v16 = vpop.eup %5518  ;;  %v4010_v59 = vadd.f32 %v4009_v33, %v4008_v25  ;;  %v3547_v63 = vpop.f32.mrf.mxu1  ;;  %5530 = vtanh.f32 %v3765_v56  ;;  %v7301_v34 = vadd.f32 0.5, %v3885_v38  ;;  %v638_v25 = vshll.u32 %v5651_v47, 16 }
 0x2b3   :  { %v7291_v15 = vadd.f32 0.5, %v3883_v21  ;;  %v3548_v52 = vadd.f32 %v7214_v45, %v3547_v63  ;;  %5532 = vtanh.f32 %v3763_v6  ;;  %v3766_v27 = vmul.f32 0.5, %v3556_v19  ;;  %v5652_v63 = vld [vmem:[%s8352_s0 + $0x140] sm:$0x1] }
 0x2b4   :  { %v5521_v7 = vpop.eup %5520  ;;  %v4012_v23 = vadd.f32 %v4011_v58, %v4010_v59  ;;  %v5357_v31 = vpop.f32.mrf.mxu1  ;;  %v3886_v61 = vmul.f32 0.5, %v5519_v16  ;;  %8459 = vst [vmem:[#allocation15_spill] sm:$0xff] %v7301_v34  ;;  %v4019_v17 = vsel %vm4007_vm5, %v7301_v34, 0.0  ;;  %v710_v38 = vshll.u32 %v5652_v63, 16 }
 0x2b5   :  { %8456 = vst [vmem:[#allocation12_spill] sm:$0xff] %v7291_v15  ;;  %v3884_v30 = vmul.f32 0.5, %v5521_v7  ;;  %v3764_v5 = vmul.f32 0.5, %v3548_v52  ;;  %5534 = vtanh.f32 %v3766_v27  ;;  %v3569_v40 = vadd.f32 %v5357_v31, %v7214_v45 }
 0x2b6   :  { %v4014_v12 = vadd.f32 %v4013_v37, %v4012_v23  ;;  %v3560_v39 = vpop.f32.mrf.mxu1  ;;  %v4015_v42 = vsel %vm4007_vm5, %v7291_v15, 0.0  ;;  %v7311_v1 = vadd.f32 0.5, %v3886_v61  ;;  %v7342_v20 = vrot.slane %v662_v60, 5 }
 0x2b7   :  { %v7305_v9 = vadd.f32 0.5, %v3884_v30  ;;  %5536 = vtanh.f32 %v3764_v5  ;;  %v3769_v36 = vmul.f32 0.5, %v3569_v40  ;;  %v3561_v13 = vadd.f32 %v7214_v45, %v3560_v39 }
 0x2b8   :  { %v5523_v2 = vpop.eup %5522  ;;  %v4016_v24 = vadd.f32 %v4015_v42, %v4014_v12  ;;  %v5358_v43 = vpop.f32.mrf.mxu1  ;;  %8461 = vst [vmem:[#allocation17_spill] sm:$0xff] %v7311_v1  ;;  %v4021_v59 = vsel %vm4007_vm5, %v7311_v1, 0.0  ;;  %v7336_v5 = vrot.slane %v590_v11, 5 }
 0x2b9   :  { %8460 = vst [vmem:[#allocation16_spill] sm:$0xff] %v7305_v9  ;;  %v5525_v29 = vpop.eup %5524  ;;  %v4017_v18 = vsel %vm4007_vm5, %v7305_v9, 0.0  ;;  %v3887_v8 = vmul.f32 0.5, %v5523_v2  ;;  %v3572_v14 = vadd.f32 %v5358_v43, %v7214_v45  ;;  %5538 = vtanh.f32 %v3769_v36 }
 0x2ba   :  { %v4018_v55 = vadd.f32 %v4017_v18, %v4016_v24  ;;  %v3767_v56 = vmul.f32 0.5, %v3561_v13  ;;  %v3563_v46 = vpop.f32.mrf.mxu1  ;;  %v5527_v44 = vpop.eup %5526  ;;  %v3889_v21 = vmul.f32 0.5, %v5525_v29  ;;  %8463 = vst [vmem:[#allocation19_spill] sm:$0xff] %v7336_v5  ;;  %v7345_v13 = vrot.slane %v638_v25, 5 }
 0x2bb   :  { %v7321_v54 = vadd.f32 0.5, %v3887_v8  ;;  %v3770_v10 = vmul.f32 0.5, %v3572_v14  ;;  %v3564_v57 = vadd.f32 %v7214_v45, %v3563_v46  ;;  %v3890_v7 = vmul.f32 0.5, %v5527_v44 }
 0x2bc   :  { %v4020_v33 = vadd.f32 %v4019_v17, %v4018_v55  ;;  %5540 = vtanh.f32 %v3767_v56  ;;  %v5361_v16 = vpop.f32.mrf.mxu1  ;;  %v5529_v58 = vpop.eup %5528  ;;  %v7338_v12 = vadd.f32 0.5, %v3889_v21  ;;  %8466 = vst [vmem:[#allocation22_spill] sm:$0xff] %v7345_v13  ;;  %v7351_v14 = vrot.slane %v710_v38, 5 }
 0x2bd   :  { %8462 = vst [vmem:[#allocation18_spill] sm:$0xff] %v7321_v54  ;;  %5542 = vtanh.f32 %v3770_v10  ;;  %v3768_v6 = vmul.f32 0.5, %v3564_v57  ;;  %v3585_v19 = vadd.f32 %v5361_v16, %v7214_v45  ;;  %v3888_v23 = vmul.f32 0.5, %v5529_v58 }
 0x2be   :  { %v4022_v52 = vadd.f32 %v4021_v59, %v4020_v33  ;;  %v3576_v27 = vpop.f32.mrf.mxu1  ;;  %v4023_v31 = vsel %vm4007_vm5, %v7321_v54, 0.0  ;;  %8464 = vst [vmem:[#allocation20_spill] sm:$0xff] %v7338_v12  ;;  %v7347_v43 = vadd.f32 0.5, %v3890_v7  ;;  %v4027_v56 = vsel %vm4007_vm5, %v7338_v12, 0.0  ;;  %v5653_v33 = vld [vmem:[%s8352_s0 + $0x134] sm:$0x1] }
 0x2bf   :  { %5544 = vtanh.f32 %v3768_v6  ;;  %v3773_v37 = vmul.f32 0.5, %v3585_v19  ;;  %v3577_v61 = vadd.f32 %v7214_v45, %v3576_v27  ;;  %v5531_v30 = vpop.eup %5530  ;;  %v7340_v39 = vadd.f32 0.5, %v3888_v23 }
 0x2c0   :  { %v4024_v40 = vadd.f32 %v4023_v31, %v4022_v52  ;;  %v5362_v42 = vpop.f32.mrf.mxu1  ;;  %v5533_v2 = vpop.eup %5532  ;;  %8467 = vst [vmem:[#allocation23_spill] sm:$0xff] %v7347_v43  ;;  %v3893_v46 = vmul.f32 0.5, %v5531_v30  ;;  %v686_v21 = vshll.u32 %v5653_v33, 16  ;;  %v4029_v16 = vsel %vm4007_vm5, %v7347_v43, 0.0 }
 0x2c1   :  { %8465 = vst [vmem:[#allocation21_spill] sm:$0xff] %v7340_v39  ;;  %5546 = vtanh.f32 %v3773_v37  ;;  %v3771_v24 = vmul.f32 0.5, %v3577_v61  ;;  %v3588_v36 = vadd.f32 %v5362_v42, %v7214_v45  ;;  %v4025_v11 = vsel %vm4007_vm5, %v7340_v39, 0.0 }
 0x2c2   :  { %v3891_v29 = vmul.f32 0.5, %v5533_v2  ;;  %v3579_v18 = vpop.f32.mrf.mxu1  ;;  %v5535_v8 = vpop.eup %5534  ;;  %v4026_v22 = vadd.f32 %v4025_v11, %v4024_v40  ;;  %v7367_v23 = vadd.f32 0.5, %v3893_v46 }
 0x2c3   :  { %5548 = vtanh.f32 %v3771_v24  ;;  %v3774_v60 = vmul.f32 0.5, %v3588_v36  ;;  %v3580_v17 = vadd.f32 %v7214_v45, %v3579_v18  ;;  %v3894_v58 = vmul.f32 0.5, %v5535_v8 }
 0x2c4   :  { %v5537_v55 = vpop.eup %5536  ;;  %v7355_v44 = vadd.f32 0.5, %v3891_v29  ;;  %v5365_v10 = vpop.f32.mrf.mxu1  ;;  %v4028_v57 = vadd.f32 %v4027_v56, %v4026_v22  ;;  %8470 = vst [vmem:[#allocation26_spill] sm:$0xff] %v7367_v23  ;;  %v7379_v56 = vrot.slane %v686_v21, 5  ;;  %v4035_v46 = vsel %vm4007_vm5, %v7367_v23, 0.0 }
 0x2c5   :  { %v3892_v47 = vmul.f32 0.5, %v5537_v55  ;;  %5550 = vtanh.f32 %v3774_v60  ;;  %v3601_v25 = vadd.f32 %v5365_v10, %v7214_v45  ;;  %v3772_v59 = vmul.f32 0.5, %v3580_v17 }
 0x2c6   :  { %8468 = vst [vmem:[#allocation24_spill] sm:$0xff] %v7355_v44  ;;  %v3592_v6 = vpop.f32.mrf.mxu1  ;;  %v5539_v19 = vpop.eup %5538  ;;  %v4030_v63 = vadd.f32 %v4029_v16, %v4028_v57  ;;  %v4031_v27 = vsel %vm4007_vm5, %v7355_v44, 0.0  ;;  %v7373_v24 = vadd.f32 0.5, %v3894_v58 }
 0x2c7   :  { %v7364_v38 = vadd.f32 0.5, %v3892_v47  ;;  %v3777_v52 = vmul.f32 0.5, %v3601_v25  ;;  %v3593_v7 = vadd.f32 %v7214_v45, %v3592_v6  ;;  %v3897_v31 = vmul.f32 0.5, %v5539_v19 }
 0x2c8   :  { %5552 = vtanh.f32 %v3772_v59  ;;  %v5366_v37 = vpop.f32.mrf.mxu1  ;;  %v4032_v30 = vadd.f32 %v4031_v27, %v4030_v63  ;;  %8471 = vst [vmem:[#allocation27_spill] sm:$0xff] %v7373_v24  ;;  %v4037_v59 = vsel %vm4007_vm5, %v7373_v24, 0.0 }
 0x2c9   :  { %8469 = vst [vmem:[#allocation25_spill] sm:$0xff] %v7364_v38  ;;  %v5541_v61 = vpop.eup %5540  ;;  %v4033_v40 = vsel %vm4007_vm5, %v7364_v38, 0.0  ;;  %5554 = vtanh.f32 %v3777_v52  ;;  %v3775_v42 = vmul.f32 0.5, %v3593_v7  ;;  %v7375_v36 = vadd.f32 0.5, %v3897_v31 }
 0x2ca   :  { %v5543_v2 = vpop.eup %5542  ;;  %v3895_v11 = vmul.f32 0.5, %v5541_v61  ;;  %v3604_v29 = vadd.f32 %v5366_v37, %v7214_v45  ;;  %v3595_v18 = vpop.f32.mrf.mxu1  ;;  %v4034_v8 = vadd.f32 %v4033_v40, %v4032_v30 }
 0x2cb   :  { %8472 = vst [vmem:[#allocation28_spill] sm:$0xff] %v7375_v36  ;;  %v3898_v22 = vmul.f32 0.5, %v5543_v2  ;;  %5556 = vtanh.f32 %v3775_v42  ;;  %v3596_v60 = vadd.f32 %v7214_v45, %v3595_v18  ;;  %v7391_v21 = vsel %vm4007_vm5, %v7375_v36, 0.0 }
 0x2cc   :  { %v5545_v55 = vpop.eup %5544  ;;  %v3778_v17 = vmul.f32 0.5, %v3604_v29  ;;  %v5369_v10 = vpop.f32.mrf.mxu1  ;;  %v7383_v57 = vadd.f32 0.5, %v3895_v11  ;;  %v4036_v47 = vadd.f32 %v4035_v46, %v4034_v8 }
 0x2cd   :  { %v7385_v25 = vadd.f32 0.5, %v3898_v22  ;;  %v3896_v33 = vmul.f32 0.5, %v5545_v55  ;;  %v3776_v16 = vmul.f32 0.5, %v3596_v60  ;;  %v3617_v6 = vadd.f32 %v5369_v10, %v7214_v45  ;;  %v5654_v22 = vld [vmem:[%s8352_s0 + $0x198] sm:$0xf] }
 0x2ce   :  { %8473 = vst [vmem:[#allocation29_spill] sm:$0xff] %v7383_v57  ;;  %v5547_v58 = vpop.eup %5546  ;;  %5558 = vtanh.f32 %v3778_v17  ;;  %v3608_v19 = vpop.f32.mrf.mxu1  ;;  %v7397_v7 = vsel %vm4007_vm5, %v7383_v57, 0.0  ;;  %v7405_v40 = vadd.f32 %v4037_v59, %v4036_v47  ;;  %v883_v60 = vshrl.u32 %v5654_v22, 16 }
 0x2cf   :  { %8474 = vst [vmem:[#allocation30_spill] sm:$0xff] %v7385_v25  ;;  %v3901_v63 = vmul.f32 0.5, %v5547_v58  ;;  %5560 = vtanh.f32 %v3776_v16  ;;  %v3609_v52 = vadd.f32 %v7214_v45, %v3608_v19  ;;  %v7401_v31 = vsel %vm4007_vm5, %v7385_v25, 0.0 }
 0x2d0   :  { %v5549_v27 = vpop.eup %5548  ;;  %v3781_v37 = vmul.f32 0.5, %v3617_v6  ;;  %v5370_v61 = vpop.f32.mrf.mxu1  ;;  %v7403_v30 = vadd.f32 0.5, %v3896_v33  ;;  %v885_v16 = vrot.slane %v883_v60, 4  ;;  %v886_v58 = vshll.u32 %v5654_v22, 16 }
 0x2d1   :  { %v7407_v42 = vadd.f32 0.5, %v3901_v63  ;;  %v3899_v2 = vmul.f32 0.5, %v5549_v27  ;;  %v3779_v11 = vmul.f32 0.5, %v3609_v52  ;;  %v3620_v29 = vadd.f32 %v5370_v61, %v7214_v45  ;;  %v5655_v52 = vld [vmem:[%s8352_s0 + $0x19c] sm:$0xf] }
 0x2d2   :  { %v5551_v18 = vpop.eup %5550  ;;  %5562 = vtanh.f32 %v3781_v37  ;;  %v3611_v8 = vpop.f32.mrf.mxu1  ;;  %v892_v27 = vshll.u32 %v5655_v52, 16 }
 0x2d3   :  { %8475 = vst [vmem:[#allocation31_spill] sm:$0xff] %v7407_v42  ;;  %v7415_v55 = vsel %vm4007_vm5, %v7407_v42, 0.0  ;;  %v7417_v46 = vadd.f32 0.5, %v3899_v2  ;;  %v3902_v17 = vmul.f32 0.5, %v5551_v18  ;;  %5564 = vtanh.f32 %v3779_v11 }
 0x2d4   :  { %v3782_v10 = vmul.f32 0.5, %v3620_v29  ;;  %v3612_v47 = vadd.f32 %v7214_v45, %v3611_v8  ;;  %v5373_v33 = vpop.f32.mrf.mxu1  ;;  %v888_v29 = vrot.slane %v886_v58, 5  ;;  %v894_v50 = vrot.slane %v892_v27, 5  ;;  %v5501_v58 = vld [vmem:[%s8357_s5] ss:$8 sps:$4 sm:$0xff]  }
 0x2d5   :  { %8476 = vst [vmem:[#allocation32_spill] sm:$0xff] %v7417_v46  ;;  %v5553_v59 = vpop.eup %5552  ;;  %v7422_v6 = vsel %vm4007_vm5, %v7417_v46, 0.0  ;;  %v7424_v19 = vadd.f32 0.5, %v3902_v17  ;;  %v3633_v63 = vadd.f32 %v5373_v33, %v7214_v45  ;;  %v896_v27 = vshrl.u32 %v5655_v52, 16 }
 0x2d6   :  { %v5555_v37 = vpop.eup %5554  ;;  %v3900_v61 = vmul.f32 0.5, %v5553_v59  ;;  %5566 = vtanh.f32 %v3782_v10  ;;  %v3780_v2 = vmul.f32 0.5, %v3612_v47  ;;  %v3624_v11 = vpop.f32.mrf.mxu1  ;;  %v889_v49 = vor.u32 %v888_v29, %v885_v16 }
 0x2d7   :  { %8477 = vst [vmem:[#allocation33_spill] sm:$0xff] %v7424_v19  ;;  %v7432_v18 = vsel %vm4007_vm5, %v7424_v19, 0.0  ;;  %v3905_v8 = vmul.f32 0.5, %v5555_v37  ;;  %v3785_v22 = vmul.f32 0.5, %v3633_v63  ;;  %v3625_v60 = vadd.f32 %v7214_v45, %v3624_v11 }
 0x2d8   :  { %v5557_v17 = vpop.eup %5556  ;;  %v7435_v33 = vadd.f32 0.5, %v3900_v61  ;;  %5568 = vtanh.f32 %v3780_v2  ;;  %v5374_v3 = vpop.f32.mrf.mxu1  ;;  %v890_v16 = vrot.slane %v889_v49, 4  ;;  %v898_v5 = vrot.slane %v896_v27, 4 }
 0x2d9   :  { %v7437_v59 = vadd.f32 0.5, %v3905_v8  ;;  %v3903_v10 = vmul.f32 0.5, %v5557_v17  ;;  %5570 = vtanh.f32 %v3785_v22  ;;  %v3783_v47 = vmul.f32 0.5, %v3625_v60 }
 0x2da   :  { %8478 = vst [vmem:[#allocation34_spill] sm:$0xff] %v7435_v33  ;;  %v7447_v63 = vsel %vm4007_vm5, %v7435_v33, 0.0  ;;  %v3636_v37 = vadd.f32 %v5374_v3, %v7214_v45  ;;  %v3627_v61 = vpop.f32.mrf.mxu1  ;;  %v895_v3 = vsel %vm7441_vm8, %v890_v16, %v894_v50 }
 0x2db   :  { %8479 = vst [vmem:[#allocation35_spill] sm:$0xff] %v7437_v59  ;;  %v5559_v2 = vpop.eup %5558  ;;  %v7452_v11 = vsel %vm4007_vm5, %v7437_v59, 0.0  ;;  %v7454_v29 = vadd.f32 0.5, %v3903_v10  ;;  %5572 = vtanh.f32 %v3783_v47  ;;  %v3628_v8 = vadd.f32 %v7214_v45, %v3627_v61 }
 0x2dc   :  { %v5561_v22 = vpop.eup %5560  ;;  %v3906_v60 = vmul.f32 0.5, %v5559_v2  ;;  %v3786_v17 = vmul.f32 0.5, %v3636_v37  ;;  %v5377_v53 = vpop.f32.mrf.mxu1  ;;  %v899_v61 = vor.u32 %v898_v5, %v894_v50  ;;  %v5656_v37 = vld [vmem:[%s8352_s0 + $0x1a0] sm:$0x1] }
 0x2dd   :  { %8482 = vst [vmem:[#allocation36_spill] sm:$0xff] %v7454_v29  ;;  %v7461_v49 = vsel %vm4007_vm5, %v7454_v29, 0.0  ;;  %v3904_v52 = vmul.f32 0.5, %v5561_v22  ;;  %v3784_v41 = vmul.f32 0.5, %v3628_v8  ;;  %v3649_v10 = vadd.f32 %v5377_v53, %v7214_v45 }
 0x2de   :  { %v7464_v24 = vadd.f32 0.5, %v3906_v60  ;;  %5574 = vtanh.f32 %v3786_v17  ;;  %v3640_v47 = vpop.f32.mrf.mxu1  ;;  %v902_v2 = vshll.u32 %v5656_v37, 16  ;;  %v900_v50 = vrot.slane %v899_v61, 4  ;;  %v5657_v61 = vld [vmem:[%s8352_s0 + $0x138] sm:$0xf] }
 0x2df   :  { %v5563_v16 = vpop.eup %5562  ;;  %v7469_v27 = vadd.f32 0.5, %v3904_v52  ;;  %5576 = vtanh.f32 %v3784_v41  ;;  %v3789_v23 = vmul.f32 0.5, %v3649_v10  ;;  %v3641_v22 = vadd.f32 %v7214_v45, %v3640_v47 }
 0x2e0   :  { %8483 = vst [vmem:[#allocation37_spill] sm:$0xff] %v7464_v24  ;;  %v5565_v8 = vpop.eup %5564  ;;  %v7474_v53 = vsel %vm4007_vm5, %v7464_v24, 0.0  ;;  %v3909_v60 = vmul.f32 0.5, %v5563_v16  ;;  %v5378_v17 = vpop.f32.mrf.mxu1  ;;  %v904_v5 = vrot.slane %v902_v2, 5  ;;  %v691_v2 = vshrl.u32 %v5657_v61, 16 }
 0x2e1   :  { %8484 = vst [vmem:[#allocation38_spill] sm:$0xff] %v7469_v27  ;;  %v7478_v38 = vsel %vm4007_vm5, %v7469_v27, 0.0  ;;  %v3907_v37 = vmul.f32 0.5, %v5565_v8  ;;  %5578 = vtanh.f32 %v3789_v23  ;;  %v3787_v52 = vmul.f32 0.5, %v3641_v22 }
 0x2e2   :  { %v7480_v41 = vadd.f32 0.5, %v3909_v60  ;;  %v3652_v10 = vadd.f32 %v5378_v17, %v7214_v45  ;;  %v3643_v47 = vpop.f32.mrf.mxu1  ;;  %v905_v44 = vsel %vm7441_vm8, %v900_v50, %v904_v5  ;;  %v693_v50 = vrot.slane %v691_v2, 4 }
 0x2e3   :  { %v5567_v16 = vpop.eup %5566  ;;  %v7488_v43 = vadd.f32 0.5, %v3907_v37  ;;  %5580 = vtanh.f32 %v3787_v52  ;;  %v3644_v23 = vadd.f32 %v7214_v45, %v3643_v47  ;;  %v4907_v22 = vcombine.low %v895_v3, %v905_v44 }
 0x2e4   :  { %8485 = vst [vmem:[#allocation39_spill] sm:$0xff] %v7480_v41  ;;  %v7493_v8 = vsel %vm4007_vm5, %v7480_v41, 0.0  ;;  %v3910_v60 = vmul.f32 0.5, %v5567_v16  ;;  %v3790_v17 = vmul.f32 0.5, %v3652_v10  ;;  %v5381_v12 = vpop.f32.mrf.mxu1  ;;  %v694_v52 = vshll.u32 %v5657_v61, 16 }
 0x2e5   :  { %8486 = vst [vmem:[#allocation40_spill] sm:$0xff] %v7488_v43  ;;  %v5569_v5 = vpop.eup %5568  ;;  %v7497_v24 = vsel %vm4007_vm5, %v7488_v43, 0.0  ;;  %v3788_v59 = vmul.f32 0.5, %v3644_v23  ;;  %v3665_v37 = vadd.f32 %v5381_v12, %v7214_v45  ;;  %5085 = vmatprep.subr.bf16.mxu1 %v4907_v22  ;;  %v5658_v10 = vld [vmem:[%s8352_s0 + $0x13c] sm:$0xf] }
 0x2e6   :  { %v5571_v47 = vpop.eup %5570  ;;  %v7500_v44 = vadd.f32 0.5, %v3910_v60  ;;  %v3908_v3 = vmul.f32 0.5, %v5569_v5  ;;  %5582 = vtanh.f32 %v3790_v17  ;;  %v3656_v41 = vpop.f32.mrf.mxu1  ;;  %v700_v2 = vshll.u32 %v5658_v10, 16 }
 0x2e7   :  { %v3913_v16 = vmul.f32 0.5, %v5571_v47  ;;  %5584 = vtanh.f32 %v3788_v59  ;;  %v3793_v43 = vmul.f32 0.5, %v3665_v37  ;;  %v3657_v23 = vadd.f32 %v7214_v45, %v3656_v41 }
 0x2e8   :  { %8487 = vst [vmem:[#allocation41_spill] sm:$0xff] %v7500_v44  ;;  %v5573_v39 = vpop.eup %5572  ;;  %v7508_v12 = vsel %vm4007_vm5, %v7500_v44, 0.0  ;;  %v7510_v61 = vadd.f32 0.5, %v3908_v3  ;;  %v5382_v22 = vpop.f32.mrf.mxu1  ;;  %v696_v60 = vrot.slane %v694_v52, 5  ;;  %v702_v17 = vrot.slane %v700_v2, 5 }
 0x2e9   :  { %8488 = vst [vmem:[#allocation42_spill] sm:$0xff] %v7508_v12  ;;  %v7512_v5 = vadd.f32 0.5, %v3913_v16  ;;  %v3911_v54 = vmul.f32 0.5, %v5573_v39  ;;  %5586 = vtanh.f32 %v3793_v43  ;;  %v3791_v27 = vmul.f32 0.5, %v3657_v23 }
 0x2ea   :  { %8489 = vst [vmem:[#allocation43_spill] sm:$0xff] %v7510_v61  ;;  %v7516_v59 = vsel %vm4007_vm5, %v7510_v61, 0.0  ;;  %v3668_v41 = vadd.f32 %v5382_v22, %v7214_v45  ;;  %v3659_v37 = vpop.f32.mrf.mxu1  ;;  %v697_v47 = vor.u32 %v696_v60, %v693_v50  ;;  %v704_v44 = vshrl.u32 %v5658_v10, 16 }
 0x2eb   :  { %v5575_v29 = vpop.eup %5574  ;;  %v4266_v3 = vsel %vm4007_vm5, %v7512_v5, 0.0  ;;  %v7521_v52 = vadd.f32 0.5, %v3911_v54  ;;  %5588 = vtanh.f32 %v3791_v27  ;;  %v3660_v39 = vadd.f32 %v7214_v45, %v3659_v37 }
 0x2ec   :  { %v5577_v43 = vpop.eup %5576  ;;  %v3914_v2 = vmul.f32 0.5, %v5575_v29  ;;  %v3794_v16 = vmul.f32 0.5, %v3668_v41  ;;  %v5385_v23 = vpop.f32.mrf.mxu1  ;;  %v698_v61 = vrot.slane %v697_v47, 4  ;;  %v706_v1 = vrot.slane %v704_v44, 4 }
 0x2ed   :  { %v4263_v22 = vsel %vm4007_vm5, %v7521_v52, 0.0  ;;  %v3912_v50 = vmul.f32 0.5, %v5577_v43  ;;  %v3792_v10 = vmul.f32 0.5, %v3660_v39  ;;  %v3681_v60 = vadd.f32 %v5385_v23, %v7214_v45 }
 0x2ee   :  { %v5579_v34 = vpop.eup %5578  ;;  %v7527_v19 = vadd.f32 0.5, %v3914_v2  ;;  %5590 = vtanh.f32 %v3794_v16  ;;  %v3672_v54 = vpop.f32.mrf.mxu1  ;;  %v703_v27 = vsel %vm7441_vm8, %v698_v61, %v702_v17  ;;  %v707_v29 = vor.u32 %v706_v1, %v702_v17  ;;  %v5659_v16 = vld [vmem:[%s8352_s0 + $0xc0] sm:$0xf] }
 0x2ef   :  { %v7531_v41 = vadd.f32 0.5, %v3912_v50  ;;  %v3917_v37 = vmul.f32 0.5, %v5579_v34  ;;  %5592 = vtanh.f32 %v3792_v10  ;;  %v3797_v44 = vmul.f32 0.5, %v3681_v60 }
 0x2f0   :  { %v5581_v47 = vpop.eup %5580  ;;  %v4268_v39 = vsel %vm4007_vm5, %v7527_v19, 0.0  ;;  %v3673_v43 = vadd.f32 %v7214_v45, %v3672_v54  ;;  %v5386_v23 = vpop.f32.mrf.mxu1  ;;  %v708_v2 = vrot.slane %v707_v29, 4  ;;  %v499_v42 = vshrl.u32 %v5659_v16, 16 }
 0x2f1   :  { %v4264_v1 = vsel %vm4007_vm5, %v7531_v41, 0.0  ;;  %v7541_v61 = vadd.f32 0.5, %v3917_v37  ;;  %v3915_v34 = vmul.f32 0.5, %v5581_v47  ;;  %5594 = vtanh.f32 %v3797_v44 }
 0x2f2   :  { %v4265_v17 = vadd.f32 %v4264_v1, %v4263_v22  ;;  %v3795_v50 = vmul.f32 0.5, %v3673_v43  ;;  %v3684_v10 = vadd.f32 %v5386_v23, %v7214_v45  ;;  %v3675_v60 = vpop.f32.mrf.mxu1  ;;  %v713_v54 = vsel %vm7441_vm8, %v708_v2, %v7351_v14 }
 0x2f3   :  { %8490 = vst [vmem:[#allocation44_spill] sm:$0xff] %v7541_v61  ;;  %v5583_v29 = vpop.eup %5582  ;;  %v4274_v9 = vsel %vm4007_vm5, %v7541_v61, 0.0  ;;  %v7549_v15 = vadd.f32 0.5, %v3915_v34  ;;  %v3676_v37 = vadd.f32 %v7214_v45, %v3675_v60  ;;  %v4899_v33 = vcombine.low %v703_v27, %v713_v54 }
 0x2f4   :  { %v5585_v47 = vpop.eup %5584  ;;  %v4267_v44 = vadd.f32 %v4266_v3, %v4265_v17  ;;  %v3918_v22 = vmul.f32 0.5, %v5583_v29  ;;  %5596 = vtanh.f32 %v3795_v50  ;;  %v3798_v43 = vmul.f32 0.5, %v3684_v10  ;;  %v5389_v23 = vpop.f32.mrf.mxu1 }
 0x2f5   :  { %v4270_v1 = vsel %vm4007_vm5, %v7549_v15, 0.0  ;;  %v3916_v46 = vmul.f32 0.5, %v5585_v47  ;;  %v3796_v14 = vmul.f32 0.5, %v3676_v37  ;;  %v3697_v2 = vadd.f32 %v5389_v23, %v7214_v45  ;;  %5086 = vmatpush3.bf16.msra.mxu1 %v4899_v33 }
 0x2f6   :  { %v5587_v62 = vpop.eup %5586  ;;  %v4269_v34 = vadd.f32 %v4268_v39, %v4267_v44  ;;  %v7555_v28 = vadd.f32 0.5, %v3918_v22  ;;  %5598 = vtanh.f32 %v3798_v43  ;;  %v3688_v27 = vpop.f32.mrf.mxu1  ;;  %v501_v60 = vrot.slane %v499_v42, 4 }
 0x2f7   :  { %v7557_v3 = vadd.f32 0.5, %v3916_v46  ;;  %v3921_v17 = vmul.f32 0.5, %v5587_v62  ;;  %5600 = vtanh.f32 %v3796_v14  ;;  %v3801_v50 = vmul.f32 0.5, %v3697_v2 }
 0x2f8   :  { %8491 = vst [vmem:[#allocation45_spill] sm:$0xff] %v7555_v28  ;;  %v5589_v10 = vpop.eup %5588  ;;  %v4271_v54 = vadd.f32 %v4270_v1, %v4269_v34  ;;  %v4276_v29 = vsel %vm4007_vm5, %v7555_v28, 0.0  ;;  %v3689_v37 = vadd.f32 %v7214_v45, %v3688_v27  ;;  %v5390_v33 = vpop.f32.mrf.mxu1  ;;  %v502_v47 = vshll.u32 %v5659_v16, 16  ;;  %v7575_v34 = vld [vmem:[%s8352_s0 + $0xc4] sm:$0xf] }
 0x2f9   :  { %v4272_v39 = vsel %vm4007_vm5, %v7557_v3, 0.0  ;;  %v7564_v44 = vadd.f32 0.5, %v3921_v17  ;;  %v3919_v42 = vmul.f32 0.5, %v5589_v10  ;;  %5602 = vtanh.f32 %v3801_v50 }
 0x2fa   :  { %v4273_v46 = vadd.f32 %v4272_v39, %v4271_v54  ;;  %v3799_v62 = vmul.f32 0.5, %v3689_v37  ;;  %v3700_v22 = vadd.f32 %v5390_v33, %v7214_v45  ;;  %v3691_v43 = vpop.f32.mrf.mxu1  ;;  %v504_v23 = vrot.slane %v502_v47, 5 }
 0x2fb   :  { %8492 = vst [vmem:[#allocation46_spill] sm:$0xff] %v7564_v44  ;;  %v5591_v1 = vpop.eup %5590  ;;  %v4282_v14 = vsel %vm4007_vm5, %v7564_v44, 0.0  ;;  %v7569_v2 = vadd.f32 0.5, %v3919_v42  ;;  %v3692_v16 = vadd.f32 %v7214_v45, %v3691_v43  ;;  %v508_v27 = vshll.u32 %v7575_v34, 16 }
 0x2fc   :  { %v5593_v17 = vpop.eup %5592  ;;  %v4275_v50 = vadd.f32 %v4274_v9, %v4273_v46  ;;  %v3922_v10 = vmul.f32 0.5, %v5591_v1  ;;  %5604 = vtanh.f32 %v3799_v62  ;;  %v3802_v54 = vmul.f32 0.5, %v3700_v22  ;;  %v5393_v37 = vpop.f32.mrf.mxu1 }
 0x2fd   :  { %8493 = vst [vmem:[#allocation47_spill] sm:$0xff] %v7569_v2  ;;  %v4278_v33 = vsel %vm4007_vm5, %v7569_v2, 0.0  ;;  %v3920_v47 = vmul.f32 0.5, %v5593_v17  ;;  %v3800_v39 = vmul.f32 0.5, %v3692_v16  ;;  %v3713_v42 = vadd.f32 %v5393_v37, %v7214_v45 }
 0x2fe   :  { %v5595_v43 = vpop.eup %5594  ;;  %v4277_v25 = vadd.f32 %v4276_v29, %v4275_v50  ;;  %v7581_v36 = vadd.f32 0.5, %v3922_v10  ;;  %5606 = vtanh.f32 %v3802_v54  ;;  %v3704_v26 = vpop.f32.mrf.mxu1  ;;  %v505_v35 = vor.u32 %v504_v23, %v501_v60 }
 0x2ff   :  { %v7583_v57 = vadd.f32 0.5, %v3920_v47  ;;  %v3925_v9 = vmul.f32 0.5, %v5595_v43  ;;  %5608 = vtanh.f32 %v3800_v39  ;;  %v3805_v46 = vmul.f32 0.5, %v3713_v42 }
 0x300   :  { %8494 = vst [vmem:[#allocation48_spill] sm:$0xff] %v7581_v36  ;;  %v4279_v62 = vadd.f32 %v4278_v33, %v4277_v25  ;;  %v4284_v22 = vsel %vm4007_vm5, %v7581_v36, 0.0  ;;  %v3705_v1 = vadd.f32 %v7214_v45, %v3704_v26  ;;  %v5394_v16 = vpop.f32.mrf.mxu1  ;;  %v7588_v17 = vrot.slane %v505_v35, 4 }
 0x301   :  { %8495 = vst [vmem:[#allocation49_spill] sm:$0xff] %v7583_v57  ;;  %v5597_v29 = vpop.eup %5596  ;;  %v4280_v50 = vsel %vm4007_vm5, %v7583_v57, 0.0  ;;  %v7592_v10 = vadd.f32 0.5, %v3925_v9  ;;  %5610 = vtanh.f32 %v3805_v46  ;;  %v3716_v60 = vadd.f32 %v5394_v16, %v7214_v45 }
 0x302   :  { %v4281_v23 = vadd.f32 %v4280_v50, %v4279_v62  ;;  %v3923_v54 = vmul.f32 0.5, %v5597_v29  ;;  %v3803_v25 = vmul.f32 0.5, %v3705_v1  ;;  %v3707_v37 = vpop.f32.mrf.mxu1  ;;  %v7595_v33 = vrot.slane %v508_v27, 5  ;;  %v7606_v29 = vld [vmem:[%s8356_s4] ss:$0 sm:$0xff] }
 0x303   :  { %8496 = vst [vmem:[#allocation50_spill] sm:$0xff] %v7592_v10  ;;  %v5599_v47 = vpop.eup %5598  ;;  %v4290_v35 = vsel %vm4007_vm5, %v7592_v10, 0.0  ;;  %v3806_v26 = vmul.f32 0.5, %v3716_v60  ;;  %v3708_v39 = vadd.f32 %v7214_v45, %v3707_v37  ;;  %v512_v42 = vshrl.u32 %v7575_v34, 16 }
 0x304   :  { %v5601_v43 = vpop.eup %5600  ;;  %v4283_v9 = vadd.f32 %v4282_v14, %v4281_v23  ;;  %v7601_v46 = vadd.f32 0.5, %v3923_v54  ;;  %v3926_v16 = vmul.f32 0.5, %v5599_v47  ;;  %5612 = vtanh.f32 %v3803_v25  ;;  %v5397_v62 = vpop.f32.mrf.mxu1 }
 0x305   :  { %v3924_v1 = vmul.f32 0.5, %v5601_v43  ;;  %5614 = vtanh.f32 %v3806_v26  ;;  %v3804_v27 = vmul.f32 0.5, %v3708_v39  ;;  %v3729_v50 = vadd.f32 %v7606_v29, %v5397_v62 }
 0x306   :  { %8497 = vst [vmem:[#allocation51_spill] sm:$0xff] %v7601_v46  ;;  %v5603_v45 = vpop.eup %5602  ;;  %v4285_v60 = vadd.f32 %v4284_v22, %v4283_v9  ;;  %v4286_v14 = vsel %vm4007_vm5, %v7601_v46, 0.0  ;;  %v7611_v34 = vadd.f32 0.5, %v3926_v16  ;;  %v3720_v23 = vpop.f32.mrf.mxu1  ;;  %v514_v9 = vrot.slane %v512_v42, 4 }
 0x307   :  { %v7617_v25 = vadd.f32 0.5, %v3924_v1  ;;  %v3929_v37 = vmul.f32 0.5, %v5603_v45  ;;  %5616 = vtanh.f32 %v3804_v27  ;;  %v3809_v47 = vmul.f32 0.5, %v3729_v50 }
 0x308   :  { %8498 = vst [vmem:[#allocation52_spill] sm:$0xff] %v7611_v34  ;;  %v4287_v26 = vadd.f32 %v4286_v14, %v4285_v60  ;;  %v4292_v22 = vsel %vm4007_vm5, %v7611_v34, 0.0  ;;  %v3721_v39 = vadd.f32 %v7606_v29, %v3720_v23  ;;  %v5398_v43 = vpop.f32.mrf.mxu1  ;;  %v515_v14 = vor.u32 %v514_v9, %v7595_v33 }
 0x309   :  { %8499 = vst [vmem:[#allocation53_spill] sm:$0xff] %v7617_v25  ;;  %v5605_v16 = vpop.eup %5604  ;;  %v4288_v62 = vsel %vm4007_vm5, %v7617_v25, 0.0  ;;  %v7624_v32 = vadd.f32 0.5, %v3929_v37  ;;  %5618 = vtanh.f32 %v3809_v47  ;;  %v3732_v1 = vadd.f32 %v7606_v29, %v5398_v43  ;;  %v5662_v37 = vld [vmem:[%s8352_s0 + $0xc8] sm:$0x1] }
 0x30a   :  { %v4289_v45 = vadd.f32 %v4288_v62, %v4287_v26  ;;  %v3927_v27 = vmul.f32 0.5, %v5605_v16  ;;  %v3807_v50 = vmul.f32 0.5, %v3721_v39  ;;  %v3723_v60 = vpop.f32.mrf.mxu1  ;;  %v518_v47 = vshll.u32 %v5662_v37, 16 }
 0x30b   :  { %v5607_v54 = vpop.eup %5606  ;;  %v4298_v23 = vsel %vm4007_vm5, %v7624_v32, 0.0  ;;  %v3810_v42 = vmul.f32 0.5, %v3732_v1  ;;  %v3724_v0 = vadd.f32 %v7606_v29, %v3723_v60  ;;  %v516_v10 = vrot.slane %v515_v14, 4 }
 0x30c   :  { %v5609_v13 = vpop.eup %5608  ;;  %v4291_v43 = vadd.f32 %v4290_v35, %v4289_v45  ;;  %v3930_v26 = vmul.f32 0.5, %v5607_v54  ;;  %5620 = vtanh.f32 %v3807_v50  ;;  %v5401_v39 = vpop.f32.mrf.mxu1  ;;  %v7634_v16 = vadd.f32 0.5, %v3927_v27 }
 0x30d   :  { %v3928_v9 = vmul.f32 0.5, %v5609_v13  ;;  %5622 = vtanh.f32 %v3810_v42  ;;  %v3808_v62 = vmul.f32 0.5, %v3724_v0  ;;  %v3745_v48 = vadd.f32 %v7606_v29, %v5401_v39 }
 0x30e   :  { %v5611_v1 = vpop.eup %5610  ;;  %v7637_v12 = vadd.f32 0.5, %v3930_v26  ;;  %v3736_v60 = vpop.f32.mrf.mxu1  ;;  %v4293_v34 = vadd.f32 %v4292_v22, %v4291_v43  ;;  %v4294_v37 = vsel %vm4007_vm5, %v7634_v16, 0.0  ;;  %v520_v42 = vrot.slane %v518_v47, 5 }
 0x30f   :  { %v3933_v35 = vmul.f32 0.5, %v5611_v1  ;;  %5624 = vtanh.f32 %v3808_v62  ;;  %v3813_v54 = vmul.f32 0.5, %v3745_v48  ;;  %v3737_v45 = vadd.f32 %v7606_v29, %v3736_v60 }
 0x310   :  { %v4300_v13 = vsel %vm4007_vm5, %v7637_v12, 0.0  ;;  %v5402_v0 = vpop.f32.mrf.mxu1  ;;  %v7644_v27 = vadd.f32 0.5, %v3928_v9  ;;  %v4295_v50 = vadd.f32 %v4294_v37, %v4293_v34  ;;  %v521_v60 = vsel %vm7441_vm8, %v516_v10, %v520_v42  ;;  %v5663_v34 = vld [vmem:[%s8352_s0 + $0x60] sm:$0xf] }
 0x311   :  { %v5613_v26 = vpop.eup %5612  ;;  %v7646_v39 = vadd.f32 0.5, %v3933_v35  ;;  %5626 = vtanh.f32 %v3813_v54  ;;  %v3811_v22 = vmul.f32 0.5, %v3737_v45  ;;  %v3748_v14 = vadd.f32 %v7606_v29, %v5402_v0 }
 0x312   :  { %v5615_v43 = vpop.eup %5614  ;;  %v3931_v62 = vmul.f32 0.5, %v5613_v26  ;;  %v3739_v48 = vpop.f32.mrf.mxu1  ;;  %v4296_v1 = vsel %vm4007_vm5, %v7644_v27, 0.0  ;;  %v307_v47 = vshrl.u32 %v5663_v34, 16  ;;  %v8500_v10 = vsel %vm7441_vm8, %v7588_v17, %v7595_v33  ;;  %v5664_v33 = vld [vmem:[%s8352_s0 + $0x64] sm:$0xf] }
 0x313   :  { %v4306_v9 = vsel %vm4007_vm5, %v7646_v39, 0.0  ;;  %v3934_v37 = vmul.f32 0.5, %v5615_v43  ;;  %5628 = vtanh.f32 %v3811_v22  ;;  %v3814_v35 = vmul.f32 0.5, %v3748_v14 }
 0x314   :  { %v5617_v54 = vpop.eup %5616  ;;  %v7658_v45 = vadd.f32 0.5, %v3931_v62  ;;  %v3740_v0 = vadd.f32 %v7606_v29, %v3739_v48  ;;  %v4297_v26 = vadd.f32 %v4296_v1, %v4295_v50  ;;  %v4891_v42 = vcombine.low %v8500_v10, %v521_v60 }
 0x315   :  { %v7666_v25 = vadd.f32 0.5, %v3934_v37  ;;  %v3932_v46 = vmul.f32 0.5, %v5617_v54  ;;  %5630 = vtanh.f32 %v3814_v35  ;;  %v309_v36 = vrot.slane %v307_v47, 4 }
 0x316   :  { %v5619_v43 = vpop.eup %5618  ;;  %v4302_v22 = vsel %vm4007_vm5, %v7658_v45, 0.0  ;;  %v3812_v14 = vmul.f32 0.5, %v3740_v0  ;;  %v4299_v62 = vadd.f32 %v4298_v23, %v4297_v26  ;;  %5063 = vmatprep.subr.bf16.mxu0 %v4891_v42  ;;  %v310_v29 = vshll.u32 %v5663_v34, 16 }
 0x317   :  { %8501 = vst [vmem:[#allocation54_spill] sm:$0xff] %v7666_v25  ;;  %v4308_v50 = vsel %vm4007_vm5, %v7666_v25, 0.0  ;;  %v7672_v48 = vadd.f32 0.5, %v3932_v46  ;;  %v3937_v17 = vmul.f32 0.5, %v5619_v43  ;;  %v316_v1 = vshll.u32 %v5664_v33, 16 }
 0x318   :  { %5632 = vtanh.f32 %v3812_v14  ;;  %v4301_v60 = vadd.f32 %v4300_v13, %v4299_v62  ;;  %v312_v47 = vrot.slane %v310_v29, 5  ;;  %v320_v37 = vshrl.u32 %v5664_v33, 16  ;;  %v5665_v46 = vld [vmem:[%s8352_s0 + $0x18c] sm:$0xf] }
 0x319   :  { %v5621_v35 = vpop.eup %5620  ;;  %v4304_v23 = vsel %vm4007_vm5, %v7672_v48, 0.0  ;;  %v7679_v34 = vadd.f32 0.5, %v3937_v17  ;;  %v318_v54 = vrot.slane %v316_v1, 5  ;;  %v859_v0 = vshrl.u32 %v5665_v46, 16 }
 0x31a   :  { %v5623_v26 = vpop.eup %5622  ;;  %v3935_v10 = vmul.f32 0.5, %v5621_v35  ;;  %v4303_v42 = vadd.f32 %v4302_v22, %v4301_v60  ;;  %v313_v43 = vor.u32 %v312_v47, %v309_v36  ;;  %v322_v14 = vrot.slane %v320_v37, 4  ;;  %v5666_v36 = vld [vmem:[%s8352_s0 + $0x190] sm:$0xf] }
 0x31b   :  { %v4314_v13 = vsel %vm4007_vm5, %v7679_v34, 0.0  ;;  %v3938_v62 = vmul.f32 0.5, %v5623_v26  ;;  %v861_v29 = vrot.slane %v859_v0, 4  ;;  %v862_v33 = vshll.u32 %v5665_v46, 16 }
 0x31c   :  { %v5625_v44 = vpop.eup %5624  ;;  %v7686_v17 = vadd.f32 0.5, %v3935_v10  ;;  %v4305_v1 = vadd.f32 %v4304_v23, %v4303_v42  ;;  %v314_v57 = vrot.slane %v313_v43, 4  ;;  %v323_v2 = vor.u32 %v322_v14, %v318_v54 }
 0x31d   :  { %v7688_v28 = vadd.f32 0.5, %v3938_v62  ;;  %v3936_v61 = vmul.f32 0.5, %v5625_v44  ;;  %v864_v25 = vrot.slane %v862_v33, 5  ;;  %v868_v22 = vshll.u32 %v5666_v36, 16 }
 0x31e   :  { %v5627_v60 = vpop.eup %5626  ;;  %v4310_v47 = vsel %vm4007_vm5, %v7686_v17, 0.0  ;;  %v4307_v37 = vadd.f32 %v4306_v9, %v4305_v1  ;;  %v319_v35 = vsel %vm7441_vm8, %v314_v57, %v318_v54  ;;  %v324_v23 = vrot.slane %v323_v2, 4 }
 0x31f   :  { %8502 = vst [vmem:[#allocation55_spill] sm:$0xff] %v7688_v28  ;;  %v4316_v46 = vsel %vm4007_vm5, %v7688_v28, 0.0  ;;  %v7699_v0 = vadd.f32 0.5, %v3936_v61  ;;  %v3941_v44 = vmul.f32 0.5, %v5627_v60  ;;  %v865_v26 = vor.u32 %v864_v25, %v861_v29  ;;  %v5667_v25 = vld [vmem:[%s8352_s0 + $0x194] sm:$0x1] }
 0x320   :  { %v5629_v10 = vpop.eup %5628  ;;  %v4309_v42 = vadd.f32 %v4308_v50, %v4307_v37  ;;  %v329_v43 = vsel %vm7441_vm8, %v324_v23, %v7261_v4  ;;  %v870_v14 = vrot.slane %v868_v22, 5  ;;  %v872_v62 = vshrl.u32 %v5666_v36, 16  ;;  %v5668_v22 = vld [vmem:[%s8352_s0 + $0x12c] sm:$0xf] }
 0x321   :  { %v4312_v9 = vsel %vm4007_vm5, %v7699_v0, 0.0  ;;  %v7706_v57 = vadd.f32 0.5, %v3941_v44  ;;  %v3939_v2 = vmul.f32 0.5, %v5629_v10  ;;  %v4883_v54 = vcombine.low %v319_v35, %v329_v43 }
 0x322   :  { %v5631_v33 = vpop.eup %5630  ;;  %v4311_v61 = vadd.f32 %v4310_v47, %v4309_v42  ;;  %v866_v1 = vrot.slane %v865_v26, 4  ;;  %v874_v60 = vrot.slane %v872_v62, 4  ;;  %v878_v50 = vshll.u32 %v5667_v25, 16  ;;  %v5670_v25 = vld [vmem:[%s8352_s0 + $0xb4] sm:$0xf] }
 0x323   :  { %8503 = vst [vmem:[#allocation56_spill] sm:$0xff] %v7706_v57  ;;  %v4322_v4 = vsel %vm4007_vm5, %v7706_v57, 0.0  ;;  %v7713_v29 = vadd.f32 0.5, %v3939_v2  ;;  %v3942_v36 = vmul.f32 0.5, %v5631_v33  ;;  %5064 = vmatpush3.bf16.msra.mxu0 %v4883_v54  ;;  %v667_v37 = vshrl.u32 %v5668_v22, 16 }
 0x324   :  { %v4313_v47 = vadd.f32 %v4312_v9, %v4311_v61  ;;  %v871_v35 = vsel %vm7441_vm8, %v866_v1, %v870_v14  ;;  %v875_v23 = vor.u32 %v874_v60, %v870_v14  ;;  %v880_v44 = vrot.slane %v878_v50, 5  ;;  %v5669_v9 = vld [vmem:[%s8352_s0 + $0x130] sm:$0xf] }
 0x325   :  { %8504 = vst [vmem:[#allocation57_spill] sm:$0xff] %v7713_v29  ;;  %v5633_v26 = vpop.eup %5632  ;;  %v4318_v10 = vsel %vm4007_vm5, %v7713_v29, 0.0  ;;  %v7722_v42 = vadd.f32 0.5, %v3942_v36  ;;  %v669_v43 = vrot.slane %v667_v37, 4  ;;  %v670_v62 = vshll.u32 %v5668_v22, 16 }
 0x326   :  { %v3940_v2 = vmul.f32 0.5, %v5633_v26  ;;  %v4315_v54 = vadd.f32 %v4314_v13, %v4313_v47  ;;  %v876_v33 = vrot.slane %v875_v23, 4  ;;  %v676_v61 = vshll.u32 %v5669_v9, 16  ;;  %v5671_v29 = vld [vmem:[%s8352_s0 + $0xb8] sm:$0xf] }
 0x327   :  { %8505 = vst [vmem:[#allocation58_spill] sm:$0xff] %v7722_v42  ;;  %v4324_v14 = vsel %vm4007_vm5, %v7722_v42, 0.0  ;;  %v672_v1 = vrot.slane %v670_v62, 5  ;;  %v680_v60 = vshrl.u32 %v5669_v9, 16  ;;  %v475_v50 = vshrl.u32 %v5670_v25, 16 }
 0x328   :  { %v7732_v36 = vadd.f32 0.5, %v3940_v2  ;;  %v4317_v22 = vadd.f32 %v4316_v46, %v4315_v54  ;;  %v881_v13 = vsel %vm7441_vm8, %v876_v33, %v880_v44  ;;  %v678_v37 = vrot.slane %v676_v61, 5 }
 0x329   :  { %v4906_v47 = vcombine.low %v871_v35, %v881_v13  ;;  %v673_v23 = vor.u32 %v672_v1, %v669_v43  ;;  %v682_v26 = vrot.slane %v680_v60, 4  ;;  %v477_v57 = vrot.slane %v475_v50, 4  ;;  %v5672_v35 = vld [vmem:[%s8352_s0 + $0xbc] sm:$0x1] }
 0x32a   :  { %v4320_v62 = vsel %vm4007_vm5, %v7732_v36, 0.0  ;;  %v4319_v9 = vadd.f32 %v4318_v10, %v4317_v22  ;;  %v478_v42 = vshll.u32 %v5670_v25, 16  ;;  %v484_v2 = vshll.u32 %v5671_v29, 16  ;;  %v5673_v10 = vld [vmem:[%s8352_s0 + $0x54] sm:$0xf] }
 0x32b   :  { %5087 = vmatprep.subr.bf16.mxu1 %v4906_v47  ;;  %v674_v46 = vrot.slane %v673_v23, 4  ;;  %v683_v54 = vor.u32 %v682_v26, %v678_v37  ;;  %v488_v28 = vshrl.u32 %v5671_v29, 16  ;;  %v494_v44 = vshll.u32 %v5672_v35, 16 }
 0x32c   :  { %v4321_v43 = vadd.f32 %v4320_v62, %v4319_v9  ;;  %v480_v33 = vrot.slane %v478_v42, 5  ;;  %v486_v61 = vrot.slane %v484_v2, 5  ;;  %v283_v1 = vshrl.u32 %v5673_v10, 16  ;;  %v5674_v62 = vld [vmem:[%s8352_s0 + $0x58] sm:$0xf] }
 0x32d   :  { %v679_v60 = vsel %vm7441_vm8, %v674_v46, %v678_v37  ;;  %v684_v25 = vrot.slane %v683_v54, 4  ;;  %v490_v50 = vrot.slane %v488_v28, 4  ;;  %v496_v22 = vrot.slane %v494_v44, 5 }
 0x32e   :  { %v4323_v29 = vadd.f32 %v4322_v4, %v4321_v43  ;;  %v481_v13 = vor.u32 %v480_v33, %v477_v57  ;;  %v285_v47 = vrot.slane %v283_v1, 4  ;;  %v286_v23 = vshll.u32 %v5673_v10, 16 }
 0x32f   :  { %v689_v42 = vsel %vm7441_vm8, %v684_v25, %v7379_v56  ;;  %v491_v26 = vor.u32 %v490_v50, %v486_v61  ;;  %v292_v9 = vshll.u32 %v5674_v62, 16  ;;  %v296_v2 = vshrl.u32 %v5674_v62, 16  ;;  %v5675_v25 = vld [vmem:[%s8352_s0 + $0x180] sm:$0xf] }
 0x330   :  { %v4325_v35 = vadd.f32 %v4324_v14, %v4323_v29  ;;  %v4898_v37 = vcombine.low %v679_v60, %v689_v42  ;;  %v482_v46 = vrot.slane %v481_v13, 4  ;;  %v288_v28 = vrot.slane %v286_v23, 5  ;;  %v5676_v42 = vld [vmem:[%s8352_s0 + $0x184] sm:$0xf] }
 0x331   :  { %v492_v54 = vrot.slane %v491_v26, 4  ;;  %v294_v4 = vrot.slane %v292_v9, 5  ;;  %v298_v57 = vrot.slane %v296_v2, 4  ;;  %v4040_v44 = vadd.f32 %v7397_v7, %v7405_v40 }
 0x332   :  { %v4326_v43 = vrot.slane %v4325_v35, 4  ;;  %5088 = vmatpush3.bf16.msra.mxu1 %v4898_v37  ;;  %v487_v56 = vsel %vm7441_vm8, %v482_v46, %v486_v61  ;;  %v289_v33 = vor.u32 %v288_v28, %v285_v47  ;;  %v4041_v10 = vsel %vm4007_vm5, %v7403_v30, 0.0  ;;  %v5677_v46 = vld [vmem:[%s8352_s0 + $0x188] sm:$0x1] }
 0x333   :  { %v497_v14 = vsel %vm7441_vm8, %v492_v54, %v496_v22  ;;  %v299_v1 = vor.u32 %v298_v57, %v294_v4  ;;  %v4042_v60 = vadd.f32 %v4041_v10, %v4040_v44  ;;  %v835_v50 = vshrl.u32 %v5675_v25, 16 }
 0x334   :  { %v4327_v7 = vadd.f32 %v4326_v43, %v4325_v35  ;;  %v4890_v40 = vcombine.low %v487_v56, %v497_v14  ;;  %v290_v29 = vrot.slane %v289_v33, 4  ;;  %v838_v13 = vshll.u32 %v5675_v25, 16  ;;  %v5678_v33 = vld [vmem:[%s8352_s0 + $0x120] sm:$0xf] }
 0x335   :  { %v300_v23 = vrot.slane %v299_v1, 4  ;;  %v4044_v61 = vadd.f32 %v7391_v21, %v4042_v60  ;;  %v837_v47 = vrot.slane %v835_v50, 4  ;;  %v844_v22 = vshll.u32 %v5676_v42, 16  ;;  %v5679_v60 = vld [vmem:[%s8352_s0 + $0x124] sm:$0xf] }
 0x336   :  { %v4328_v26 = vrot.slane %v4327_v7, 2  ;;  %5065 = vmatprep.subr.bf16.mxu0 %v4890_v40  ;;  %v295_v62 = vsel %vm7441_vm8, %v290_v29, %v294_v4  ;;  %v840_v9 = vrot.slane %v838_v13, 5  ;;  %v848_v2 = vshrl.u32 %v5676_v42, 16 }
 0x337   :  { %v305_v35 = vsel %vm7441_vm8, %v300_v23, %v7267_v51  ;;  %v4046_v37 = vadd.f32 %v7401_v31, %v4044_v61  ;;  %v846_v21 = vrot.slane %v844_v22, 5  ;;  %v854_v28 = vshll.u32 %v5677_v46, 16 }
 0x338   :  { %v4329_v54 = vadd.f32 %v4328_v26, %v4327_v7  ;;  %v4882_v57 = vcombine.low %v295_v62, %v305_v35  ;;  %v841_v44 = vor.u32 %v840_v9, %v837_v47  ;;  %v850_v43 = vrot.slane %v848_v2, 4  ;;  %v5680_v26 = vld [vmem:[%s8352_s0 + $0xa8] sm:$0xf]  ;;  %v5681_v35 = vld [vmem:[%s8352_s0 + $0xac] sm:$0xf] }
 0x339   :  { %v4048_v4 = vadd.f32 %v7422_v6, %v4046_v37  ;;  %v856_v56 = vrot.slane %v854_v28, 5  ;;  %v643_v51 = vshrl.u32 %v5678_v33, 16  ;;  %v646_v10 = vshll.u32 %v5678_v33, 16 }
 0x33a   :  { %v4330_v31 = vrot.slane %v4329_v54, 1  ;;  %5066 = vmatpush3.bf16.msra.mxu0 %v4882_v57  ;;  %v842_v14 = vrot.slane %v841_v44, 4  ;;  %v851_v1 = vor.u32 %v850_v43, %v846_v21  ;;  %v652_v25 = vshll.u32 %v5679_v60, 16 }
 0x33b   :  { %v4050_v50 = vadd.f32 %v7447_v63, %v4048_v4  ;;  %v645_v7 = vrot.slane %v643_v51, 4  ;;  %v648_v6 = vrot.slane %v646_v10, 5  ;;  %v656_v40 = vshrl.u32 %v5679_v60, 16 }
 0x33c   :  { %v4331_v29 = vadd.f32 %v4330_v31, %v4329_v54  ;;  %v847_v13 = vsel %vm7441_vm8, %v842_v14, %v846_v21  ;;  %v852_v23 = vrot.slane %v851_v1, 4  ;;  %v654_v61 = vrot.slane %v652_v25, 5  ;;  %v5683_v31 = vld [vmem:[%s8352_s0 + $0x48] sm:$0xf] }
 0x33d   :  { %v4052_v47 = vadd.f32 %v7415_v55, %v4050_v50  ;;  %v649_v42 = vor.u32 %v648_v6, %v645_v7  ;;  %v658_v22 = vrot.slane %v656_v40, 4  ;;  %v451_v62 = vshrl.u32 %v5680_v26, 16  ;;  %v5684_v50 = vld [vmem:[%s8352_s0 + $0x4c] sm:$0xf] }
 0x33e   :  { %v4332_v9 = vadd.f32 1e-08, %v4331_v29  ;;  %v857_v63 = vsel %vm7441_vm8, %v852_v23, %v856_v56  ;;  %v454_v2 = vshll.u32 %v5680_v26, 16  ;;  %v460_v37 = vshll.u32 %v5681_v35, 16 }
 0x33f   :  { %v4054_v21 = vadd.f32 %v7432_v18, %v4052_v47  ;;  %v4905_v55 = vcombine.low %v847_v13, %v857_v63  ;;  %v650_v46 = vrot.slane %v649_v42, 4  ;;  %v659_v28 = vor.u32 %v658_v22, %v654_v61  ;;  %v5682_v18 = vld [vmem:[%s8352_s0 + $0xb0] sm:$0x1]  ;;  %v5685_v22 = vld [vmem:[%s8352_s0 + $0x174] sm:$0xf] }
 0x340   :  { %5634 = vrcp.f32 %v4332_v9  ;;  %v453_v54 = vrot.slane %v451_v62, 4  ;;  %v456_v57 = vrot.slane %v454_v2, 5  ;;  %v462_v44 = vrot.slane %v460_v37, 5 }
 0x341   :  { %v4056_v43 = vadd.f32 %v7461_v49, %v4054_v21  ;;  %5089 = vmatprep.subr.bf16.mxu1 %v4905_v55  ;;  %v655_v4 = vsel %vm7441_vm8, %v650_v46, %v654_v61  ;;  %v660_v56 = vrot.slane %v659_v28, 4  ;;  %v464_v33 = vshrl.u32 %v5681_v35, 16 }
 0x342   :  { %v457_v51 = vor.u32 %v456_v57, %v453_v54  ;;  %v470_v10 = vshll.u32 %v5682_v18, 16  ;;  %v259_v14 = vshrl.u32 %v5683_v31, 16  ;;  %v262_v1 = vshll.u32 %v5683_v31, 16 }
 0x343   :  { %v4058_v49 = vadd.f32 %v7478_v38, %v4056_v43  ;;  %v665_v60 = vsel %vm7441_vm8, %v660_v56, %v7342_v20  ;;  %v466_v25 = vrot.slane %v464_v33, 4  ;;  %v268_v7 = vshll.u32 %v5684_v50, 16 }
 0x344   :  { %v4897_v6 = vcombine.low %v655_v4, %v665_v60  ;;  %v458_v40 = vrot.slane %v457_v51, 4  ;;  %v472_v29 = vrot.slane %v470_v10, 5  ;;  %v261_v13 = vrot.slane %v259_v14, 4  ;;  %v5688_v10 = vld [vmem:[%s8352_s0 + $0x114] sm:$0xf] }
 0x345   :  { %v4060_v23 = vadd.f32 %v7452_v11, %v4058_v49  ;;  %v467_v61 = vor.u32 %v466_v25, %v462_v44  ;;  %v264_v47 = vrot.slane %v262_v1, 5  ;;  %v7816_v42 = vrot.slane %v268_v7, 5  ;;  %v5686_v11 = vld [vmem:[%s8352_s0 + $0x178] sm:$0xf] }
 0x346   :  { %5090 = vmatpush3.bf16.msra.mxu1 %v4897_v6  ;;  %v463_v20 = vsel %vm7441_vm8, %v458_v40, %v462_v44  ;;  %v272_v38 = vshrl.u32 %v5684_v50, 16  ;;  %v811_v26 = vshrl.u32 %v5685_v22, 16  ;;  %v814_v62 = vshll.u32 %v5685_v22, 16  ;;  %v7859_v6 = vld [vmem:[%s8352_s0 + $0x118] sm:$0xf] }
 0x347   :  { %v4062_v9 = vadd.f32 %v7474_v53, %v4060_v23  ;;  %v468_v63 = vrot.slane %v467_v61, 4  ;;  %v265_v2 = vor.u32 %v264_v47, %v261_v13  ;;  %v820_v35 = vshll.u32 %v5686_v11, 16 }
 0x348   :  { %v274_v37 = vrot.slane %v272_v38, 4  ;;  %v813_v21 = vrot.slane %v811_v26, 4  ;;  %v816_v55 = vrot.slane %v814_v62, 5  ;;  %v824_v46 = vshrl.u32 %v5686_v11, 16  ;;  %v8507_v11 = vld [vmem:[#allocation44_spill] sm:$0xff] }
 0x349   :  { %v4064_v28 = vadd.f32 %v7497_v24, %v4062_v9  ;;  %v473_v54 = vsel %vm7441_vm8, %v468_v63, %v472_v29  ;;  %v7830_v57 = vrot.slane %v265_v2, 4  ;;  %v7832_v44 = vrot.slane %v820_v35, 5  ;;  %v5687_v24 = vld [vmem:[%s8352_s0 + $0x17c] sm:$0x1] }
 0x34a   :  { %v4889_v53 = vcombine.low %v463_v20, %v473_v54  ;;  %v275_v43 = vor.u32 %v274_v37, %v7816_v42  ;;  %v817_v4 = vor.u32 %v816_v55, %v813_v21  ;;  %v826_v56 = vrot.slane %v824_v46, 4  ;;  %v8510_v46 = vld [vmem:[#allocation49_spill] sm:$0xff] }
 0x34b   :  { %v4066_v33 = vadd.f32 %v7516_v59, %v4064_v28  ;;  %v271_v51 = vsel %vm7441_vm8, %v7830_v57, %v7816_v42  ;;  %v830_v18 = vshll.u32 %v5687_v24, 16  ;;  %v619_v31 = vshrl.u32 %v5688_v10, 16 }
 0x34c   :  { %5067 = vmatprep.subr.bf16.mxu0 %v4889_v53  ;;  %v7846_v14 = vrot.slane %v275_v43, 4  ;;  %v7848_v1 = vrot.slane %v817_v4, 4  ;;  %v827_v59 = vor.u32 %v826_v56, %v7832_v44  ;;  %v622_v49 = vshll.u32 %v5688_v10, 16  ;;  %v8511_v53 = vld [vmem:[#allocation55_spill] sm:$0xff]  ;;  %v8512_v4 = vld [vmem:[#allocation46_spill] sm:$0xff]  ;;  %v8514_v10 = vld [vmem:[#allocation57_spill] sm:$0xff] }
 0x34d   :  { %v5635_v60 = vpop.eup %5634  ;;  %v4068_v25 = vadd.f32 %v7493_v8, %v4066_v33  ;;  %v7852_v50 = vrot.slane %v830_v18, 5  ;;  %v7854_v7 = vrot.slane %v619_v31, 4  ;;  %v628_v40 = vshll.u32 %v7859_v6, 16  ;;  %v8513_v33 = vld [vmem:[#allocation48_spill] sm:$0xff] }
 0x34e   :  { %v4350_v29 = vmul.f32 %v5635_v60, %v7634_v16  ;;  %v4351_v13 = vmul.f32 %v5635_v60, %v7644_v27  ;;  %v4334_v23 = vmul.f32 %v5635_v60, %v7521_v52  ;;  %v4335_v61 = vmul.f32 %v5635_v60, %v7531_v41 }
 0x34f   :  { %v4352_v8 = vmul.f32 %v5635_v60, %v7624_v32  ;;  %v4353_v47 = vmul.f32 %v5635_v60, %v7637_v12  ;;  %v4336_v20 = vmul.f32 %v5635_v60, %v7512_v5  ;;  %v4337_v38 = vmul.f32 %v5635_v60, %v7527_v19  ;;  %v8506_v5 = vld [vmem:[#allocation54_spill] sm:$0xff] }
 0x350   :  { %v4374_v22 = vpack.c.bf16 %v4351_v13, %v4350_v29  ;;  %v4366_v26 = vpack.c.bf16 %v4335_v61, %v4334_v23  ;;  %v4354_v62 = vmul.f32 %v5635_v60, %v7658_v45  ;;  %v4355_v16 = vmul.f32 %v5635_v60, %v7672_v48  ;;  %v8508_v45 = vld [vmem:[#allocation45_spill] sm:$0xff]  ;;  %v8515_v29 = vld [vmem:[#allocation51_spill] sm:$0xff] }
 0x351   :  { %v4375_v9 = vpack.c.bf16 %v4353_v47, %v4352_v8  ;;  %v4367_v27 = vpack.c.bf16 %v4337_v38, %v4336_v20  ;;  %v4338_v52 = vmul.f32 %v5635_v60, %v7549_v15  ;;  %v4339_v41 = vmul.f32 %v5635_v60, %v7557_v3  ;;  %v8509_v3 = vld [vmem:[#allocation47_spill] sm:$0xff]  ;;  %v8516_v61 = vld [vmem:[#allocation53_spill] sm:$0xff]  ;;  %v8517_v47 = vld [vmem:[#allocation56_spill] sm:$0xff] }
 0x352   :  { %4398 = vxpose.xlu0.c.b16.start [1/8] (narrow) %v4374_v22, 16  ;;  %4382 = vxpose.xlu1.c.b16.start [1/8] (narrow) %v4366_v26, 16  ;;  %v4376_v32 = vpack.c.bf16 %v4355_v16, %v4354_v62  ;;  %v4356_v12 = vmul.f32 %v5635_v60, %v7646_v39  ;;  %v4357_v63 = vmul.f32 %v5635_v60, %v8506_v5  ;;  %v828_v19 = vrot.slane %v827_v59, 4  ;;  %v8518_v20 = vld [vmem:[#allocation58_spill] sm:$0xff]  ;;  %v8520_v62 = vld [vmem:[#allocation52_spill] sm:$0xff] }
 0x353   :  { %v4368_v2 = vpack.c.bf16 %v4339_v41, %v4338_v52  ;;  %v4340_v35 = vmul.f32 %v5635_v60, %v8507_v11  ;;  %v4341_v37 = vmul.f32 %v5635_v60, %v8508_v45  ;;  %v7879_v48 = vmul.f32 %v5635_v60, %v7686_v17 }
 0x354   :  { %v4377_v21 = vpack.c.bf16 %v4357_v63, %v4356_v12  ;;  %v7882_v15 = vmul.f32 %v5635_v60, %v7699_v0  ;;  %v7885_v55 = vmul.f32 %v5635_v60, %v8509_v3  ;;  %v7888_v39 = vmul.f32 %v5635_v60, %v8510_v46  ;;  %v8522_v12 = vld [vmem:[#allocation5_spill] sm:$0xff]  ;;  %v5692_v3 = vld [vmem:[%s8352_s0 + $0xa4] sm:$0x1] }
 0x355   :  { %v4369_v28 = vpack.c.bf16 %v4341_v37, %v4340_v35  ;;  %v7891_v54 = vmul.f32 %v5635_v60, %v7679_v34  ;;  %v7894_v43 = vmul.f32 %v5635_v60, %v8511_v53  ;;  %v7897_v17 = vmul.f32 %v5635_v60, %v8512_v4  ;;  %v5690_v35 = vld [vmem:[%s8352_s0 + $0x9c] sm:$0xf] }
 0x356   :  { %4399 = vxpose.xlu0.c.b16.cont [2/8] (narrow) %v4375_v9, 16  ;;  %4383 = vxpose.xlu1.c.b16.cont [2/8] (narrow) %v4367_v27, 16  ;;  %v4378_v0 = vpack.c.bf16 %v7882_v15, %v7879_v48  ;;  %v4370_v56 = vpack.c.bf16 %v7888_v39, %v7885_v55  ;;  %v7904_v24 = vmul.f32 %v5635_v60, %v8513_v33  ;;  %v624_v18 = vrot.slane %v622_v49, 5  ;;  %v8521_v9 = vld [vmem:[#allocation42_spill] sm:$0xff] }
 0x357   :  { %v4379_v34 = vpack.c.bf16 %v7894_v43, %v7891_v54  ;;  %v7909_v31 = vmul.f32 %v5635_v60, %v8514_v10  ;;  %v7912_v59 = vmul.f32 %v5635_v60, %v7732_v36  ;;  %v7915_v13 = vmul.f32 %v5635_v60, %v8515_v29  ;;  %v8519_v36 = vld [vmem:[#allocation50_spill] sm:$0xff] }
 0x358   :  { %v4371_v23 = vpack.c.bf16 %v7904_v24, %v7897_v17  ;;  %v7920_v8 = vmul.f32 %v5635_v60, %v8516_v61  ;;  %v7923_v49 = vmul.f32 %v5635_v60, %v8517_v47  ;;  %v7926_v38 = vmul.f32 %v5635_v60, %v8518_v20  ;;  %v5694_v20 = vld [vmem:[%s8352_s0 + $0x40] sm:$0xf]  ;;  %v5697_v17 = vld [vmem:[%s8352_s0 + $0x170] sm:$0x1] }
 0x359   :  { %v4380_v22 = vpack.c.bf16 %v7912_v59, %v7909_v31  ;;  %v7931_v26 = vmul.f32 %v5635_v60, %v8519_v36  ;;  %v7934_v16 = vmul.f32 %v5635_v60, %v8520_v62  ;;  %v4070_v27 = vadd.f32 %v8521_v9, %v4068_v25 }
 0x35a   :  { %4400 = vxpose.xlu0.c.b16.cont [3/8] (narrow) %v4376_v32, 16  ;;  %4384 = vxpose.xlu1.c.b16.cont [3/8] (narrow) %v4368_v2, 16  ;;  %v4372_v52 = vpack.c.bf16 %v7920_v8, %v7915_v13  ;;  %v4381_v41 = vpack.c.bf16 %v7926_v38, %v7923_v49  ;;  %v281_v5 = vsel %vm7441_vm8, %v7846_v14, %v8522_v12  ;;  %v630_v63 = vrot.slane %v628_v40, 5  ;;  %v5700_v13 = vld [vmem:[%s8352_s0 + $0x90] sm:$0xf] }
 0x35b   :  { %v4373_v60 = vpack.c.bf16 %v7934_v16, %v7931_v26  ;;  %v4071_v11 = vrot.slane %v4070_v27, 4  ;;  %v4881_v25 = vcombine.low %v271_v51, %v281_v5  ;;  %v823_v32 = vsel %vm7441_vm8, %v7848_v1, %v7832_v44  ;;  %v5691_v44 = vld [vmem:[%s8352_s0 + $0xa0] sm:$0xf]  ;;  %v5702_v16 = vld [vmem:[%s8352_s0 + $0x98] sm:$0x1] }
 0x35c   :  { %v833_v14 = vsel %vm7441_vm8, %v828_v19, %v7852_v50  ;;  %v625_v40 = vor.u32 %v624_v18, %v7854_v7  ;;  %v632_v2 = vshrl.u32 %v7859_v6, 16  ;;  %v427_v45 = vshrl.u32 %v5690_v35, 16  ;;  %v8523_v5 = vld [vmem:[#allocation22_spill] sm:$0xff] }
 0x35d   :  { %v4072_v42 = vadd.f32 %v4071_v11, %v4070_v27  ;;  %5068 = vmatpush3.bf16.msra.mxu0 %v4881_v25  ;;  %v4904_v57 = vcombine.low %v823_v32, %v833_v14  ;;  %v430_v51 = vshll.u32 %v5690_v35, 16  ;;  %v436_v1 = vshll.u32 %v5691_v44, 16 }
 0x35e   :  { %4401 = vxpose.xlu0.c.b16.cont [4/8] (narrow) %v4377_v21, 16  ;;  %4385 = vxpose.xlu1.c.b16.cont [4/8] (narrow) %v4369_v28, 16  ;;  %v626_v50 = vrot.slane %v625_v40, 4  ;;  %v634_v7 = vrot.slane %v632_v2, 4  ;;  %v429_v19 = vrot.slane %v427_v45, 4  ;;  %v440_v6 = vshrl.u32 %v5691_v44, 16 }
 0x35f   :  { %v4073_v37 = vrot.slane %v4072_v42, 2  ;;  %5091 = vmatprep.subr.bf16.mxu1 %v4904_v57  ;;  %v432_v48 = vrot.slane %v430_v51, 5  ;;  %v438_v15 = vrot.slane %v436_v1, 5  ;;  %v446_v55 = vshll.u32 %v5692_v3, 16  ;;  %v5693_v21 = vld [vmem:[%s8352_s0 + $0x3c] sm:$0xf] }
 0x360   :  { %v631_v46 = vsel %vm7441_vm8, %v626_v50, %v630_v63  ;;  %v635_v39 = vor.u32 %v634_v7, %v630_v63  ;;  %v442_v53 = vrot.slane %v440_v6, 4  ;;  %v235_v28 = vshrl.u32 %v5693_v21, 16  ;;  %v5696_v50 = vld [vmem:[%s8352_s0 + $0x16c] sm:$0xf]  ;;  %v5698_v6 = vld [vmem:[%s8352_s0 + $0x108] sm:$0xf] }
 0x361   :  { %v4074_v4 = vadd.f32 %v4073_v37, %v4072_v42  ;;  %v433_v33 = vor.u32 %v432_v48, %v429_v19  ;;  %v448_v18 = vrot.slane %v446_v55, 5  ;;  %v238_v10 = vshll.u32 %v5693_v21, 16 }
 0x362   :  { %4402 = vxpose.xlu0.c.b16.cont [5/8] (narrow) %v4378_v0, 16  ;;  %4386 = vxpose.xlu1.c.b16.cont [5/8] (narrow) %v4370_v56, 16  ;;  %v636_v29 = vrot.slane %v635_v39, 4  ;;  %v443_v61 = vor.u32 %v442_v53, %v438_v15  ;;  %v237_v47 = vrot.slane %v235_v28, 4  ;;  %v244_v36 = vshll.u32 %v5694_v20, 16 }
 0x363   :  { %v4075_v62 = vrot.slane %v4074_v4, 1  ;;  %v434_v9 = vrot.slane %v433_v33, 4  ;;  %v240_v27 = vrot.slane %v238_v10, 5  ;;  %v248_v12 = vshrl.u32 %v5694_v20, 16  ;;  %v5695_v0 = vld [vmem:[%s8352_s0 + $0x168] sm:$0xf] }
 0x364   :  { %v641_v63 = vsel %vm7441_vm8, %v636_v29, %v8523_v5  ;;  %v444_v11 = vrot.slane %v443_v61, 4  ;;  %v246_v25 = vrot.slane %v244_v36, 5  ;;  %v787_v56 = vshrl.u32 %v5695_v0, 16  ;;  %v5699_v53 = vld [vmem:[%s8352_s0 + $0x10c] sm:$0xf] }
 0x365   :  { %v4076_v32 = vadd.f32 %v4075_v62, %v4074_v4  ;;  %v4896_v14 = vcombine.low %v631_v46, %v641_v63  ;;  %v439_v40 = vsel %vm7441_vm8, %v434_v9, %v438_v15  ;;  %v241_v2 = vor.u32 %v240_v27, %v237_v47  ;;  %v8524_v4 = vld [vmem:[#allocation6_spill] sm:$0xff]  ;;  %v5701_v9 = vld [vmem:[%s8352_s0 + $0x94] sm:$0xf] }
 0x366   :  { %4403 = vxpose.xlu0.c.b16.cont [6/8] (narrow) %v4379_v34, 16  ;;  %4387 = vxpose.xlu1.c.b16.cont [6/8] (narrow) %v4371_v23, 16  ;;  %v449_v35 = vsel %vm7441_vm8, %v444_v11, %v448_v18  ;;  %v250_v45 = vrot.slane %v248_v12, 4  ;;  %v789_v42 = vrot.slane %v787_v56, 4  ;;  %v790_v57 = vshll.u32 %v5695_v0, 16 }
 0x367   :  { %v4077_v51 = vadd.f32 1e-08, %v4076_v32  ;;  %5092 = vmatpush3.bf16.msra.mxu1 %v4896_v14  ;;  %v4888_v44 = vcombine.low %v439_v40, %v449_v35  ;;  %v242_v1 = vrot.slane %v241_v2, 4  ;;  %v796_v54 = vshll.u32 %v5696_v50, 16  ;;  %v8525_v2 = vld [vmem:[#allocation14_spill] sm:$0xff] }
 0x368   :  { %v251_v43 = vor.u32 %v250_v45, %v246_v25  ;;  %v792_v34 = vrot.slane %v790_v57, 5  ;;  %v800_v7 = vshrl.u32 %v5696_v50, 16  ;;  %v806_v24 = vshll.u32 %v5697_v17, 16 }
 0x369   :  { %5636 = vrcp.f32 %v4077_v51  ;;  %5069 = vmatprep.subr.bf16.mxu0 %v4888_v44  ;;  %v247_v23 = vsel %vm7441_vm8, %v242_v1, %v246_v25  ;;  %v798_v19 = vrot.slane %v796_v54, 5  ;;  %v595_v37 = vshrl.u32 %v5698_v6, 16 }
 0x36a   :  { %4404 = vxpose.xlu0.c.b16.cont [7/8] (narrow) %v4380_v22, 16  ;;  %4388 = vxpose.xlu1.c.b16.cont [7/8] (narrow) %v4372_v52, 16  ;;  %v252_v48 = vrot.slane %v251_v43, 4  ;;  %v793_v15 = vor.u32 %v792_v34, %v789_v42  ;;  %v802_v3 = vrot.slane %v800_v7, 4  ;;  %v808_v55 = vrot.slane %v806_v24, 5 }
 0x36b   :  { %v597_v46 = vrot.slane %v595_v37, 4  ;;  %v598_v39 = vshll.u32 %v5698_v6, 16  ;;  %v604_v21 = vshll.u32 %v5699_v53, 16  ;;  %v608_v28 = vshrl.u32 %v5699_v53, 16  ;;  %v5704_v42 = vld [vmem:[%s8352_s0 + $0x34] sm:$0xf] }
 0x36c   :  { %v257_v31 = vsel %vm7441_vm8, %v252_v48, %v8524_v4  ;;  %v794_v59 = vrot.slane %v793_v15, 4  ;;  %v803_v22 = vor.u32 %v802_v3, %v798_v19  ;;  %v403_v8 = vshrl.u32 %v5700_v13, 16  ;;  %v5705_v34 = vld [vmem:[%s8352_s0 + $0x15c] sm:$0xf]  ;;  %v8072_v37 = vld [vmem:[%s8352_s0 + $0x160] sm:$0xf] }
 0x36d   :  { %v4880_v52 = vcombine.low %v247_v23, %v257_v31  ;;  %v600_v33 = vrot.slane %v598_v39, 5  ;;  %v606_v18 = vrot.slane %v604_v21, 5  ;;  %v610_v10 = vrot.slane %v608_v28, 4  ;;  %v8526_v15 = vld [vmem:[#allocation29_spill] sm:$0xff]  ;;  %v8528_v53 = vld [vmem:[#allocation10_spill] sm:$0xff]  ;;  %v8529_v28 = vld [vmem:[#allocation28_spill] sm:$0xff] }
 0x36e   :  { %4405 = vxpose.xlu0.c.b16.end [8/8] (narrow) %v4381_v41, 16  ;;  %4389 = vxpose.xlu1.c.b16.end [8/8] (narrow) %v4373_v60, 16  ;;  %v799_v29 = vsel %vm7441_vm8, %v794_v59, %v798_v19  ;;  %v804_v61 = vrot.slane %v803_v22, 4  ;;  %v405_v47 = vrot.slane %v403_v8, 4  ;;  %v406_v20 = vshll.u32 %v5700_v13, 16  ;;  %v8530_v31 = vld [vmem:[#allocation30_spill] sm:$0xff] }
 0x36f   :  { %5070 = vmatpush3.bf16.msra.mxu0 %v4880_v52  ;;  %v601_v36 = vor.u32 %v600_v33, %v597_v46  ;;  %v611_v62 = vor.u32 %v610_v10, %v606_v18  ;;  %v412_v27 = vshll.u32 %v5701_v9, 16  ;;  %v416_v49 = vshrl.u32 %v5701_v9, 16  ;;  %v5703_v60 = vld [vmem:[%s8352_s0 + $0x30] sm:$0xf]  ;;  %v8527_v46 = vld [vmem:[#allocation7_spill] sm:$0xff] }
 0x370   :  { %v809_v38 = vsel %vm7441_vm8, %v804_v61, %v808_v55  ;;  %v408_v26 = vrot.slane %v406_v20, 5  ;;  %v422_v41 = vshll.u32 %v5702_v16, 16  ;;  %v211_v12 = vshrl.u32 %v5703_v60, 16  ;;  %v8531_v22 = vld [vmem:[#allocation8_spill] sm:$0xff]  ;;  %v8532_v8 = vld [vmem:[#allocation11_spill] sm:$0xff]  ;;  %v8534_v61 = vld [vmem:[#allocation34_spill] sm:$0xff] }
 0x371   :  { %v4903_v5 = vcombine.low %v799_v29, %v809_v38  ;;  %v602_v63 = vrot.slane %v601_v36, 4  ;;  %v612_v11 = vrot.slane %v611_v62, 4  ;;  %v8039_v25 = vrot.slane %v412_v27, 5  ;;  %v8533_v10 = vld [vmem:[#allocation32_spill] sm:$0xff]  ;;  %v8537_v38 = vld [vmem:[#allocation31_spill] sm:$0xff]  ;;  %v8538_v16 = vld [vmem:[#allocation33_spill] sm:$0xff] }
 0x372   :  { %v409_v0 = vor.u32 %v408_v26, %v405_v47  ;;  %v418_v56 = vrot.slane %v416_v49, 4  ;;  %v8041_v32 = vrot.slane %v422_v41, 5  ;;  %v8043_v14 = vrot.slane %v211_v12, 4  ;;  %v8535_v36 = vld [vmem:[#allocation12_spill] sm:$0xff] }
 0x373   :  { %5093 = vmatprep.subr.bf16.mxu1 %v4903_v5  ;;  %v607_v40 = vsel %vm7441_vm8, %v602_v63, %v606_v18  ;;  %v617_v35 = vsel %vm7441_vm8, %v612_v11, %v8525_v2  ;;  %v214_v45 = vshll.u32 %v5703_v60, 16  ;;  %v220_v57 = vshll.u32 %v5704_v42, 16  ;;  %v8536_v9 = vld [vmem:[#allocation16_spill] sm:$0xff]  ;;  %v8539_v5 = vld [vmem:[#allocation15_spill] sm:$0xff]  ;;  %v8540_v11 = vld [vmem:[#allocation17_spill] sm:$0xff] }
 0x374   :  { %v4895_v51 = vcombine.low %v607_v40, %v617_v35  ;;  %v8053_v44 = vrot.slane %v409_v0, 4  ;;  %v419_v1 = vor.u32 %v418_v56, %v8039_v25  ;;  %v224_v50 = vshrl.u32 %v5704_v42, 16  ;;  %v8541_v0 = vld [vmem:[#allocation36_spill] sm:$0xff]  ;;  %v8542_v2 = vld [vmem:[#allocation38_spill] sm:$0xff] }
 0x375   :  { %v8056_v54 = vrot.slane %v214_v45, 5  ;;  %v8058_v43 = vrot.slane %v220_v57, 5  ;;  %v763_v7 = vshrl.u32 %v5705_v34, 16  ;;  %v766_v17 = vshll.u32 %v5705_v34, 16  ;;  %v8543_v45 = vld [vmem:[#allocation18_spill] sm:$0xff]  ;;  %v8544_v57 = vld [vmem:[#allocation21_spill] sm:$0xff] }
 0x376   :  { %v5637_v24 = vpop.eup %5636  ;;  %5094 = vmatpush3.bf16.msra.mxu1 %v4895_v51  ;;  %v415_v23 = vsel %vm7441_vm8, %v8053_v44, %v8039_v25  ;;  %v420_v19 = vrot.slane %v419_v1, 4  ;;  %v8067_v6 = vrot.slane %v224_v50, 4  ;;  %v772_v48 = vshll.u32 %v8072_v37, 16  ;;  %v8545_v1 = vld [vmem:[#allocation35_spill] sm:$0xff]  ;;  %v8546_v34 = vld [vmem:[#allocation37_spill] sm:$0xff] }
 0x377   :  { %v4095_v3 = vmul.f32 %v5637_v24, %v8526_v15  ;;  %v4096_v55 = vmul.f32 %v5637_v24, %v7403_v30  ;;  %v4079_v39 = vmul.f32 %v5637_v24, %v8527_v46  ;;  %v4080_v21 = vmul.f32 %v5637_v24, %v8528_v53  ;;  %v8547_v15 = vld [vmem:[#allocation20_spill] sm:$0xff] }
 0x378   :  { %v4097_v4 = vmul.f32 %v5637_v24, %v8529_v28  ;;  %v4098_v59 = vmul.f32 %v5637_v24, %v8530_v31  ;;  %v4081_v13 = vmul.f32 %v5637_v24, %v8531_v22  ;;  %v4082_v52 = vmul.f32 %v5637_v24, %v8532_v8 }
 0x379   :  { %v4119_v33 = vpack.c.bf16 %v4096_v55, %v4095_v3  ;;  %v4111_v18 = vpack.c.bf16 %v4080_v21, %v4079_v39  ;;  %v4099_v29 = vmul.f32 %v5637_v24, %v8533_v10  ;;  %v4100_v47 = vmul.f32 %v5637_v24, %v8534_v61  ;;  %v8548_v39 = vld [vmem:[#allocation23_spill] sm:$0xff] }
 0x37a   :  { %v4120_v20 = vpack.c.bf16 %v4098_v59, %v4097_v4  ;;  %v4112_v30 = vpack.c.bf16 %v4082_v52, %v4081_v13  ;;  %v4083_v62 = vmul.f32 %v5637_v24, %v8535_v36  ;;  %v4084_v27 = vmul.f32 %v5637_v24, %v8536_v9  ;;  %v8549_v4 = vld [vmem:[#allocation40_spill] sm:$0xff]  ;;  %v8550_v59 = vld [vmem:[#allocation43_spill] sm:$0xff] }
 0x37b   :  { %4143 = vxpose.xlu0.c.b16.start [1/8] (narrow) %v4119_v33, 16  ;;  %4127 = vxpose.xlu1.c.b16.start [1/8] (narrow) %v4111_v18, 16  ;;  %v4121_v49 = vpack.c.bf16 %v4100_v47, %v4099_v29  ;;  %v4101_v26 = vmul.f32 %v5637_v24, %v8537_v38  ;;  %v4102_v41 = vmul.f32 %v5637_v24, %v8538_v16  ;;  %v765_v60 = vrot.slane %v763_v7, 4  ;;  %v8551_v13 = vld [vmem:[#allocation24_spill] sm:$0xff]  ;;  %v8552_v33 = vld [vmem:[#allocation25_spill] sm:$0xff]  ;;  %v8553_v10 = vld [vmem:[#allocation39_spill] sm:$0xff] }
 0x37c   :  { %v4113_v12 = vpack.c.bf16 %v4084_v27, %v4083_v62  ;;  %v4085_v63 = vmul.f32 %v5637_v24, %v8539_v5  ;;  %v4086_v25 = vmul.f32 %v5637_v24, %v8540_v11  ;;  %v8092_v56 = vmul.f32 %v5637_v24, %v8541_v0  ;;  %v8554_v29 = vld [vmem:[#allocation41_spill] sm:$0xff]  ;;  %v8556_v36 = vld [vmem:[#allocation27_spill] sm:$0xff] }
 0x37d   :  { %v4122_v40 = vpack.c.bf16 %v4102_v41, %v4101_v26  ;;  %v8095_v35 = vmul.f32 %v5637_v24, %v8542_v2  ;;  %v8098_v42 = vmul.f32 %v5637_v24, %v8543_v45  ;;  %v8101_v51 = vmul.f32 %v5637_v24, %v8544_v57 }
 0x37e   :  { %v4114_v44 = vpack.c.bf16 %v4086_v25, %v4085_v63  ;;  %v8104_v50 = vmul.f32 %v5637_v24, %v8545_v1  ;;  %v8107_v7 = vmul.f32 %v5637_v24, %v8546_v34  ;;  %v8110_v3 = vmul.f32 %v5637_v24, %v8547_v15  ;;  %v5710_v34 = vld [vmem:[%s8352_s0 + $0x84] sm:$0xf] }
 0x37f   :  { %4144 = vxpose.xlu0.c.b16.cont [2/8] (narrow) %v4120_v20, 16  ;;  %4128 = vxpose.xlu1.c.b16.cont [2/8] (narrow) %v4112_v30, 16  ;;  %v4123_v55 = vpack.c.bf16 %v8095_v35, %v8092_v56  ;;  %v4115_v46 = vpack.c.bf16 %v8101_v51, %v8098_v42  ;;  %v8117_v53 = vmul.f32 %v5637_v24, %v8548_v39  ;;  %v768_v21 = vrot.slane %v766_v17, 5  ;;  %v8555_v20 = vld [vmem:[#allocation26_spill] sm:$0xff]  ;;  %v8557_v35 = vld [vmem:[#allocation3_spill] sm:$0xff] }
 0x380   :  { %v4124_v28 = vpack.c.bf16 %v8107_v7, %v8104_v50  ;;  %v8122_v31 = vmul.f32 %v5637_v24, %v8549_v4  ;;  %v8125_v22 = vmul.f32 %v5637_v24, %v8550_v59  ;;  %v8128_v8 = vmul.f32 %v5637_v24, %v8551_v13  ;;  %v5715_v50 = vld [vmem:[%s8352_s0 + $0x150] sm:$0xf] }
 0x381   :  { %v4116_v52 = vpack.c.bf16 %v8117_v53, %v8110_v3  ;;  %v8133_v18 = vmul.f32 %v5637_v24, %v8552_v33  ;;  %v8136_v17 = vmul.f32 %v5637_v24, %v8553_v10  ;;  %v8139_v61 = vmul.f32 %v5637_v24, %v8554_v29  ;;  %v5712_v10 = vld [vmem:[%s8352_s0 + $0x8c] sm:$0x1] }
 0x382   :  { %v4125_v47 = vpack.c.bf16 %v8125_v22, %v8122_v31  ;;  %v8144_v30 = vmul.f32 %v5637_v24, %v8555_v20  ;;  %v8147_v62 = vmul.f32 %v5637_v24, %v8556_v36  ;;  %v425_v9 = vsel %vm7441_vm8, %v420_v19, %v8041_v32  ;;  %v5717_v31 = vld [vmem:[%s8352_s0 + $0x158] sm:$0x1] }
 0x383   :  { %4145 = vxpose.xlu0.c.b16.cont [3/8] (narrow) %v4121_v49, 16  ;;  %4129 = vxpose.xlu1.c.b16.cont [3/8] (narrow) %v4113_v12, 16  ;;  %v4117_v27 = vpack.c.bf16 %v8133_v18, %v8128_v8  ;;  %v4126_v38 = vpack.c.bf16 %v8139_v61, %v8136_v17  ;;  %v4887_v26 = vcombine.low %v415_v23, %v425_v9  ;;  %v774_v16 = vrot.slane %v772_v48, 5  ;;  %v5707_v49 = vld [vmem:[%s8352_s0 + $0x164] sm:$0x1] }
 0x384   :  { %v4118_v41 = vpack.c.bf16 %v8147_v62, %v8144_v30  ;;  %v217_v24 = vor.u32 %v8056_v54, %v8043_v14  ;;  %v227_v5 = vor.u32 %v8067_v6, %v8058_v43  ;;  %v769_v32 = vor.u32 %v768_v21, %v765_v60  ;;  %v5708_v23 = vld [vmem:[%s8352_s0 + $0xfc] sm:$0xf]  ;;  %v5709_v6 = vld [vmem:[%s8352_s0 + $0x100] sm:$0xf]  ;;  %v5718_v8 = vld [vmem:[%s8352_s0 + $0xf0] sm:$0xf] }
 0x385   :  { %5071 = vmatprep.subr.bf16.mxu0 %v4887_v26  ;;  %v776_v19 = vshrl.u32 %v8072_v37, 16  ;;  %v782_v12 = vshll.u32 %v5707_v49, 16  ;;  %v571_v48 = vshrl.u32 %v5708_v23, 16  ;;  %v574_v63 = vshll.u32 %v5708_v23, 16  ;;  %v5713_v49 = vld [vmem:[%s8352_s0 + $0x24] sm:$0xf] }
 0x386   :  { %v218_v11 = vrot.slane %v217_v24, 4  ;;  %v228_v14 = vrot.slane %v227_v5, 4  ;;  %v770_v54 = vrot.slane %v769_v32, 4  ;;  %v580_v60 = vshll.u32 %v5709_v6, 16  ;;  %v5719_v17 = vld [vmem:[%s8352_s0 + $0xf4] sm:$0xf] }
 0x387   :  { %4146 = vxpose.xlu0.c.b16.cont [4/8] (narrow) %v4122_v40, 16  ;;  %4130 = vxpose.xlu1.c.b16.cont [4/8] (narrow) %v4114_v44, 16  ;;  %v778_v37 = vrot.slane %v776_v19, 4  ;;  %v784_v25 = vrot.slane %v782_v12, 5  ;;  %v573_v0 = vrot.slane %v571_v48, 4  ;;  %v576_v56 = vrot.slane %v574_v63, 5 }
 0x388   :  { %v223_v2 = vsel %vm7441_vm8, %v218_v11, %v8058_v43  ;;  %v233_v45 = vsel %vm7441_vm8, %v228_v14, %v8557_v35  ;;  %v775_v42 = vsel %vm7441_vm8, %v770_v54, %v774_v16  ;;  %v582_v57 = vrot.slane %v580_v60, 5  ;;  %v5711_v43 = vld [vmem:[%s8352_s0 + $0x88] sm:$0xf]  ;;  %v5720_v62 = vld [vmem:[%s8352_s0 + $0x78] sm:$0xf] }
 0x389   :  { %v4879_v51 = vcombine.low %v223_v2, %v233_v45  ;;  %v779_v1 = vor.u32 %v778_v37, %v774_v16  ;;  %v577_v40 = vor.u32 %v576_v56, %v573_v0  ;;  %v584_v44 = vshrl.u32 %v5709_v6, 16  ;;  %v5714_v63 = vld [vmem:[%s8352_s0 + $0x28] sm:$0xf] }
 0x38a   :  { %v379_v15 = vshrl.u32 %v5710_v34, 16  ;;  %v382_v39 = vshll.u32 %v5710_v34, 16  ;;  %v388_v21 = vshll.u32 %v5711_v43, 16  ;;  %v392_v4 = vshrl.u32 %v5711_v43, 16 }
 0x38b   :  { %4147 = vxpose.xlu0.c.b16.cont [5/8] (narrow) %v4123_v55, 16  ;;  %4131 = vxpose.xlu1.c.b16.cont [5/8] (narrow) %v4115_v46, 16  ;;  %v780_v59 = vrot.slane %v779_v1, 4  ;;  %v578_v13 = vrot.slane %v577_v40, 4  ;;  %v586_v33 = vrot.slane %v584_v44, 4  ;;  %v398_v29 = vshll.u32 %v5712_v10, 16 }
 0x38c   :  { %5072 = vmatpush3.bf16.msra.mxu0 %v4879_v51  ;;  %v381_v20 = vrot.slane %v379_v15, 4  ;;  %v384_v36 = vrot.slane %v382_v39, 5  ;;  %v390_v9 = vrot.slane %v388_v21, 5  ;;  %v394_v26 = vrot.slane %v392_v4, 4  ;;  %v5716_v51 = vld [vmem:[%s8352_s0 + $0x154] sm:$0xf] }
 0x38d   :  { %v785_v16 = vsel %vm7441_vm8, %v780_v59, %v784_v25  ;;  %v583_v55 = vsel %vm7441_vm8, %v578_v13, %v582_v57  ;;  %v587_v46 = vor.u32 %v586_v33, %v582_v57  ;;  %v400_v24 = vrot.slane %v398_v29, 5  ;;  %v8559_v59 = vld [vmem:[#allocation4_spill] sm:$0xff] }
 0x38e   :  { %v4902_v5 = vcombine.low %v775_v42, %v785_v16  ;;  %v385_v32 = vor.u32 %v384_v36, %v381_v20  ;;  %v395_v19 = vor.u32 %v394_v26, %v390_v9  ;;  %v187_v12 = vshrl.u32 %v5713_v49, 16 }
 0x38f   :  { %4148 = vxpose.xlu0.c.b16.cont [6/8] (narrow) %v4124_v28, 16  ;;  %4132 = vxpose.xlu1.c.b16.cont [6/8] (narrow) %v4116_v52, 16  ;;  %v588_v23 = vrot.slane %v587_v46, 4  ;;  %v190_v48 = vshll.u32 %v5713_v49, 16  ;;  %v196_v11 = vshll.u32 %v5714_v63, 16  ;;  %v200_v14 = vshrl.u32 %v5714_v63, 16 }
 0x390   :  { %5095 = vmatprep.subr.bf16.mxu1 %v4902_v5  ;;  %v386_v54 = vrot.slane %v385_v32, 4  ;;  %v396_v6 = vrot.slane %v395_v19, 4  ;;  %v189_v60 = vrot.slane %v187_v12, 4  ;;  %v739_v7 = vshrl.u32 %v5715_v50, 16  ;;  %v8558_v28 = vld [vmem:[#allocation19_spill] sm:$0xff] }
 0x391   :  { %v593_v3 = vsel %vm7441_vm8, %v588_v23, %v8558_v28  ;;  %v192_v53 = vrot.slane %v190_v48, 5  ;;  %v198_v52 = vrot.slane %v196_v11, 5  ;;  %v202_v37 = vrot.slane %v200_v14, 4  ;;  %v5721_v46 = vld [vmem:[%s8352_s0 + $0x7c] sm:$0xf] }
 0x392   :  { %v4894_v25 = vcombine.low %v583_v55, %v593_v3  ;;  %v391_v0 = vsel %vm7441_vm8, %v386_v54, %v390_v9  ;;  %v401_v56 = vsel %vm7441_vm8, %v396_v6, %v400_v24  ;;  %v741_v2 = vrot.slane %v739_v7, 4  ;;  %v5722_v6 = vld [vmem:[%s8352_s0 + $0x80] sm:$0x1]  ;;  %v5723_v28 = vld [vmem:[%s8352_s0 + $0x18] sm:$0xf] }
 0x393   :  { %4149 = vxpose.xlu0.c.b16.cont [7/8] (narrow) %v4125_v47, 16  ;;  %4133 = vxpose.xlu1.c.b16.cont [7/8] (narrow) %v4117_v27, 16  ;;  %v4886_v35 = vcombine.low %v391_v0, %v401_v56  ;;  %v193_v45 = vor.u32 %v192_v53, %v189_v60  ;;  %v203_v42 = vor.u32 %v202_v37, %v198_v52  ;;  %v742_v57 = vshll.u32 %v5715_v50, 16 }
 0x394   :  { %5096 = vmatpush3.bf16.msra.mxu1 %v4894_v25  ;;  %v748_v1 = vshll.u32 %v5716_v51, 16  ;;  %v752_v40 = vshrl.u32 %v5716_v51, 16  ;;  %v758_v22 = vshll.u32 %v5717_v31, 16  ;;  %v547_v18 = vshrl.u32 %v5718_v8, 16  ;;  %v5724_v25 = vld [vmem:[%s8352_s0 + $0x1c] sm:$0xf] }
 0x395   :  { %5073 = vmatprep.subr.bf16.mxu0 %v4886_v35  ;;  %v194_v47 = vrot.slane %v193_v45, 4  ;;  %v204_v27 = vrot.slane %v203_v42, 4  ;;  %v744_v44 = vrot.slane %v742_v57, 5  ;;  %v550_v34 = vshll.u32 %v5718_v8, 16 }
 0x396   :  { %v750_v15 = vrot.slane %v748_v1, 5  ;;  %v754_v39 = vrot.slane %v752_v40, 4  ;;  %v760_v43 = vrot.slane %v758_v22, 5  ;;  %v549_v21 = vrot.slane %v547_v18, 4  ;;  %v5725_v18 = vld [vmem:[%s8352_s0 + $0x144] sm:$0xf] }
 0x397   :  { %4150 = vxpose.xlu0.c.b16.end [8/8] (narrow) %v4126_v38, 16  ;;  %4134 = vxpose.xlu1.c.b16.end [8/8] (narrow) %v4118_v41, 16  ;;  %v199_v4 = vsel %vm7441_vm8, %v194_v47, %v198_v52  ;;  %v209_v13 = vsel %vm7441_vm8, %v204_v27, %v8559_v59  ;;  %v745_v33 = vor.u32 %v744_v44, %v741_v2  ;;  %v552_v10 = vrot.slane %v550_v34, 5  ;;  %v8560_v2 = vld [vmem:[#allocation9_spill] sm:$0xff]  ;;  %v5726_v34 = vld [vmem:[%s8352_s0 + $0x148] sm:$0xf] }
 0x398   :  { %v4878_v29 = vcombine.low %v199_v4, %v209_v13  ;;  %v755_v20 = vor.u32 %v754_v39, %v750_v15  ;;  %v556_v61 = vshll.u32 %v5719_v17, 16  ;;  %v560_v38 = vshrl.u32 %v5719_v17, 16 }
 0x399   :  { %v746_v36 = vrot.slane %v745_v33, 4  ;;  %v553_v30 = vor.u32 %v552_v10, %v549_v21  ;;  %v355_v41 = vshrl.u32 %v5720_v62, 16  ;;  %v358_v9 = vshll.u32 %v5720_v62, 16 }
 0x39a   :  { %5074 = vmatpush3.bf16.msra.mxu0 %v4878_v29  ;;  %v756_v26 = vrot.slane %v755_v20, 4  ;;  %v558_v16 = vrot.slane %v556_v61, 5  ;;  %v562_v55 = vrot.slane %v560_v38, 4  ;;  %v364_v24 = vshll.u32 %v5721_v46, 16 }
 0x39b   :  { %v751_v5 = vsel %vm7441_vm8, %v746_v36, %v750_v15  ;;  %v554_v32 = vrot.slane %v553_v30, 4  ;;  %v357_v19 = vrot.slane %v355_v41, 4  ;;  %v360_v49 = vrot.slane %v358_v9, 5  ;;  %v5728_v30 = vld [vmem:[%s8352_s0 + $0xe4] sm:$0xf] }
 0x39c   :  { %v761_v12 = vsel %vm7441_vm8, %v756_v26, %v760_v43  ;;  %v563_v23 = vor.u32 %v562_v55, %v558_v16  ;;  %v366_v48 = vrot.slane %v364_v24, 5  ;;  %v368_v63 = vshrl.u32 %v5721_v46, 16  ;;  %v5727_v43 = vld [vmem:[%s8352_s0 + $0x14c] sm:$0x1]  ;;  %v8561_v41 = vld [vmem:[#allocation2_spill] sm:$0xff] }
 0x39d   :  { %v4901_v11 = vcombine.low %v751_v5, %v761_v12  ;;  %v559_v14 = vsel %vm7441_vm8, %v554_v32, %v558_v16  ;;  %v361_v54 = vor.u32 %v360_v49, %v357_v19  ;;  %v374_v60 = vshll.u32 %v5722_v6, 16  ;;  %v5729_v55 = vld [vmem:[%s8352_s0 + $0xe8] sm:$0xf]  ;;  %v5731_v6 = vld [vmem:[%s8352_s0 + $0x70] sm:$0xf] }
 0x39e   :  { %v564_v50 = vrot.slane %v563_v23, 4  ;;  %v370_v7 = vrot.slane %v368_v63, 4  ;;  %v163_v3 = vshrl.u32 %v5723_v28, 16  ;;  %v166_v53 = vshll.u32 %v5723_v28, 16 }
 0x39f   :  { %5097 = vmatprep.subr.bf16.mxu1 %v4901_v11  ;;  %v362_v52 = vrot.slane %v361_v54, 4  ;;  %v376_v37 = vrot.slane %v374_v60, 5  ;;  %v172_v0 = vshll.u32 %v5724_v25, 16  ;;  %v176_v56 = vshrl.u32 %v5724_v25, 16 }
 0x3a0   :  { %v569_v35 = vsel %vm7441_vm8, %v564_v50, %v8560_v2  ;;  %v371_v45 = vor.u32 %v370_v7, %v366_v48  ;;  %v165_v42 = vrot.slane %v163_v3, 4  ;;  %v168_v57 = vrot.slane %v166_v53, 5  ;;  %v5732_v2 = vld [vmem:[%s8352_s0 + $0x74] sm:$0x1] }
 0x3a1   :  { %v4893_v51 = vcombine.low %v559_v14, %v569_v35  ;;  %v367_v1 = vsel %vm7441_vm8, %v362_v52, %v366_v48  ;;  %v174_v40 = vrot.slane %v172_v0, 5  ;;  %v178_v31 = vrot.slane %v176_v56, 4  ;;  %v5730_v48 = vld [vmem:[%s8352_s0 + $0x6c] sm:$0xf] }
 0x3a2   :  { %v372_v22 = vrot.slane %v371_v45, 4  ;;  %v169_v8 = vor.u32 %v168_v57, %v165_v42  ;;  %v715_v47 = vshrl.u32 %v5725_v18, 16  ;;  %v718_v27 = vshll.u32 %v5725_v18, 16  ;;  %v5733_v45 = vld [vmem:[%s8352_s0 + $0xc] sm:$0xf] }
 0x3a3   :  { %5098 = vmatpush3.bf16.msra.mxu1 %v4893_v51  ;;  %v179_v44 = vor.u32 %v178_v31, %v174_v40  ;;  %v724_v15 = vshll.u32 %v5726_v34, 16  ;;  %v728_v39 = vshrl.u32 %v5726_v34, 16  ;;  %v734_v21 = vshll.u32 %v5727_v43, 16  ;;  %v8562_v34 = vld [vmem:[#allocation13_spill] sm:$0xff] }
 0x3a4   :  { %v377_v4 = vsel %vm7441_vm8, %v372_v22, %v376_v37  ;;  %v170_v59 = vrot.slane %v169_v8, 4  ;;  %v717_v13 = vrot.slane %v715_v47, 4  ;;  %v720_v33 = vrot.slane %v718_v27, 5  ;;  %v5735_v27 = vld [vmem:[%s8352_s0 + $0x14] sm:$0x1] }
 0x3a5   :  { %v4885_v10 = vcombine.low %v367_v1, %v377_v4  ;;  %v180_v29 = vrot.slane %v179_v44, 4  ;;  %v726_v20 = vrot.slane %v724_v15, 5  ;;  %v730_v17 = vrot.slane %v728_v39, 4 }
 0x3a6   :  { %v175_v61 = vsel %vm7441_vm8, %v170_v59, %v174_v40  ;;  %v721_v38 = vor.u32 %v720_v33, %v717_v13  ;;  %v736_v36 = vrot.slane %v734_v21, 5  ;;  %v523_v62 = vshrl.u32 %v5728_v30, 16  ;;  %v5734_v40 = vld [vmem:[%s8352_s0 + $0x10] sm:$0xf] }
 0x3a7   :  { %5075 = vmatprep.subr.bf16.mxu0 %v4885_v10  ;;  %v185_v9 = vsel %vm7441_vm8, %v180_v29, %v8561_v41  ;;  %v731_v26 = vor.u32 %v730_v17, %v726_v20  ;;  %v526_v16 = vshll.u32 %v5728_v30, 16  ;;  %v532_v46 = vshll.u32 %v5729_v55, 16 }
 0x3a8   :  { %v4877_v24 = vcombine.low %v175_v61, %v185_v9  ;;  %v722_v5 = vrot.slane %v721_v38, 4  ;;  %v525_v32 = vrot.slane %v523_v62, 4  ;;  %v536_v19 = vshrl.u32 %v5729_v55, 16 }
 0x3a9   :  { %v732_v49 = vrot.slane %v731_v26, 4  ;;  %v528_v12 = vrot.slane %v526_v16, 5  ;;  %v534_v23 = vrot.slane %v532_v46, 5  ;;  %v331_v63 = vshrl.u32 %v5730_v48, 16 }
 0x3aa   :  { %5076 = vmatpush3.bf16.msra.mxu0 %v4877_v24  ;;  %v727_v11 = vsel %vm7441_vm8, %v722_v5, %v726_v20  ;;  %v538_v14 = vrot.slane %v536_v19, 4  ;;  %v334_v54 = vshll.u32 %v5730_v48, 16  ;;  %v340_v60 = vshll.u32 %v5731_v6, 16  ;;  %v5498_v24 = vld [vmem:[%s8357_s5 + $0x10] ss:$8 sps:$4 sm:$0xff]  }
 0x3ab   :  { %v737_v50 = vsel %vm7441_vm8, %v732_v49, %v736_v36  ;;  %v529_v7 = vor.u32 %v528_v12, %v525_v32  ;;  %v333_v28 = vrot.slane %v331_v63, 4  ;;  %v344_v3 = vshrl.u32 %v5731_v6, 16  ;;  %v5500_v5 = vld [vmem:[%s8357_s5 + $0x14] ss:$8 sps:$4 sm:$0xff]   ;;  %v5503_v32 = vld [vmem:[%s8357_s5 + $0x4] ss:$8 sps:$4 sm:$0xff]  }
 0x3ac   :  { %v4900_v53 = vcombine.low %v727_v11, %v737_v50  ;;  %v539_v52 = vor.u32 %v538_v14, %v534_v23  ;;  %v336_v37 = vrot.slane %v334_v54, 5  ;;  %v342_v25 = vrot.slane %v340_v60, 5 }
 0x3ad   :  { %v530_v0 = vrot.slane %v529_v7, 4  ;;  %v346_v56 = vrot.slane %v344_v3, 4  ;;  %v350_v35 = vshll.u32 %v5732_v2, 16  ;;  %v139_v42 = vshrl.u32 %v5733_v45, 16  ;;  %v4603_v3 = vld [vmem:[%s8358_s6] sm:$0x77] }
 0x3ae   :  { %5099 = vmatprep.subr.bf16.mxu1 %v4900_v53  ;;  %v540_v57 = vrot.slane %v539_v52, 4  ;;  %v337_v51 = vor.u32 %v336_v37, %v333_v28  ;;  %v142_v1 = vshll.u32 %v5733_v45, 16  ;;  %v148_v31 = vshll.u32 %v5734_v40, 16  ;;  %v4592_v52 = vld [vmem:[%s8358_s6] sm:$0x77] }
 0x3af   :  { %v535_v22 = vsel %vm7441_vm8, %v530_v0, %v534_v23  ;;  %v347_v8 = vor.u32 %v346_v56, %v342_v25  ;;  %v352_v18 = vrot.slane %v350_v35, 5  ;;  %v141_v47 = vrot.slane %v139_v42, 4 }
 0x3b0   :  { %v158_v44 = vshll.u32 %v5735_v27, 16  ;;  %v545_v15 = vsel %vm7441_vm8, %v540_v57, %v8562_v34  ;;  %v338_v39 = vrot.slane %v337_v51, 4  ;;  %v144_v43 = vrot.slane %v142_v1, 5 }
 0x3b1   :  { %v4892_v21 = vcombine.low %v535_v22, %v545_v15  ;;  %v348_v4 = vrot.slane %v347_v8, 4  ;;  %v150_v59 = vrot.slane %v148_v31, 5  ;;  %v152_v13 = vshrl.u32 %v5734_v40, 16 }
 0x3b2   :  { %v343_v33 = vsel %vm7441_vm8, %v338_v39, %v342_v25  ;;  %v145_v10 = vor.u32 %v144_v43, %v141_v47  ;;  %v160_v30 = vrot.slane %v158_v44, 5  ;;  %v5738_v19 = vmov 0  }
 0x3b3   :  { %5100 = vmatpush3.bf16.msra.mxu1 %v4892_v21  ;;  %v353_v29 = vsel %vm7441_vm8, %v348_v4, %v352_v18  ;;  %v154_v20 = vrot.slane %v152_v13, 4  ;;  %v4605_v53 = vcombine.high %v4603_v3, %v4603_v3  ;;  %v4606_v37 = vrot.slane %v4603_v3, 5 }
 0x3b4   :  { %v4884_v17 = vcombine.low %v343_v33, %v353_v29  ;;  %v146_v61 = vrot.slane %v145_v10, 4  ;;  %v4406_v38 = vpop.trf.xlu0  ;;  %v4390_v36 = vpop.trf.xlu1  ;;  %v4594_v25 = vcombine.high %v4592_v52, %v4592_v52 }
 0x3b5   :  { %v155_v62 = vor.u32 %v154_v20, %v150_v59  ;;  %4510 = vmatprep.mubr.bf16.mxu1 %v4406_v38  ;;  %v4607_v0 = vrot.slane %v4605_v53, 5 }
 0x3b6   :  { %5077 = vmatprep.subr.bf16.mxu0 %v4884_v17  ;;  %4511 = vmatmul.mubr.bf16.vlgmr.msra.gmra.mxu1 %v4390_v36  ;;  %v151_v41 = vsel %vm7441_vm8, %v146_v61, %v150_v59 }
 0x3b7   :  { %v156_v9 = vrot.slane %v155_v62, 4 }
 0x3b9   :  { %v161_v26 = vsel %vm7441_vm8, %v156_v9, %v160_v30 }
 0x3ba   :  { %v4876_v16 = vcombine.low %v151_v41, %v161_v26 }
 0x3bc   :  { %5078 = vmatpush3.bf16.msra.mxu0 %v4876_v16 }
 0x3bd   :  { %4563 = vmatprep.subr.bf16.mxu0 %v5500_v5 }
 0x3dd   :  { %v4151_v55 = vpop.trf.xlu0  ;;  %v4135_v46 = vpop.trf.xlu1 }
 0x3de   :  { %4255 = vmatprep.mubr.bf16.mxu0 %v4151_v55 }
 0x3df   :  { %4256 = vmatmul.mubr.bf16.vlgmr.msra.gmra.mxu0 %v4135_v46 }
 0x3e0   :  { %4564 = vmatpush1.bf16.msra.mxu0 %v5498_v24  ;;  %4583 = vmatprep.mubr.bf16.mxu0 %v5738_v19 }
 0x3e1   :  { %4565 = vmatprep.subr.bf16.mxu0 %v5503_v32 }
 0x3e4   :  { %4566 = vmatpush1.bf16.msra.mxu0 %v5501_v58 }
 0x476   :  { %v5101_v49 = vpop.f32.mrf.mxu1 }
 0x478   :  { %v5102_v12 = vpop.f32.mrf.mxu1 }
 0x479   :  { %v5103_v63 = vadd.f32 %v5102_v12, %v5101_v49 }
 0x47a   :  { %v5104_v23 = vpop.f32.mrf.mxu1 }
 0x47b   :  { %v4519_v54 = vrot.slane %v5103_v63, 5 }
 0x47c   :  { %v5105_v48 = vpop.f32.mrf.mxu1 }
 0x49f   :  { %v5079_v11 = vpop.f32.mrf.mxu0 }
 0x4a1   :  { %v5080_v14 = vpop.f32.mrf.mxu0 }
 0x4a2   :  { %v5081_v6 = vadd.f32 %v5080_v14, %v5079_v11 }
 0x4a3   :  { %v5082_v60 = vpop.f32.mrf.mxu0 }
 0x4a4   :  { %v4522_v50 = vsel %vm4521_vm9, %v5081_v6, %v4519_v54 }
 0x4a5   :  { %v4523_v7 = vpack.c.bf16 %v4522_v50, %v4522_v50  ;;  %v5083_v28 = vpop.f32.mrf.mxu0 }
 0x4a7   :  { %4912 = vmatmul.mubr.msk.bf16.vlgmr.msra.gmra.mxu0 %vm1880_vm2, %v4523_v7 }
 0x567   :  { %v4585_v56 = vpop.f32.mrf.mxu0 }
 0x568   :  { %v4596_v35 = vadd.f32 %v4592_v52, %v4585_v56  ;;  %v4610_v45 = vadd.f32 %v4606_v37, %v4585_v56 }
 0x569   :  { %v4587_v2 = vpop.f32.mrf.mxu0 }
 0x56a   :  { %v4597_v42 = vadd.f32 %v4594_v25, %v4587_v2  ;;  %v4611_v57 = vadd.f32 %v4607_v0, %v4587_v2 }
 0x56b   :  { %v4589_v51 = vpop.f32.mrf.mxu0 }
 0x56c   :  { %v4600_v1 = vcombine.low %v4596_v35, %v4597_v42  ;;  %v4614_v40 = vcombine.low %v4610_v45, %v4611_v57  ;;  %v4615_v31 = vcombine.high %v4610_v45, %v4611_v57 }
 0x56d   :  { %v4590_v22 = vpop.f32.mrf.mxu0 }
 0x56e   :  { %4602 = vst [vmem:[%s8359_s7] sm:$0x77] %v4600_v1  ;;  %v4913_v8 = vrot.slane %v4614_v40, 11  ;;  %v4621_v18 = vrot.slane %v4615_v31, 7 }
 0x570   :  { %v4622_v47 = vsel %vm4618_vm12, %v4913_v8, %v4621_v18 }
 0x571   :  { %4914 = vst [vmem:[%s8359_s7 + $0x8] sm:$0x77] %v4622_v47 }

</bundles_post_ra>
